<compile_context>
chip_gen: v6e
topology: v6e:2x2x1
jax: 0.10.0
libtpu: 0.0.40
codegen_flags: <defaults>
</compile_context>

<pallas_src>
import numpy as np
import jax
import jax.numpy as jnp
from jax.experimental import pallas as pl
from jax.experimental.pallas import tpu as pltpu


def _round_up(n, m):
    return ((n + m - 1) // m) * m


# ConvTranspose2d(k=4, s=2, p=1): oh = 2*ih + kh - 1.
# kh (or kw) -> (output parity ph, input read offset dh relative to oh'):
#   kh=0:(ph=1, dh=+1)  kh=1:(ph=0, dh=0)  kh=2:(ph=1, dh=0)  kh=3:(ph=0, dh=-1)
_PHASE = {0: (1, +1), 1: (0, 0), 2: (1, 0), 3: (0, -1)}


# --------------------------- host-side packing (done once) ---------------------------

def _pack_stem_weight(w_lin, c, s, cp, latent):
    """nn.Linear weight (c*s*s, latent) reordered (pq-major, channel-minor) so the stem is
    one matmul: out[pq*cp + cc, :] = w_lin[cc*s*s + pq, :] (pq = p*s + q).  Padded channel
    rows are zero."""
    wl = np.asarray(w_lin, np.float32)
    out = np.zeros((s * s * cp, latent), np.float32)
    for pq in range(s * s):
        out[pq * cp:pq * cp + c, :] = wl[np.arange(c) * (s * s) + pq, :]
    return jnp.asarray(out, jnp.bfloat16)


def _pack_convT_weight(w, cp_in, cp_out, k=4):
    """PyTorch ConvTranspose2d weight (cin, cout, k, k) -> tap-stacked (k*k*cp_out, cp_in)
    bf16; rows [t*cp_out + co] (t = kh*k + kw) hold w[:, co, kh, kw]^T.  Padded rows/cols
    are zero so padded channels stay exactly zero."""
    wn = np.asarray(w, np.float32)
    cin, cout = wn.shape[0], wn.shape[1]
    out = np.zeros((k * k * cp_out, cp_in), np.float32)
    for kh in range(k):
        for kw in range(k):
            t = kh * k + kw
            out[t * cp_out:t * cp_out + cout, :cin] = wn[:, :, kh, kw].T
    return jnp.asarray(out, jnp.bfloat16)


def _build_tap_masks(B, H, W, k=4):
    """(16, B*H*W) f32 validity masks over phase-image positions (b, oh', ow') for tap
    t = kh*4 + kw: 1 where the tap's shifted read stays inside the same image (p=1 border
    and row/batch-boundary handling)."""
    N = B * H * W
    l = np.arange(N)
    ow = l % W
    oh = (l // W) % H
    m = np.ones((k * k, N), np.float32)
    for kh in range(k):
        _, dh = _PHASE[kh]
        for kw in range(k):
            _, dw = _PHASE[kw]
            valid = np.ones(N, bool)
            if dh == -1:
                valid &= oh >= 1
            if dh == +1:
                valid &= oh <= H - 2
            if dw == -1:
                valid &= ow >= 1
            if dw == +1:
                valid &= ow <= W - 2
            m[kh * k + kw] = valid.astype(np.float32)
    return jnp.asarray(m)


def _build_spread(H, W):
    """Per-sample 0/1 sub-pixel spread matrix (H*W, 4*H*W): phase-(0,0) position (oh', ow')
    -> output pixel (2*oh')*(2W) + 2*ow'.  The other 3 phases are obtained by lane shifts
    of the matmul result (offsets 1, 2W, 2W+1 only touch zero lanes).  Batch-independent."""
    Ho, Wo = 2 * H, 2 * W
    S = np.zeros((H * W, Ho * Wo), np.float32)
    for oh in range(H):
        for ow in range(W):
            S[oh * W + ow, (2 * oh) * Wo + 2 * ow] = 1.0
    return jnp.asarray(S, jnp.bfloat16)


def _pad_affine(v, cp, fill):
    out = np.full((cp, 1), fill, np.float32)
    v = np.asarray(v, np.float32)
    out[:v.shape[0], 0] = v
    return jnp.asarray(out)


# --------------------------- in-kernel building blocks ---------------------------

def _shift_lanes(x, k):
    """Zero-filled static shift along the lane (last) axis: out[:, p] = x[:, p - k]."""
    if k == 0:
        return x
    rows, n = x.shape
    assert 0 < abs(k) < n
    z = jnp.zeros((rows, abs(k)), x.dtype)
    if k > 0:
        return jnp.concatenate([z, x[:, :n - k]], axis=1)
    return jnp.concatenate([x[:, -k:], z], axis=1)


def _bn_relu(x, gamma, beta):
    # nn.BatchNorm2d training-mode forward: per-channel stats over all pixels (columns),
    # biased variance, eps=1e-5, affine, then ReLU.  Lane reductions ride the XLU.
    mean = jnp.mean(x, axis=1, keepdims=True)
    var = jnp.mean(jnp.square(x - mean), axis=1, keepdims=True)
    y = (x - mean) * jax.lax.rsqrt(var + 1e-5) * gamma + beta
    return jnp.maximum(y, 0.0)


def _conv_transpose(act, w_ref, m_ref, s_ref, B, H, W, cp_out):
    """ConvTranspose2d(4, stride=2, padding=1, bias=False):
    act (cp_in, B*H*W) f32 -> (cp_out, B*2H*2W) f32, canonical (b, row, col) lane order."""
    Wo = 2 * W
    HW = H * W
    # (a) channel mixing for all 16 taps in ONE bf16 MXU matmul (f32 accumulate).
    taps = jnp.dot(w_ref[...], act.astype(jnp.bfloat16),
                   preferred_element_type=jnp.float32)            # (16*cp_out, B*H*W)
    mask = m_ref[...]                                             # (16, B*H*W)
    # (b) phase-grouped accumulation: 4 taps per output phase, +/-1-pixel shifts + masks.
    phases = [jnp.zeros((cp_out, B * HW), jnp.float32) for _ in range(4)]
    for kh in range(4):
        ph, dh = _PHASE[kh]
        for kw in range(4):
            pw, dw = _PHASE[kw]
            t = kh * 4 + kw
            contrib = _shift_lanes(taps[t * cp_out:(t + 1) * cp_out, :], -(dh * W + dw))
            phases[2 * ph + pw] += contrib * mask[t:t + 1, :]
    stk = jnp.concatenate(phases, axis=0)                         # (4*cp_out, B*H*W)
    # (c) per-sample sub-pixel spread (stride-2 dilation) + phase interleave via shifts.
    outs = []
    for b in range(B):
        z = jnp.dot(stk[:, b * HW:(b + 1) * HW].astype(jnp.bfloat16), s_ref[...],
                    preferred_element_type=jnp.float32)           # (4*cp_out, Ho*Wo)
        y = (z[0 * cp_out:1 * cp_out, :]
             + _shift_lanes(z[1 * cp_out:2 * cp_out, :], 1)
             + _shift_lanes(z[2 * cp_out:3 * cp_out, :], Wo)
             + _shift_lanes(z[3 * cp_out:4 * cp_out, :], Wo + 1))
        outs.append(y)
    return jnp.concatenate(outs, axis=1)                          # (cp_out, B*Ho*Wo)


# --------------------------- parameters & forward ---------------------------

def init_params(key, latent_dim=32, img_size=16, img_channels=3,
                hidden_channels=(8, 16, 32)):
    """Parameters in PyTorch layouts (Linear: (n_out, latent); ConvT: (cin, cout, 4, 4))."""
    n_layers = len(hidden_channels)
    assert img_size % (2 ** n_layers) == 0
    c = hidden_channels[-1]
    s = img_size // 2 ** n_layers
    n_out = c * s * s

    keys = jax.random.split(key, 1 + n_layers)
    params = {
        "w_lin": 0.02 * jax.random.normal(keys[0], (n_out, latent_dim), jnp.float32),
        "bn0_gamma": jnp.ones((c,), jnp.float32),
        "bn0_beta": jnp.zeros((c,), jnp.float32),
        "conv_w": [], "bn_gamma": [], "bn_beta": [],
    }
    chans = list(hidden_channels)[::-1] + [img_channels]
    for li in range(n_layers):
        cin, cout = chans[li], chans[li + 1]
        params["conv_w"].append(
            0.02 * jax.random.normal(keys[1 + li], (cin, cout, 4, 4), jnp.float32))
        if li < n_layers - 1:
            params["bn_gamma"].append(jnp.ones((cout,), jnp.float32))
            params["bn_beta"].append(jnp.zeros((cout,), jnp.float32))
    params["_meta"] = (latent_dim, img_size, img_channels, tuple(hidden_channels))
    return params


def make_forward(params, batch_size):
    """Pack weights / masks / spread matrices once; return a jitted forward:
    x (B, latent) f32 -> image (B, img_channels, img_size, img_size) f32 (NCHW)."""
    latent, img_size, img_ch, hidden = params["_meta"]
    n_layers = len(hidden)
    s = img_size // 2 ** n_layers
    ss = s * s
    B = batch_size
    c0 = hidden[-1]
    cp0 = _round_up(c0, 8)

    consts = [
        _pack_stem_weight(params["w_lin"], c0, s, cp0, latent),
        _pad_affine(params["bn0_gamma"], cp0, 1.0),
        _pad_affine(params["bn0_beta"], cp0, 0.0),
    ]
    chans = list(hidden)[::-1] + [img_ch]
    layer_meta = []                               # (H, W, cp_out, has_bn)
    H = W = s
    cp_in = cp0
    for li in range(n_layers):
        cp_out = _round_up(chans[li + 1], 8)
        consts.append(_pack_convT_weight(params["conv_w"][li], cp_in, cp_out))
        consts.append(_build_tap_masks(B, H, W))
        consts.append(_build_spread(H, W))
        has_bn = li < n_layers - 1
        if has_bn:
            consts.append(_pad_affine(params["bn_gamma"][li], cp_out, 1.0))
            consts.append(_pad_affine(params["bn_beta"][li], cp_out, 0.0))
        layer_meta.append((H, W, cp_out, has_bn))
        H, W = 2 * H, 2 * W
        cp_in = cp_out
    cp_last = cp_in
    hw = img_size * img_size
    out_shape = (cp_last, B * hw)                 # single lane-dense output slab

    def kernel(*refs):
        o_ref = refs[-1]
        xT = refs[0][...]                         # (latent, B) bf16
        wstem, g0, b0 = refs[1], refs[2], refs[3]

        # Stem: Linear(bias=False) as ONE bf16 MXU matmul; the 'b (c w h) -> b c w h'
        # rearrange is a tiny in-VMEM lane permute to canonical (C, b*p*q) layout.
        lin = jnp.dot(wstem[...], xT, preferred_element_type=jnp.float32)  # (ss*cp0, B)
        cols = []
        for b in range(B):
            for pq in range(ss):
                cols.append(lin[pq * cp0:(pq + 1) * cp0, b:b + 1])
        act = jnp.concatenate(cols, axis=1)                                 # (cp0, B*ss)
        act = _bn_relu(act, g0[...], b0[...])

        r = 4
        for (Hl, Wl, cpo, has_bn) in layer_meta:
            w_ref, m_ref, s_ref = refs[r], refs[r + 1], refs[r + 2]
            r += 3
            act = _conv_transpose(act, w_ref, m_ref, s_ref, B, Hl, Wl, cpo)
            if has_bn:
                act = _bn_relu(act, refs[r][...], refs[r + 1][...])
                r += 2

        # Custom Tanh: (e^x - e^-x)/(e^x + e^-x), overflow-safe single-exp form; the
        # divide becomes an EUP reciprocal that co-issues with VPU work.
        t = jnp.exp(-2.0 * jnp.abs(act))
        th = jnp.where(act >= 0, 1.0, -1.0) * ((1.0 - t) * pl.reciprocal(1.0 + t, approx=True))
        o_ref[...] = th.astype(o_ref.dtype)       # one contiguous lane-dense store

    xT_shape = (latent, B)
    in_shapes = [xT_shape] + [tuple(c.shape) for c in consts]
    in_specs = [pl.BlockSpec(shp, (lambda i, nd=len(shp): (0,) * nd))
                for shp in in_shapes]

    call = pl.pallas_call(
        kernel,
        grid=(1,),                                # whole problem resident in VMEM
        in_specs=in_specs,
        out_specs=pl.BlockSpec(out_shape, lambda i: (0, 0)),
        out_shape=jax.ShapeDtypeStruct(out_shape, jnp.float32),
        compiler_params=pltpu.CompilerParams(
            dimension_semantics=("arbitrary",),
            vmem_limit_bytes=32 * 1024 * 1024),   # fits v7x 64 MiB physical with margin
    )

    @jax.jit
    def forward(x):
        assert x.shape == (B, latent)
        out = call(jnp.transpose(x).astype(jnp.bfloat16), *consts)
        out4 = out.reshape(cp_last, B, img_size, img_size)
        # Tiny XLA transpose outside the kernel; drop padded channels.
        return jnp.transpose(out4, (1, 0, 2, 3))[:, :img_ch, :, :]

    return forward


# --------------------------- pure NumPy reference (for verification) ---------------------------

def _ref_bn_relu(h, gamma, beta):
    g = np.asarray(gamma, np.float32).reshape(1, -1, 1, 1)
    bt = np.asarray(beta, np.float32).reshape(1, -1, 1, 1)
    mean = h.mean(axis=(0, 2, 3), keepdims=True)
    var = h.var(axis=(0, 2, 3), keepdims=True)    # biased, as in BN training forward
    return np.maximum((h - mean) / np.sqrt(var + 1e-5) * g + bt, 0.0)


def _ref_conv_transpose(x, w):
    """ConvTranspose2d(k=4, s=2, p=1, bias=False): x (B,Cin,H,W), w (Cin,Cout,4,4)."""
    B, Cin, H, W = x.shape
    Cout = w.shape[1]
    Ho, Wo = 2 * H, 2 * W
    t = np.einsum('bihw,iokl->boklhw', x, w)
    y = np.zeros((B, Cout, Ho + 2, Wo + 2), np.float32)
    for kh in range(4):
        for kw in range(4):
            y[:, :, kh:kh + Ho:2, kw:kw + Wo:2] += t[:, :, kh, kw]
    return y[:, :, 1:1 + Ho, 1:1 + Wo]


def _reference_forward(params, x):
    latent, img_size, img_ch, hidden = params["_meta"]
    n_layers = len(hidden)
    s = img_size // 2 ** n_layers
    c = hidden[-1]
    h = np.asarray(x, np.float32) @ np.asarray(params["w_lin"], np.float32).T
    h = h.reshape(-1, c, s, s)                    # 'b (c w h) -> b c w h'
    h = _ref_bn_relu(h, params["bn0_gamma"], params["bn0_beta"])
    for li in range(n_layers):
        h = _ref_conv_transpose(h, np.asarray(params["conv_w"][li], np.float32))
        if li < n_layers - 1:
            h = _ref_bn_relu(h, params["bn_gamma"][li], params["bn_beta"][li])
    e, em = np.exp(h), np.exp(-h)
    return (e - em) / (e + em)


if __name__ == "__main__":
    key = jax.random.PRNGKey(0)
    k_param, k_x = jax.random.split(key)

    LATENT, IMG_SIZE, IMG_CH = 32, 16, 3
    HIDDEN = (8, 16, 32)
    B = 2

    params = init_params(k_param, LATENT, IMG_SIZE, IMG_CH, HIDDEN)
    fwd = make_forward(params, batch_size=B)

    x = jax.random.normal(k_x, (B, LATENT), jnp.float32)
    out = jax.block_until_ready(fwd(x))

    assert out.shape == (B, IMG_CH, IMG_SIZE, IMG_SIZE), out.shape
    out_np = np.asarray(out)
    assert np.all(np.isfinite(out_np))
    assert np.all(np.abs(out_np) <= 1.0 + 1e-2)   # tanh range (approx-reciprocal slack)

    # bf16 MXU operands -> expect ~1e-2-level deviation from the f32 reference.
    ref = _reference_forward(params, np.asarray(x, np.float32))
    np.testing.assert_allclose(out_np, ref, atol=5e-2, rtol=0.0)

    print("KERNEL_OK")
</pallas_src>

<mosaic_0001>
module attributes {stable_mosaic.version = 11 : i64} {
  func.func @kernel(%arg0: i32, %arg1: memref<32x2xbf16, #tpu.memory_space<vmem>>, %arg2: memref<128x32xbf16, #tpu.memory_space<vmem>>, %arg3: memref<32x1xf32, #tpu.memory_space<vmem>>, %arg4: memref<32x1xf32, #tpu.memory_space<vmem>>, %arg5: memref<256x32xbf16, #tpu.memory_space<vmem>>, %arg6: memref<16x8xf32, #tpu.memory_space<vmem>>, %arg7: memref<4x16xbf16, #tpu.memory_space<vmem>>, %arg8: memref<16x1xf32, #tpu.memory_space<vmem>>, %arg9: memref<16x1xf32, #tpu.memory_space<vmem>>, %arg10: memref<128x16xbf16, #tpu.memory_space<vmem>>, %arg11: memref<16x32xf32, #tpu.memory_space<vmem>>, %arg12: memref<16x64xbf16, #tpu.memory_space<vmem>>, %arg13: memref<8x1xf32, #tpu.memory_space<vmem>>, %arg14: memref<8x1xf32, #tpu.memory_space<vmem>>, %arg15: memref<128x8xbf16, #tpu.memory_space<vmem>>, %arg16: memref<16x128xf32, #tpu.memory_space<vmem>>, %arg17: memref<64x256xbf16, #tpu.memory_space<vmem>>, %arg18: memref<8x512xf32, #tpu.memory_space<vmem>>) attributes {dimension_semantics = [#tpu.dimension_semantics<arbitrary>], iteration_bounds = array<i64: 1>, scalar_prefetch = 0 : i64, scratch_operands = 0 : i64, tpu.core_type = #tpu.core_type<tc>, window_params = [{pipeline_mode = #tpu.pipeline_mode<synchronous>, transform_indices = @transform_0, window_bounds = array<i64: 32, 2>}, {pipeline_mode = #tpu.pipeline_mode<synchronous>, transform_indices = @transform_1, window_bounds = array<i64: 128, 32>}, {pipeline_mode = #tpu.pipeline_mode<synchronous>, transform_indices = @transform_2, window_bounds = array<i64: 32, 1>}, {pipeline_mode = #tpu.pipeline_mode<synchronous>, transform_indices = @transform_3, window_bounds = array<i64: 32, 1>}, {pipeline_mode = #tpu.pipeline_mode<synchronous>, transform_indices = @transform_4, window_bounds = array<i64: 256, 32>}, {pipeline_mode = #tpu.pipeline_mode<synchronous>, transform_indices = @transform_5, window_bounds = array<i64: 16, 8>}, {pipeline_mode = #tpu.pipeline_mode<synchronous>, transform_indices = @transform_6, window_bounds = array<i64: 4, 16>}, {pipeline_mode = #tpu.pipeline_mode<synchronous>, transform_indices = @transform_7, window_bounds = array<i64: 16, 1>}, {pipeline_mode = #tpu.pipeline_mode<synchronous>, transform_indices = @transform_8, window_bounds = array<i64: 16, 1>}, {pipeline_mode = #tpu.pipeline_mode<synchronous>, transform_indices = @transform_9, window_bounds = array<i64: 128, 16>}, {pipeline_mode = #tpu.pipeline_mode<synchronous>, transform_indices = @transform_10, window_bounds = array<i64: 16, 32>}, {pipeline_mode = #tpu.pipeline_mode<synchronous>, transform_indices = @transform_11, window_bounds = array<i64: 16, 64>}, {pipeline_mode = #tpu.pipeline_mode<synchronous>, transform_indices = @transform_12, window_bounds = array<i64: 8, 1>}, {pipeline_mode = #tpu.pipeline_mode<synchronous>, transform_indices = @transform_13, window_bounds = array<i64: 8, 1>}, {pipeline_mode = #tpu.pipeline_mode<synchronous>, transform_indices = @transform_14, window_bounds = array<i64: 128, 8>}, {pipeline_mode = #tpu.pipeline_mode<synchronous>, transform_indices = @transform_15, window_bounds = array<i64: 16, 128>}, {pipeline_mode = #tpu.pipeline_mode<synchronous>, transform_indices = @transform_16, window_bounds = array<i64: 64, 256>}, {pipeline_mode = #tpu.pipeline_mode<synchronous>, transform_indices = @transform_17, window_bounds = array<i64: 8, 512>}]} {
    %c0 = arith.constant 0 : index
    %c0_0 = arith.constant 0 : index
    %0 = vector.load %arg1[%c0, %c0_0] : memref<32x2xbf16, #tpu.memory_space<vmem>>, vector<32x2xbf16>
    %c0_1 = arith.constant 0 : index
    %c0_2 = arith.constant 0 : index
    %1 = vector.load %arg2[%c0_1, %c0_2] : memref<128x32xbf16, #tpu.memory_space<vmem>>, vector<128x32xbf16>
    %cst = arith.constant dense<0.000000e+00> : vector<128x2xf32>
    %2 = tpu.matmul %1, %0, %cst {dimension_numbers = #tpu.dot_dimension_numbers<[1], [0], [0], [1], [0, 0, 1, 1], [], []>} : vector<128x32xbf16>, vector<32x2xbf16>, vector<128x2xf32> -> vector<128x2xf32>
    %3 = vector.extract_strided_slice %2 {offsets = [0, 0], sizes = [32, 1], strides = [1, 1]} : vector<128x2xf32> to vector<32x1xf32>
    %4 = vector.extract_strided_slice %2 {offsets = [32, 0], sizes = [32, 1], strides = [1, 1]} : vector<128x2xf32> to vector<32x1xf32>
    %5 = vector.extract_strided_slice %2 {offsets = [64, 0], sizes = [32, 1], strides = [1, 1]} : vector<128x2xf32> to vector<32x1xf32>
    %6 = vector.extract_strided_slice %2 {offsets = [96, 0], sizes = [32, 1], strides = [1, 1]} : vector<128x2xf32> to vector<32x1xf32>
    %7 = vector.extract_strided_slice %2 {offsets = [0, 1], sizes = [32, 1], strides = [1, 1]} : vector<128x2xf32> to vector<32x1xf32>
    %8 = vector.extract_strided_slice %2 {offsets = [32, 1], sizes = [32, 1], strides = [1, 1]} : vector<128x2xf32> to vector<32x1xf32>
    %9 = vector.extract_strided_slice %2 {offsets = [64, 1], sizes = [32, 1], strides = [1, 1]} : vector<128x2xf32> to vector<32x1xf32>
    %10 = vector.extract_strided_slice %2 {offsets = [96, 1], sizes = [32, 1], strides = [1, 1]} : vector<128x2xf32> to vector<32x1xf32>
    %11 = tpu.concatenate %3, %4, %5, %6, %7, %8, %9, %10 in 1 : vector<32x1xf32>, vector<32x1xf32>, vector<32x1xf32>, vector<32x1xf32>, vector<32x1xf32>, vector<32x1xf32>, vector<32x1xf32>, vector<32x1xf32> -> vector<32x8xf32>
    %c0_3 = arith.constant 0 : index
    %c0_4 = arith.constant 0 : index
    %12 = vector.load %arg3[%c0_3, %c0_4] : memref<32x1xf32, #tpu.memory_space<vmem>>, vector<32x1xf32>
    %c0_5 = arith.constant 0 : index
    %c0_6 = arith.constant 0 : index
    %13 = vector.load %arg4[%c0_5, %c0_6] : memref<32x1xf32, #tpu.memory_space<vmem>>, vector<32x1xf32>
    %cst_7 = arith.constant dense<0.000000e+00> : vector<32xf32>
    %14 = vector.multi_reduction <add>, %11, %cst_7 [1] : vector<32x8xf32> to vector<32xf32>
    %15 = vector.shape_cast %14 : vector<32xf32> to vector<32x1xf32>
    %cst_8 = arith.constant 8.000000e+00 : f32
    %16 = vector.broadcast %cst_8 : f32 to vector<32x1xf32>
    %17 = arith.divf %15, %16 : vector<32x1xf32>
    %18 = vector.broadcast %17 : vector<32x1xf32> to vector<32x8xf32>
    %19 = arith.subf %11, %18 : vector<32x8xf32>
    %20 = arith.mulf %19, %19 : vector<32x8xf32>
    %cst_9 = arith.constant dense<0.000000e+00> : vector<32xf32>
    %21 = vector.multi_reduction <add>, %20, %cst_9 [1] : vector<32x8xf32> to vector<32xf32>
    %22 = vector.shape_cast %21 : vector<32xf32> to vector<32x1xf32>
    %cst_10 = arith.constant 8.000000e+00 : f32
    %23 = vector.broadcast %cst_10 : f32 to vector<32x1xf32>
    %24 = arith.divf %22, %23 : vector<32x1xf32>
    %25 = vector.broadcast %17 : vector<32x1xf32> to vector<32x8xf32>
    %26 = arith.subf %11, %25 : vector<32x8xf32>
    %cst_11 = arith.constant 9.99999974E-6 : f32
    %27 = vector.broadcast %cst_11 : f32 to vector<32x1xf32>
    %28 = arith.addf %24, %27 : vector<32x1xf32>
    %29 = math.rsqrt %28 : vector<32x1xf32>
    %30 = vector.broadcast %29 : vector<32x1xf32> to vector<32x8xf32>
    %31 = arith.mulf %26, %30 : vector<32x8xf32>
    %32 = vector.broadcast %12 : vector<32x1xf32> to vector<32x8xf32>
    %33 = arith.mulf %31, %32 : vector<32x8xf32>
    %34 = vector.broadcast %13 : vector<32x1xf32> to vector<32x8xf32>
    %35 = arith.addf %33, %34 : vector<32x8xf32>
    %cst_12 = arith.constant 0.000000e+00 : f32
    %36 = vector.broadcast %cst_12 : f32 to vector<32x8xf32>
    %37 = arith.maximumf %35, %36 : vector<32x8xf32>
    %c0_13 = arith.constant 0 : index
    %c0_14 = arith.constant 0 : index
    %38 = vector.load %arg5[%c0_13, %c0_14] : memref<256x32xbf16, #tpu.memory_space<vmem>>, vector<256x32xbf16>
    %39 = arith.truncf %37 : vector<32x8xf32> to vector<32x8xbf16>
    %cst_15 = arith.constant dense<0.000000e+00> : vector<256x8xf32>
    %40 = tpu.matmul %38, %39, %cst_15 {dimension_numbers = #tpu.dot_dimension_numbers<[1], [0], [0], [1], [0, 0, 1, 1], [], []>} : vector<256x32xbf16>, vector<32x8xbf16>, vector<256x8xf32> -> vector<256x8xf32>
    %c0_16 = arith.constant 0 : index
    %c0_17 = arith.constant 0 : index
    %41 = vector.load %arg6[%c0_16, %c0_17] : memref<16x8xf32, #tpu.memory_space<vmem>>, vector<16x8xf32>
    %cst_18 = arith.constant 0.000000e+00 : f32
    %42 = vector.broadcast %cst_18 : f32 to vector<16x8xf32>
    %cst_19 = arith.constant 0.000000e+00 : f32
    %43 = vector.broadcast %cst_19 : f32 to vector<16x8xf32>
    %cst_20 = arith.constant 0.000000e+00 : f32
    %44 = vector.broadcast %cst_20 : f32 to vector<16x8xf32>
    %cst_21 = arith.constant 0.000000e+00 : f32
    %45 = vector.broadcast %cst_21 : f32 to vector<16x8xf32>
    %46 = vector.extract_strided_slice %40 {offsets = [0, 0], sizes = [16, 8], strides = [1, 1]} : vector<256x8xf32> to vector<16x8xf32>
    %cst_22 = arith.constant 0.000000e+00 : f32
    %47 = vector.broadcast %cst_22 : f32 to vector<16x3xf32>
    %48 = vector.extract_strided_slice %46 {offsets = [0, 3], sizes = [16, 5], strides = [1, 1]} : vector<16x8xf32> to vector<16x5xf32>
    %49 = tpu.concatenate %48, %47 in 1 : vector<16x5xf32>, vector<16x3xf32> -> vector<16x8xf32>
    %50 = vector.extract_strided_slice %41 {offsets = [0, 0], sizes = [1, 8], strides = [1, 1]} : vector<16x8xf32> to vector<1x8xf32>
    %51 = vector.broadcast %50 : vector<1x8xf32> to vector<16x8xf32>
    %52 = arith.mulf %49, %51 : vector<16x8xf32>
    %53 = arith.addf %45, %52 : vector<16x8xf32>
    %54 = vector.extract_strided_slice %40 {offsets = [16, 0], sizes = [16, 8], strides = [1, 1]} : vector<256x8xf32> to vector<16x8xf32>
    %cst_23 = arith.constant 0.000000e+00 : f32
    %55 = vector.broadcast %cst_23 : f32 to vector<16x2xf32>
    %56 = vector.extract_strided_slice %54 {offsets = [0, 2], sizes = [16, 6], strides = [1, 1]} : vector<16x8xf32> to vector<16x6xf32>
    %57 = tpu.concatenate %56, %55 in 1 : vector<16x6xf32>, vector<16x2xf32> -> vector<16x8xf32>
    %58 = vector.extract_strided_slice %41 {offsets = [1, 0], sizes = [1, 8], strides = [1, 1]} : vector<16x8xf32> to vector<1x8xf32>
    %59 = vector.broadcast %58 : vector<1x8xf32> to vector<16x8xf32>
    %60 = arith.mulf %57, %59 : vector<16x8xf32>
    %61 = arith.addf %44, %60 : vector<16x8xf32>
    %62 = vector.extract_strided_slice %40 {offsets = [32, 0], sizes = [16, 8], strides = [1, 1]} : vector<256x8xf32> to vector<16x8xf32>
    %cst_24 = arith.constant 0.000000e+00 : f32
    %63 = vector.broadcast %cst_24 : f32 to vector<16x2xf32>
    %64 = vector.extract_strided_slice %62 {offsets = [0, 2], sizes = [16, 6], strides = [1, 1]} : vector<16x8xf32> to vector<16x6xf32>
    %65 = tpu.concatenate %64, %63 in 1 : vector<16x6xf32>, vector<16x2xf32> -> vector<16x8xf32>
    %66 = vector.extract_strided_slice %41 {offsets = [2, 0], sizes = [1, 8], strides = [1, 1]} : vector<16x8xf32> to vector<1x8xf32>
    %67 = vector.broadcast %66 : vector<1x8xf32> to vector<16x8xf32>
    %68 = arith.mulf %65, %67 : vector<16x8xf32>
    %69 = arith.addf %53, %68 : vector<16x8xf32>
    %70 = vector.extract_strided_slice %40 {offsets = [48, 0], sizes = [16, 8], strides = [1, 1]} : vector<256x8xf32> to vector<16x8xf32>
    %cst_25 = arith.constant 0.000000e+00 : f32
    %71 = vector.broadcast %cst_25 : f32 to vector<16x1xf32>
    %72 = vector.extract_strided_slice %70 {offsets = [0, 1], sizes = [16, 7], strides = [1, 1]} : vector<16x8xf32> to vector<16x7xf32>
    %73 = tpu.concatenate %72, %71 in 1 : vector<16x7xf32>, vector<16x1xf32> -> vector<16x8xf32>
    %74 = vector.extract_strided_slice %41 {offsets = [3, 0], sizes = [1, 8], strides = [1, 1]} : vector<16x8xf32> to vector<1x8xf32>
    %75 = vector.broadcast %74 : vector<1x8xf32> to vector<16x8xf32>
    %76 = arith.mulf %73, %75 : vector<16x8xf32>
    %77 = arith.addf %61, %76 : vector<16x8xf32>
    %78 = vector.extract_strided_slice %40 {offsets = [64, 0], sizes = [16, 8], strides = [1, 1]} : vector<256x8xf32> to vector<16x8xf32>
    %cst_26 = arith.constant 0.000000e+00 : f32
    %79 = vector.broadcast %cst_26 : f32 to vector<16x1xf32>
    %80 = vector.extract_strided_slice %78 {offsets = [0, 1], sizes = [16, 7], strides = [1, 1]} : vector<16x8xf32> to vector<16x7xf32>
    %81 = tpu.concatenate %80, %79 in 1 : vector<16x7xf32>, vector<16x1xf32> -> vector<16x8xf32>
    %82 = vector.extract_strided_slice %41 {offsets = [4, 0], sizes = [1, 8], strides = [1, 1]} : vector<16x8xf32> to vector<1x8xf32>
    %83 = vector.broadcast %82 : vector<1x8xf32> to vector<16x8xf32>
    %84 = arith.mulf %81, %83 : vector<16x8xf32>
    %85 = arith.addf %43, %84 : vector<16x8xf32>
    %86 = vector.extract_strided_slice %40 {offsets = [80, 0], sizes = [16, 8], strides = [1, 1]} : vector<256x8xf32> to vector<16x8xf32>
    %87 = vector.extract_strided_slice %41 {offsets = [5, 0], sizes = [1, 8], strides = [1, 1]} : vector<16x8xf32> to vector<1x8xf32>
    %88 = vector.broadcast %87 : vector<1x8xf32> to vector<16x8xf32>
    %89 = arith.mulf %86, %88 : vector<16x8xf32>
    %90 = arith.addf %42, %89 : vector<16x8xf32>
    %91 = vector.extract_strided_slice %40 {offsets = [96, 0], sizes = [16, 8], strides = [1, 1]} : vector<256x8xf32> to vector<16x8xf32>
    %92 = vector.extract_strided_slice %41 {offsets = [6, 0], sizes = [1, 8], strides = [1, 1]} : vector<16x8xf32> to vector<1x8xf32>
    %93 = vector.broadcast %92 : vector<1x8xf32> to vector<16x8xf32>
    %94 = arith.mulf %91, %93 : vector<16x8xf32>
    %95 = arith.addf %85, %94 : vector<16x8xf32>
    %96 = vector.extract_strided_slice %40 {offsets = [112, 0], sizes = [16, 8], strides = [1, 1]} : vector<256x8xf32> to vector<16x8xf32>
    %cst_27 = arith.constant 0.000000e+00 : f32
    %97 = vector.broadcast %cst_27 : f32 to vector<16x1xf32>
    %98 = vector.extract_strided_slice %96 {offsets = [0, 0], sizes = [16, 7], strides = [1, 1]} : vector<16x8xf32> to vector<16x7xf32>
    %99 = tpu.concatenate %97, %98 in 1 : vector<16x1xf32>, vector<16x7xf32> -> vector<16x8xf32>
    %100 = vector.extract_strided_slice %41 {offsets = [7, 0], sizes = [1, 8], strides = [1, 1]} : vector<16x8xf32> to vector<1x8xf32>
    %101 = vector.broadcast %100 : vector<1x8xf32> to vector<16x8xf32>
    %102 = arith.mulf %99, %101 : vector<16x8xf32>
    %103 = arith.addf %90, %102 : vector<16x8xf32>
    %104 = vector.extract_strided_slice %40 {offsets = [128, 0], sizes = [16, 8], strides = [1, 1]} : vector<256x8xf32> to vector<16x8xf32>
    %cst_28 = arith.constant 0.000000e+00 : f32
    %105 = vector.broadcast %cst_28 : f32 to vector<16x1xf32>
    %106 = vector.extract_strided_slice %104 {offsets = [0, 1], sizes = [16, 7], strides = [1, 1]} : vector<16x8xf32> to vector<16x7xf32>
    %107 = tpu.concatenate %106, %105 in 1 : vector<16x7xf32>, vector<16x1xf32> -> vector<16x8xf32>
    %108 = vector.extract_strided_slice %41 {offsets = [8, 0], sizes = [1, 8], strides = [1, 1]} : vector<16x8xf32> to vector<1x8xf32>
    %109 = vector.broadcast %108 : vector<1x8xf32> to vector<16x8xf32>
    %110 = arith.mulf %107, %109 : vector<16x8xf32>
    %111 = arith.addf %69, %110 : vector<16x8xf32>
    %112 = vector.extract_strided_slice %40 {offsets = [144, 0], sizes = [16, 8], strides = [1, 1]} : vector<256x8xf32> to vector<16x8xf32>
    %113 = vector.extract_strided_slice %41 {offsets = [9, 0], sizes = [1, 8], strides = [1, 1]} : vector<16x8xf32> to vector<1x8xf32>
    %114 = vector.broadcast %113 : vector<1x8xf32> to vector<16x8xf32>
    %115 = arith.mulf %112, %114 : vector<16x8xf32>
    %116 = arith.addf %77, %115 : vector<16x8xf32>
    %117 = vector.extract_strided_slice %40 {offsets = [160, 0], sizes = [16, 8], strides = [1, 1]} : vector<256x8xf32> to vector<16x8xf32>
    %118 = vector.extract_strided_slice %41 {offsets = [10, 0], sizes = [1, 8], strides = [1, 1]} : vector<16x8xf32> to vector<1x8xf32>
    %119 = vector.broadcast %118 : vector<1x8xf32> to vector<16x8xf32>
    %120 = arith.mulf %117, %119 : vector<16x8xf32>
    %121 = arith.addf %111, %120 : vector<16x8xf32>
    %122 = vector.extract_strided_slice %40 {offsets = [176, 0], sizes = [16, 8], strides = [1, 1]} : vector<256x8xf32> to vector<16x8xf32>
    %cst_29 = arith.constant 0.000000e+00 : f32
    %123 = vector.broadcast %cst_29 : f32 to vector<16x1xf32>
    %124 = vector.extract_strided_slice %122 {offsets = [0, 0], sizes = [16, 7], strides = [1, 1]} : vector<16x8xf32> to vector<16x7xf32>
    %125 = tpu.concatenate %123, %124 in 1 : vector<16x1xf32>, vector<16x7xf32> -> vector<16x8xf32>
    %126 = vector.extract_strided_slice %41 {offsets = [11, 0], sizes = [1, 8], strides = [1, 1]} : vector<16x8xf32> to vector<1x8xf32>
    %127 = vector.broadcast %126 : vector<1x8xf32> to vector<16x8xf32>
    %128 = arith.mulf %125, %127 : vector<16x8xf32>
    %129 = arith.addf %116, %128 : vector<16x8xf32>
    %130 = vector.extract_strided_slice %40 {offsets = [192, 0], sizes = [16, 8], strides = [1, 1]} : vector<256x8xf32> to vector<16x8xf32>
    %cst_30 = arith.constant 0.000000e+00 : f32
    %131 = vector.broadcast %cst_30 : f32 to vector<16x1xf32>
    %132 = vector.extract_strided_slice %130 {offsets = [0, 0], sizes = [16, 7], strides = [1, 1]} : vector<16x8xf32> to vector<16x7xf32>
    %133 = tpu.concatenate %131, %132 in 1 : vector<16x1xf32>, vector<16x7xf32> -> vector<16x8xf32>
    %134 = vector.extract_strided_slice %41 {offsets = [12, 0], sizes = [1, 8], strides = [1, 1]} : vector<16x8xf32> to vector<1x8xf32>
    %135 = vector.broadcast %134 : vector<1x8xf32> to vector<16x8xf32>
    %136 = arith.mulf %133, %135 : vector<16x8xf32>
    %137 = arith.addf %95, %136 : vector<16x8xf32>
    %138 = vector.extract_strided_slice %40 {offsets = [208, 0], sizes = [16, 8], strides = [1, 1]} : vector<256x8xf32> to vector<16x8xf32>
    %cst_31 = arith.constant 0.000000e+00 : f32
    %139 = vector.broadcast %cst_31 : f32 to vector<16x2xf32>
    %140 = vector.extract_strided_slice %138 {offsets = [0, 0], sizes = [16, 6], strides = [1, 1]} : vector<16x8xf32> to vector<16x6xf32>
    %141 = tpu.concatenate %139, %140 in 1 : vector<16x2xf32>, vector<16x6xf32> -> vector<16x8xf32>
    %142 = vector.extract_strided_slice %41 {offsets = [13, 0], sizes = [1, 8], strides = [1, 1]} : vector<16x8xf32> to vector<1x8xf32>
    %143 = vector.broadcast %142 : vector<1x8xf32> to vector<16x8xf32>
    %144 = arith.mulf %141, %143 : vector<16x8xf32>
    %145 = arith.addf %103, %144 : vector<16x8xf32>
    %146 = vector.extract_strided_slice %40 {offsets = [224, 0], sizes = [16, 8], strides = [1, 1]} : vector<256x8xf32> to vector<16x8xf32>
    %cst_32 = arith.constant 0.000000e+00 : f32
    %147 = vector.broadcast %cst_32 : f32 to vector<16x2xf32>
    %148 = vector.extract_strided_slice %146 {offsets = [0, 0], sizes = [16, 6], strides = [1, 1]} : vector<16x8xf32> to vector<16x6xf32>
    %149 = tpu.concatenate %147, %148 in 1 : vector<16x2xf32>, vector<16x6xf32> -> vector<16x8xf32>
    %150 = vector.extract_strided_slice %41 {offsets = [14, 0], sizes = [1, 8], strides = [1, 1]} : vector<16x8xf32> to vector<1x8xf32>
    %151 = vector.broadcast %150 : vector<1x8xf32> to vector<16x8xf32>
    %152 = arith.mulf %149, %151 : vector<16x8xf32>
    %153 = arith.addf %137, %152 : vector<16x8xf32>
    %154 = vector.extract_strided_slice %40 {offsets = [240, 0], sizes = [16, 8], strides = [1, 1]} : vector<256x8xf32> to vector<16x8xf32>
    %cst_33 = arith.constant 0.000000e+00 : f32
    %155 = vector.broadcast %cst_33 : f32 to vector<16x3xf32>
    %156 = vector.extract_strided_slice %154 {offsets = [0, 0], sizes = [16, 5], strides = [1, 1]} : vector<16x8xf32> to vector<16x5xf32>
    %157 = tpu.concatenate %155, %156 in 1 : vector<16x3xf32>, vector<16x5xf32> -> vector<16x8xf32>
    %158 = vector.extract_strided_slice %41 {offsets = [15, 0], sizes = [1, 8], strides = [1, 1]} : vector<16x8xf32> to vector<1x8xf32>
    %159 = vector.broadcast %158 : vector<1x8xf32> to vector<16x8xf32>
    %160 = arith.mulf %157, %159 : vector<16x8xf32>
    %161 = arith.addf %145, %160 : vector<16x8xf32>
    %162 = tpu.concatenate %161, %153, %129, %121 in 0 : vector<16x8xf32>, vector<16x8xf32>, vector<16x8xf32>, vector<16x8xf32> -> vector<64x8xf32>
    %163 = vector.extract_strided_slice %162 {offsets = [0, 0], sizes = [64, 4], strides = [1, 1]} : vector<64x8xf32> to vector<64x4xf32>
    %164 = arith.truncf %163 : vector<64x4xf32> to vector<64x4xbf16>
    %c0_34 = arith.constant 0 : index
    %c0_35 = arith.constant 0 : index
    %165 = vector.load %arg7[%c0_34, %c0_35] : memref<4x16xbf16, #tpu.memory_space<vmem>>, vector<4x16xbf16>
    %cst_36 = arith.constant dense<0.000000e+00> : vector<64x16xf32>
    %166 = tpu.matmul %164, %165, %cst_36 {dimension_numbers = #tpu.dot_dimension_numbers<[1], [0], [0], [1], [0, 0, 1, 1], [], []>} : vector<64x4xbf16>, vector<4x16xbf16>, vector<64x16xf32> -> vector<64x16xf32>
    %167 = vector.extract_strided_slice %166 {offsets = [0, 0], sizes = [16, 16], strides = [1, 1]} : vector<64x16xf32> to vector<16x16xf32>
    %168 = vector.extract_strided_slice %166 {offsets = [16, 0], sizes = [16, 16], strides = [1, 1]} : vector<64x16xf32> to vector<16x16xf32>
    %cst_37 = arith.constant 0.000000e+00 : f32
    %169 = vector.broadcast %cst_37 : f32 to vector<16x1xf32>
    %170 = vector.extract_strided_slice %168 {offsets = [0, 0], sizes = [16, 15], strides = [1, 1]} : vector<16x16xf32> to vector<16x15xf32>
    %171 = tpu.concatenate %169, %170 in 1 : vector<16x1xf32>, vector<16x15xf32> -> vector<16x16xf32>
    %172 = arith.addf %167, %171 : vector<16x16xf32>
    %173 = vector.extract_strided_slice %166 {offsets = [32, 0], sizes = [16, 16], strides = [1, 1]} : vector<64x16xf32> to vector<16x16xf32>
    %cst_38 = arith.constant 0.000000e+00 : f32
    %174 = vector.broadcast %cst_38 : f32 to vector<16x4xf32>
    %175 = vector.extract_strided_slice %173 {offsets = [0, 0], sizes = [16, 12], strides = [1, 1]} : vector<16x16xf32> to vector<16x12xf32>
    %176 = tpu.concatenate %174, %175 in 1 : vector<16x4xf32>, vector<16x12xf32> -> vector<16x16xf32>
    %177 = arith.addf %172, %176 : vector<16x16xf32>
    %178 = vector.extract_strided_slice %166 {offsets = [48, 0], sizes = [16, 16], strides = [1, 1]} : vector<64x16xf32> to vector<16x16xf32>
    %cst_39 = arith.constant 0.000000e+00 : f32
    %179 = vector.broadcast %cst_39 : f32 to vector<16x5xf32>
    %180 = vector.extract_strided_slice %178 {offsets = [0, 0], sizes = [16, 11], strides = [1, 1]} : vector<16x16xf32> to vector<16x11xf32>
    %181 = tpu.concatenate %179, %180 in 1 : vector<16x5xf32>, vector<16x11xf32> -> vector<16x16xf32>
    %182 = arith.addf %177, %181 : vector<16x16xf32>
    %183 = vector.extract_strided_slice %162 {offsets = [0, 4], sizes = [64, 4], strides = [1, 1]} : vector<64x8xf32> to vector<64x4xf32>
    %184 = arith.truncf %183 : vector<64x4xf32> to vector<64x4xbf16>
    %c0_40 = arith.constant 0 : index
    %c0_41 = arith.constant 0 : index
    %185 = vector.load %arg7[%c0_40, %c0_41] : memref<4x16xbf16, #tpu.memory_space<vmem>>, vector<4x16xbf16>
    %cst_42 = arith.constant dense<0.000000e+00> : vector<64x16xf32>
    %186 = tpu.matmul %184, %185, %cst_42 {dimension_numbers = #tpu.dot_dimension_numbers<[1], [0], [0], [1], [0, 0, 1, 1], [], []>} : vector<64x4xbf16>, vector<4x16xbf16>, vector<64x16xf32> -> vector<64x16xf32>
    %187 = vector.extract_strided_slice %186 {offsets = [0, 0], sizes = [16, 16], strides = [1, 1]} : vector<64x16xf32> to vector<16x16xf32>
    %188 = vector.extract_strided_slice %186 {offsets = [16, 0], sizes = [16, 16], strides = [1, 1]} : vector<64x16xf32> to vector<16x16xf32>
    %cst_43 = arith.constant 0.000000e+00 : f32
    %189 = vector.broadcast %cst_43 : f32 to vector<16x1xf32>
    %190 = vector.extract_strided_slice %188 {offsets = [0, 0], sizes = [16, 15], strides = [1, 1]} : vector<16x16xf32> to vector<16x15xf32>
    %191 = tpu.concatenate %189, %190 in 1 : vector<16x1xf32>, vector<16x15xf32> -> vector<16x16xf32>
    %192 = arith.addf %187, %191 : vector<16x16xf32>
    %193 = vector.extract_strided_slice %186 {offsets = [32, 0], sizes = [16, 16], strides = [1, 1]} : vector<64x16xf32> to vector<16x16xf32>
    %cst_44 = arith.constant 0.000000e+00 : f32
    %194 = vector.broadcast %cst_44 : f32 to vector<16x4xf32>
    %195 = vector.extract_strided_slice %193 {offsets = [0, 0], sizes = [16, 12], strides = [1, 1]} : vector<16x16xf32> to vector<16x12xf32>
    %196 = tpu.concatenate %194, %195 in 1 : vector<16x4xf32>, vector<16x12xf32> -> vector<16x16xf32>
    %197 = arith.addf %192, %196 : vector<16x16xf32>
    %198 = vector.extract_strided_slice %186 {offsets = [48, 0], sizes = [16, 16], strides = [1, 1]} : vector<64x16xf32> to vector<16x16xf32>
    %cst_45 = arith.constant 0.000000e+00 : f32
    %199 = vector.broadcast %cst_45 : f32 to vector<16x5xf32>
    %200 = vector.extract_strided_slice %198 {offsets = [0, 0], sizes = [16, 11], strides = [1, 1]} : vector<16x16xf32> to vector<16x11xf32>
    %201 = tpu.concatenate %199, %200 in 1 : vector<16x5xf32>, vector<16x11xf32> -> vector<16x16xf32>
    %202 = arith.addf %197, %201 : vector<16x16xf32>
    %203 = tpu.concatenate %182, %202 in 1 : vector<16x16xf32>, vector<16x16xf32> -> vector<16x32xf32>
    %c0_46 = arith.constant 0 : index
    %c0_47 = arith.constant 0 : index
    %204 = vector.load %arg8[%c0_46, %c0_47] : memref<16x1xf32, #tpu.memory_space<vmem>>, vector<16x1xf32>
    %c0_48 = arith.constant 0 : index
    %c0_49 = arith.constant 0 : index
    %205 = vector.load %arg9[%c0_48, %c0_49] : memref<16x1xf32, #tpu.memory_space<vmem>>, vector<16x1xf32>
    %cst_50 = arith.constant dense<0.000000e+00> : vector<16xf32>
    %206 = vector.multi_reduction <add>, %203, %cst_50 [1] : vector<16x32xf32> to vector<16xf32>
    %207 = vector.shape_cast %206 : vector<16xf32> to vector<16x1xf32>
    %cst_51 = arith.constant 3.200000e+01 : f32
    %208 = vector.broadcast %cst_51 : f32 to vector<16x1xf32>
    %209 = arith.divf %207, %208 : vector<16x1xf32>
    %210 = vector.broadcast %209 : vector<16x1xf32> to vector<16x32xf32>
    %211 = arith.subf %203, %210 : vector<16x32xf32>
    %212 = arith.mulf %211, %211 : vector<16x32xf32>
    %cst_52 = arith.constant dense<0.000000e+00> : vector<16xf32>
    %213 = vector.multi_reduction <add>, %212, %cst_52 [1] : vector<16x32xf32> to vector<16xf32>
    %214 = vector.shape_cast %213 : vector<16xf32> to vector<16x1xf32>
    %cst_53 = arith.constant 3.200000e+01 : f32
    %215 = vector.broadcast %cst_53 : f32 to vector<16x1xf32>
    %216 = arith.divf %214, %215 : vector<16x1xf32>
    %217 = vector.broadcast %209 : vector<16x1xf32> to vector<16x32xf32>
    %218 = arith.subf %203, %217 : vector<16x32xf32>
    %cst_54 = arith.constant 9.99999974E-6 : f32
    %219 = vector.broadcast %cst_54 : f32 to vector<16x1xf32>
    %220 = arith.addf %216, %219 : vector<16x1xf32>
    %221 = math.rsqrt %220 : vector<16x1xf32>
    %222 = vector.broadcast %221 : vector<16x1xf32> to vector<16x32xf32>
    %223 = arith.mulf %218, %222 : vector<16x32xf32>
    %224 = vector.broadcast %204 : vector<16x1xf32> to vector<16x32xf32>
    %225 = arith.mulf %223, %224 : vector<16x32xf32>
    %226 = vector.broadcast %205 : vector<16x1xf32> to vector<16x32xf32>
    %227 = arith.addf %225, %226 : vector<16x32xf32>
    %cst_55 = arith.constant 0.000000e+00 : f32
    %228 = vector.broadcast %cst_55 : f32 to vector<16x32xf32>
    %229 = arith.maximumf %227, %228 : vector<16x32xf32>
    %c0_56 = arith.constant 0 : index
    %c0_57 = arith.constant 0 : index
    %230 = vector.load %arg10[%c0_56, %c0_57] : memref<128x16xbf16, #tpu.memory_space<vmem>>, vector<128x16xbf16>
    %231 = arith.truncf %229 : vector<16x32xf32> to vector<16x32xbf16>
    %cst_58 = arith.constant dense<0.000000e+00> : vector<128x32xf32>
    %232 = tpu.matmul %230, %231, %cst_58 {dimension_numbers = #tpu.dot_dimension_numbers<[1], [0], [0], [1], [0, 0, 1, 1], [], []>} : vector<128x16xbf16>, vector<16x32xbf16>, vector<128x32xf32> -> vector<128x32xf32>
    %c0_59 = arith.constant 0 : index
    %c0_60 = arith.constant 0 : index
    %233 = vector.load %arg11[%c0_59, %c0_60] : memref<16x32xf32, #tpu.memory_space<vmem>>, vector<16x32xf32>
    %cst_61 = arith.constant 0.000000e+00 : f32
    %234 = vector.broadcast %cst_61 : f32 to vector<8x32xf32>
    %cst_62 = arith.constant 0.000000e+00 : f32
    %235 = vector.broadcast %cst_62 : f32 to vector<8x32xf32>
    %cst_63 = arith.constant 0.000000e+00 : f32
    %236 = vector.broadcast %cst_63 : f32 to vector<8x32xf32>
    %cst_64 = arith.constant 0.000000e+00 : f32
    %237 = vector.broadcast %cst_64 : f32 to vector<8x32xf32>
    %238 = vector.extract_strided_slice %232 {offsets = [0, 0], sizes = [8, 32], strides = [1, 1]} : vector<128x32xf32> to vector<8x32xf32>
    %cst_65 = arith.constant 0.000000e+00 : f32
    %239 = vector.broadcast %cst_65 : f32 to vector<8x5xf32>
    %240 = vector.extract_strided_slice %238 {offsets = [0, 5], sizes = [8, 27], strides = [1, 1]} : vector<8x32xf32> to vector<8x27xf32>
    %241 = tpu.concatenate %240, %239 in 1 : vector<8x27xf32>, vector<8x5xf32> -> vector<8x32xf32>
    %242 = vector.extract_strided_slice %233 {offsets = [0, 0], sizes = [1, 32], strides = [1, 1]} : vector<16x32xf32> to vector<1x32xf32>
    %243 = vector.broadcast %242 : vector<1x32xf32> to vector<8x32xf32>
    %244 = arith.mulf %241, %243 : vector<8x32xf32>
    %245 = arith.addf %237, %244 : vector<8x32xf32>
    %246 = vector.extract_strided_slice %232 {offsets = [8, 0], sizes = [8, 32], strides = [1, 1]} : vector<128x32xf32> to vector<8x32xf32>
    %cst_66 = arith.constant 0.000000e+00 : f32
    %247 = vector.broadcast %cst_66 : f32 to vector<8x4xf32>
    %248 = vector.extract_strided_slice %246 {offsets = [0, 4], sizes = [8, 28], strides = [1, 1]} : vector<8x32xf32> to vector<8x28xf32>
    %249 = tpu.concatenate %248, %247 in 1 : vector<8x28xf32>, vector<8x4xf32> -> vector<8x32xf32>
    %250 = vector.extract_strided_slice %233 {offsets = [1, 0], sizes = [1, 32], strides = [1, 1]} : vector<16x32xf32> to vector<1x32xf32>
    %251 = vector.broadcast %250 : vector<1x32xf32> to vector<8x32xf32>
    %252 = arith.mulf %249, %251 : vector<8x32xf32>
    %253 = arith.addf %236, %252 : vector<8x32xf32>
    %254 = vector.extract_strided_slice %232 {offsets = [16, 0], sizes = [8, 32], strides = [1, 1]} : vector<128x32xf32> to vector<8x32xf32>
    %cst_67 = arith.constant 0.000000e+00 : f32
    %255 = vector.broadcast %cst_67 : f32 to vector<8x4xf32>
    %256 = vector.extract_strided_slice %254 {offsets = [0, 4], sizes = [8, 28], strides = [1, 1]} : vector<8x32xf32> to vector<8x28xf32>
    %257 = tpu.concatenate %256, %255 in 1 : vector<8x28xf32>, vector<8x4xf32> -> vector<8x32xf32>
    %258 = vector.extract_strided_slice %233 {offsets = [2, 0], sizes = [1, 32], strides = [1, 1]} : vector<16x32xf32> to vector<1x32xf32>
    %259 = vector.broadcast %258 : vector<1x32xf32> to vector<8x32xf32>
    %260 = arith.mulf %257, %259 : vector<8x32xf32>
    %261 = arith.addf %245, %260 : vector<8x32xf32>
    %262 = vector.extract_strided_slice %232 {offsets = [24, 0], sizes = [8, 32], strides = [1, 1]} : vector<128x32xf32> to vector<8x32xf32>
    %cst_68 = arith.constant 0.000000e+00 : f32
    %263 = vector.broadcast %cst_68 : f32 to vector<8x3xf32>
    %264 = vector.extract_strided_slice %262 {offsets = [0, 3], sizes = [8, 29], strides = [1, 1]} : vector<8x32xf32> to vector<8x29xf32>
    %265 = tpu.concatenate %264, %263 in 1 : vector<8x29xf32>, vector<8x3xf32> -> vector<8x32xf32>
    %266 = vector.extract_strided_slice %233 {offsets = [3, 0], sizes = [1, 32], strides = [1, 1]} : vector<16x32xf32> to vector<1x32xf32>
    %267 = vector.broadcast %266 : vector<1x32xf32> to vector<8x32xf32>
    %268 = arith.mulf %265, %267 : vector<8x32xf32>
    %269 = arith.addf %253, %268 : vector<8x32xf32>
    %270 = vector.extract_strided_slice %232 {offsets = [32, 0], sizes = [8, 32], strides = [1, 1]} : vector<128x32xf32> to vector<8x32xf32>
    %cst_69 = arith.constant 0.000000e+00 : f32
    %271 = vector.broadcast %cst_69 : f32 to vector<8x1xf32>
    %272 = vector.extract_strided_slice %270 {offsets = [0, 1], sizes = [8, 31], strides = [1, 1]} : vector<8x32xf32> to vector<8x31xf32>
    %273 = tpu.concatenate %272, %271 in 1 : vector<8x31xf32>, vector<8x1xf32> -> vector<8x32xf32>
    %274 = vector.extract_strided_slice %233 {offsets = [4, 0], sizes = [1, 32], strides = [1, 1]} : vector<16x32xf32> to vector<1x32xf32>
    %275 = vector.broadcast %274 : vector<1x32xf32> to vector<8x32xf32>
    %276 = arith.mulf %273, %275 : vector<8x32xf32>
    %277 = arith.addf %235, %276 : vector<8x32xf32>
    %278 = vector.extract_strided_slice %232 {offsets = [40, 0], sizes = [8, 32], strides = [1, 1]} : vector<128x32xf32> to vector<8x32xf32>
    %279 = vector.extract_strided_slice %233 {offsets = [5, 0], sizes = [1, 32], strides = [1, 1]} : vector<16x32xf32> to vector<1x32xf32>
    %280 = vector.broadcast %279 : vector<1x32xf32> to vector<8x32xf32>
    %281 = arith.mulf %278, %280 : vector<8x32xf32>
    %282 = arith.addf %234, %281 : vector<8x32xf32>
    %283 = vector.extract_strided_slice %232 {offsets = [48, 0], sizes = [8, 32], strides = [1, 1]} : vector<128x32xf32> to vector<8x32xf32>
    %284 = vector.extract_strided_slice %233 {offsets = [6, 0], sizes = [1, 32], strides = [1, 1]} : vector<16x32xf32> to vector<1x32xf32>
    %285 = vector.broadcast %284 : vector<1x32xf32> to vector<8x32xf32>
    %286 = arith.mulf %283, %285 : vector<8x32xf32>
    %287 = arith.addf %277, %286 : vector<8x32xf32>
    %288 = vector.extract_strided_slice %232 {offsets = [56, 0], sizes = [8, 32], strides = [1, 1]} : vector<128x32xf32> to vector<8x32xf32>
    %cst_70 = arith.constant 0.000000e+00 : f32
    %289 = vector.broadcast %cst_70 : f32 to vector<8x1xf32>
    %290 = vector.extract_strided_slice %288 {offsets = [0, 0], sizes = [8, 31], strides = [1, 1]} : vector<8x32xf32> to vector<8x31xf32>
    %291 = tpu.concatenate %289, %290 in 1 : vector<8x1xf32>, vector<8x31xf32> -> vector<8x32xf32>
    %292 = vector.extract_strided_slice %233 {offsets = [7, 0], sizes = [1, 32], strides = [1, 1]} : vector<16x32xf32> to vector<1x32xf32>
    %293 = vector.broadcast %292 : vector<1x32xf32> to vector<8x32xf32>
    %294 = arith.mulf %291, %293 : vector<8x32xf32>
    %295 = arith.addf %282, %294 : vector<8x32xf32>
    %296 = vector.extract_strided_slice %232 {offsets = [64, 0], sizes = [8, 32], strides = [1, 1]} : vector<128x32xf32> to vector<8x32xf32>
    %cst_71 = arith.constant 0.000000e+00 : f32
    %297 = vector.broadcast %cst_71 : f32 to vector<8x1xf32>
    %298 = vector.extract_strided_slice %296 {offsets = [0, 1], sizes = [8, 31], strides = [1, 1]} : vector<8x32xf32> to vector<8x31xf32>
    %299 = tpu.concatenate %298, %297 in 1 : vector<8x31xf32>, vector<8x1xf32> -> vector<8x32xf32>
    %300 = vector.extract_strided_slice %233 {offsets = [8, 0], sizes = [1, 32], strides = [1, 1]} : vector<16x32xf32> to vector<1x32xf32>
    %301 = vector.broadcast %300 : vector<1x32xf32> to vector<8x32xf32>
    %302 = arith.mulf %299, %301 : vector<8x32xf32>
    %303 = arith.addf %261, %302 : vector<8x32xf32>
    %304 = vector.extract_strided_slice %232 {offsets = [72, 0], sizes = [8, 32], strides = [1, 1]} : vector<128x32xf32> to vector<8x32xf32>
    %305 = vector.extract_strided_slice %233 {offsets = [9, 0], sizes = [1, 32], strides = [1, 1]} : vector<16x32xf32> to vector<1x32xf32>
    %306 = vector.broadcast %305 : vector<1x32xf32> to vector<8x32xf32>
    %307 = arith.mulf %304, %306 : vector<8x32xf32>
    %308 = arith.addf %269, %307 : vector<8x32xf32>
    %309 = vector.extract_strided_slice %232 {offsets = [80, 0], sizes = [8, 32], strides = [1, 1]} : vector<128x32xf32> to vector<8x32xf32>
    %310 = vector.extract_strided_slice %233 {offsets = [10, 0], sizes = [1, 32], strides = [1, 1]} : vector<16x32xf32> to vector<1x32xf32>
    %311 = vector.broadcast %310 : vector<1x32xf32> to vector<8x32xf32>
    %312 = arith.mulf %309, %311 : vector<8x32xf32>
    %313 = arith.addf %303, %312 : vector<8x32xf32>
    %314 = vector.extract_strided_slice %232 {offsets = [88, 0], sizes = [8, 32], strides = [1, 1]} : vector<128x32xf32> to vector<8x32xf32>
    %cst_72 = arith.constant 0.000000e+00 : f32
    %315 = vector.broadcast %cst_72 : f32 to vector<8x1xf32>
    %316 = vector.extract_strided_slice %314 {offsets = [0, 0], sizes = [8, 31], strides = [1, 1]} : vector<8x32xf32> to vector<8x31xf32>
    %317 = tpu.concatenate %315, %316 in 1 : vector<8x1xf32>, vector<8x31xf32> -> vector<8x32xf32>
    %318 = vector.extract_strided_slice %233 {offsets = [11, 0], sizes = [1, 32], strides = [1, 1]} : vector<16x32xf32> to vector<1x32xf32>
    %319 = vector.broadcast %318 : vector<1x32xf32> to vector<8x32xf32>
    %320 = arith.mulf %317, %319 : vector<8x32xf32>
    %321 = arith.addf %308, %320 : vector<8x32xf32>
    %322 = vector.extract_strided_slice %232 {offsets = [96, 0], sizes = [8, 32], strides = [1, 1]} : vector<128x32xf32> to vector<8x32xf32>
    %cst_73 = arith.constant 0.000000e+00 : f32
    %323 = vector.broadcast %cst_73 : f32 to vector<8x3xf32>
    %324 = vector.extract_strided_slice %322 {offsets = [0, 0], sizes = [8, 29], strides = [1, 1]} : vector<8x32xf32> to vector<8x29xf32>
    %325 = tpu.concatenate %323, %324 in 1 : vector<8x3xf32>, vector<8x29xf32> -> vector<8x32xf32>
    %326 = vector.extract_strided_slice %233 {offsets = [12, 0], sizes = [1, 32], strides = [1, 1]} : vector<16x32xf32> to vector<1x32xf32>
    %327 = vector.broadcast %326 : vector<1x32xf32> to vector<8x32xf32>
    %328 = arith.mulf %325, %327 : vector<8x32xf32>
    %329 = arith.addf %287, %328 : vector<8x32xf32>
    %330 = vector.extract_strided_slice %232 {offsets = [104, 0], sizes = [8, 32], strides = [1, 1]} : vector<128x32xf32> to vector<8x32xf32>
    %cst_74 = arith.constant 0.000000e+00 : f32
    %331 = vector.broadcast %cst_74 : f32 to vector<8x4xf32>
    %332 = vector.extract_strided_slice %330 {offsets = [0, 0], sizes = [8, 28], strides = [1, 1]} : vector<8x32xf32> to vector<8x28xf32>
    %333 = tpu.concatenate %331, %332 in 1 : vector<8x4xf32>, vector<8x28xf32> -> vector<8x32xf32>
    %334 = vector.extract_strided_slice %233 {offsets = [13, 0], sizes = [1, 32], strides = [1, 1]} : vector<16x32xf32> to vector<1x32xf32>
    %335 = vector.broadcast %334 : vector<1x32xf32> to vector<8x32xf32>
    %336 = arith.mulf %333, %335 : vector<8x32xf32>
    %337 = arith.addf %295, %336 : vector<8x32xf32>
    %338 = vector.extract_strided_slice %232 {offsets = [112, 0], sizes = [8, 32], strides = [1, 1]} : vector<128x32xf32> to vector<8x32xf32>
    %cst_75 = arith.constant 0.000000e+00 : f32
    %339 = vector.broadcast %cst_75 : f32 to vector<8x4xf32>
    %340 = vector.extract_strided_slice %338 {offsets = [0, 0], sizes = [8, 28], strides = [1, 1]} : vector<8x32xf32> to vector<8x28xf32>
    %341 = tpu.concatenate %339, %340 in 1 : vector<8x4xf32>, vector<8x28xf32> -> vector<8x32xf32>
    %342 = vector.extract_strided_slice %233 {offsets = [14, 0], sizes = [1, 32], strides = [1, 1]} : vector<16x32xf32> to vector<1x32xf32>
    %343 = vector.broadcast %342 : vector<1x32xf32> to vector<8x32xf32>
    %344 = arith.mulf %341, %343 : vector<8x32xf32>
    %345 = arith.addf %329, %344 : vector<8x32xf32>
    %346 = vector.extract_strided_slice %232 {offsets = [120, 0], sizes = [8, 32], strides = [1, 1]} : vector<128x32xf32> to vector<8x32xf32>
    %cst_76 = arith.constant 0.000000e+00 : f32
    %347 = vector.broadcast %cst_76 : f32 to vector<8x5xf32>
    %348 = vector.extract_strided_slice %346 {offsets = [0, 0], sizes = [8, 27], strides = [1, 1]} : vector<8x32xf32> to vector<8x27xf32>
    %349 = tpu.concatenate %347, %348 in 1 : vector<8x5xf32>, vector<8x27xf32> -> vector<8x32xf32>
    %350 = vector.extract_strided_slice %233 {offsets = [15, 0], sizes = [1, 32], strides = [1, 1]} : vector<16x32xf32> to vector<1x32xf32>
    %351 = vector.broadcast %350 : vector<1x32xf32> to vector<8x32xf32>
    %352 = arith.mulf %349, %351 : vector<8x32xf32>
    %353 = arith.addf %337, %352 : vector<8x32xf32>
    %354 = tpu.concatenate %353, %345, %321, %313 in 0 : vector<8x32xf32>, vector<8x32xf32>, vector<8x32xf32>, vector<8x32xf32> -> vector<32x32xf32>
    %355 = vector.extract_strided_slice %354 {offsets = [0, 0], sizes = [32, 16], strides = [1, 1]} : vector<32x32xf32> to vector<32x16xf32>
    %356 = arith.truncf %355 : vector<32x16xf32> to vector<32x16xbf16>
    %c0_77 = arith.constant 0 : index
    %c0_78 = arith.constant 0 : index
    %357 = vector.load %arg12[%c0_77, %c0_78] : memref<16x64xbf16, #tpu.memory_space<vmem>>, vector<16x64xbf16>
    %cst_79 = arith.constant dense<0.000000e+00> : vector<32x64xf32>
    %358 = tpu.matmul %356, %357, %cst_79 {dimension_numbers = #tpu.dot_dimension_numbers<[1], [0], [0], [1], [0, 0, 1, 1], [], []>} : vector<32x16xbf16>, vector<16x64xbf16>, vector<32x64xf32> -> vector<32x64xf32>
    %359 = vector.extract_strided_slice %358 {offsets = [0, 0], sizes = [8, 64], strides = [1, 1]} : vector<32x64xf32> to vector<8x64xf32>
    %360 = vector.extract_strided_slice %358 {offsets = [8, 0], sizes = [8, 64], strides = [1, 1]} : vector<32x64xf32> to vector<8x64xf32>
    %cst_80 = arith.constant 0.000000e+00 : f32
    %361 = vector.broadcast %cst_80 : f32 to vector<8x1xf32>
    %362 = vector.extract_strided_slice %360 {offsets = [0, 0], sizes = [8, 63], strides = [1, 1]} : vector<8x64xf32> to vector<8x63xf32>
    %363 = tpu.concatenate %361, %362 in 1 : vector<8x1xf32>, vector<8x63xf32> -> vector<8x64xf32>
    %364 = arith.addf %359, %363 : vector<8x64xf32>
    %365 = vector.extract_strided_slice %358 {offsets = [16, 0], sizes = [8, 64], strides = [1, 1]} : vector<32x64xf32> to vector<8x64xf32>
    %cst_81 = arith.constant 0.000000e+00 : f32
    %366 = vector.broadcast %cst_81 : f32 to vector<8x8xf32>
    %367 = vector.extract_strided_slice %365 {offsets = [0, 0], sizes = [8, 56], strides = [1, 1]} : vector<8x64xf32> to vector<8x56xf32>
    %368 = tpu.concatenate %366, %367 in 1 : vector<8x8xf32>, vector<8x56xf32> -> vector<8x64xf32>
    %369 = arith.addf %364, %368 : vector<8x64xf32>
    %370 = vector.extract_strided_slice %358 {offsets = [24, 0], sizes = [8, 64], strides = [1, 1]} : vector<32x64xf32> to vector<8x64xf32>
    %cst_82 = arith.constant 0.000000e+00 : f32
    %371 = vector.broadcast %cst_82 : f32 to vector<8x9xf32>
    %372 = vector.extract_strided_slice %370 {offsets = [0, 0], sizes = [8, 55], strides = [1, 1]} : vector<8x64xf32> to vector<8x55xf32>
    %373 = tpu.concatenate %371, %372 in 1 : vector<8x9xf32>, vector<8x55xf32> -> vector<8x64xf32>
    %374 = arith.addf %369, %373 : vector<8x64xf32>
    %375 = vector.extract_strided_slice %354 {offsets = [0, 16], sizes = [32, 16], strides = [1, 1]} : vector<32x32xf32> to vector<32x16xf32>
    %376 = arith.truncf %375 : vector<32x16xf32> to vector<32x16xbf16>
    %c0_83 = arith.constant 0 : index
    %c0_84 = arith.constant 0 : index
    %377 = vector.load %arg12[%c0_83, %c0_84] : memref<16x64xbf16, #tpu.memory_space<vmem>>, vector<16x64xbf16>
    %cst_85 = arith.constant dense<0.000000e+00> : vector<32x64xf32>
    %378 = tpu.matmul %376, %377, %cst_85 {dimension_numbers = #tpu.dot_dimension_numbers<[1], [0], [0], [1], [0, 0, 1, 1], [], []>} : vector<32x16xbf16>, vector<16x64xbf16>, vector<32x64xf32> -> vector<32x64xf32>
    %379 = vector.extract_strided_slice %378 {offsets = [0, 0], sizes = [8, 64], strides = [1, 1]} : vector<32x64xf32> to vector<8x64xf32>
    %380 = vector.extract_strided_slice %378 {offsets = [8, 0], sizes = [8, 64], strides = [1, 1]} : vector<32x64xf32> to vector<8x64xf32>
    %cst_86 = arith.constant 0.000000e+00 : f32
    %381 = vector.broadcast %cst_86 : f32 to vector<8x1xf32>
    %382 = vector.extract_strided_slice %380 {offsets = [0, 0], sizes = [8, 63], strides = [1, 1]} : vector<8x64xf32> to vector<8x63xf32>
    %383 = tpu.concatenate %381, %382 in 1 : vector<8x1xf32>, vector<8x63xf32> -> vector<8x64xf32>
    %384 = arith.addf %379, %383 : vector<8x64xf32>
    %385 = vector.extract_strided_slice %378 {offsets = [16, 0], sizes = [8, 64], strides = [1, 1]} : vector<32x64xf32> to vector<8x64xf32>
    %cst_87 = arith.constant 0.000000e+00 : f32
    %386 = vector.broadcast %cst_87 : f32 to vector<8x8xf32>
    %387 = vector.extract_strided_slice %385 {offsets = [0, 0], sizes = [8, 56], strides = [1, 1]} : vector<8x64xf32> to vector<8x56xf32>
    %388 = tpu.concatenate %386, %387 in 1 : vector<8x8xf32>, vector<8x56xf32> -> vector<8x64xf32>
    %389 = arith.addf %384, %388 : vector<8x64xf32>
    %390 = vector.extract_strided_slice %378 {offsets = [24, 0], sizes = [8, 64], strides = [1, 1]} : vector<32x64xf32> to vector<8x64xf32>
    %cst_88 = arith.constant 0.000000e+00 : f32
    %391 = vector.broadcast %cst_88 : f32 to vector<8x9xf32>
    %392 = vector.extract_strided_slice %390 {offsets = [0, 0], sizes = [8, 55], strides = [1, 1]} : vector<8x64xf32> to vector<8x55xf32>
    %393 = tpu.concatenate %391, %392 in 1 : vector<8x9xf32>, vector<8x55xf32> -> vector<8x64xf32>
    %394 = arith.addf %389, %393 : vector<8x64xf32>
    %395 = tpu.concatenate %374, %394 in 1 : vector<8x64xf32>, vector<8x64xf32> -> vector<8x128xf32>
    %c0_89 = arith.constant 0 : index
    %c0_90 = arith.constant 0 : index
    %396 = vector.load %arg13[%c0_89, %c0_90] : memref<8x1xf32, #tpu.memory_space<vmem>>, vector<8x1xf32>
    %c0_91 = arith.constant 0 : index
    %c0_92 = arith.constant 0 : index
    %397 = vector.load %arg14[%c0_91, %c0_92] : memref<8x1xf32, #tpu.memory_space<vmem>>, vector<8x1xf32>
    %cst_93 = arith.constant dense<0.000000e+00> : vector<8xf32>
    %398 = vector.multi_reduction <add>, %395, %cst_93 [1] : vector<8x128xf32> to vector<8xf32>
    %399 = vector.shape_cast %398 : vector<8xf32> to vector<8x1xf32>
    %cst_94 = arith.constant 1.280000e+02 : f32
    %400 = vector.broadcast %cst_94 : f32 to vector<8x1xf32>
    %401 = arith.divf %399, %400 : vector<8x1xf32>
    %402 = vector.broadcast %401 : vector<8x1xf32> to vector<8x128xf32>
    %403 = arith.subf %395, %402 : vector<8x128xf32>
    %404 = arith.mulf %403, %403 : vector<8x128xf32>
    %cst_95 = arith.constant dense<0.000000e+00> : vector<8xf32>
    %405 = vector.multi_reduction <add>, %404, %cst_95 [1] : vector<8x128xf32> to vector<8xf32>
    %406 = vector.shape_cast %405 : vector<8xf32> to vector<8x1xf32>
    %cst_96 = arith.constant 1.280000e+02 : f32
    %407 = vector.broadcast %cst_96 : f32 to vector<8x1xf32>
    %408 = arith.divf %406, %407 : vector<8x1xf32>
    %409 = vector.broadcast %401 : vector<8x1xf32> to vector<8x128xf32>
    %410 = arith.subf %395, %409 : vector<8x128xf32>
    %cst_97 = arith.constant 9.99999974E-6 : f32
    %411 = vector.broadcast %cst_97 : f32 to vector<8x1xf32>
    %412 = arith.addf %408, %411 : vector<8x1xf32>
    %413 = math.rsqrt %412 : vector<8x1xf32>
    %414 = vector.broadcast %413 : vector<8x1xf32> to vector<8x128xf32>
    %415 = arith.mulf %410, %414 : vector<8x128xf32>
    %416 = vector.broadcast %396 : vector<8x1xf32> to vector<8x128xf32>
    %417 = arith.mulf %415, %416 : vector<8x128xf32>
    %418 = vector.broadcast %397 : vector<8x1xf32> to vector<8x128xf32>
    %419 = arith.addf %417, %418 : vector<8x128xf32>
    %cst_98 = arith.constant 0.000000e+00 : f32
    %420 = vector.broadcast %cst_98 : f32 to vector<8x128xf32>
    %421 = arith.maximumf %419, %420 : vector<8x128xf32>
    %c0_99 = arith.constant 0 : index
    %c0_100 = arith.constant 0 : index
    %422 = vector.load %arg15[%c0_99, %c0_100] : memref<128x8xbf16, #tpu.memory_space<vmem>>, vector<128x8xbf16>
    %423 = arith.truncf %421 : vector<8x128xf32> to vector<8x128xbf16>
    %cst_101 = arith.constant dense<0.000000e+00> : vector<128x128xf32>
    %424 = tpu.matmul %422, %423, %cst_101 {dimension_numbers = #tpu.dot_dimension_numbers<[1], [0], [0], [1], [0, 0, 1, 1], [], []>} : vector<128x8xbf16>, vector<8x128xbf16>, vector<128x128xf32> -> vector<128x128xf32>
    %c0_102 = arith.constant 0 : index
    %c0_103 = arith.constant 0 : index
    %425 = vector.load %arg16[%c0_102, %c0_103] : memref<16x128xf32, #tpu.memory_space<vmem>>, vector<16x128xf32>
    %cst_104 = arith.constant 0.000000e+00 : f32
    %426 = vector.broadcast %cst_104 : f32 to vector<8x128xf32>
    %cst_105 = arith.constant 0.000000e+00 : f32
    %427 = vector.broadcast %cst_105 : f32 to vector<8x128xf32>
    %cst_106 = arith.constant 0.000000e+00 : f32
    %428 = vector.broadcast %cst_106 : f32 to vector<8x128xf32>
    %cst_107 = arith.constant 0.000000e+00 : f32
    %429 = vector.broadcast %cst_107 : f32 to vector<8x128xf32>
    %430 = vector.extract_strided_slice %424 {offsets = [0, 0], sizes = [8, 128], strides = [1, 1]} : vector<128x128xf32> to vector<8x128xf32>
    %cst_108 = arith.constant 0.000000e+00 : f32
    %431 = vector.broadcast %cst_108 : f32 to vector<8x9xf32>
    %432 = vector.extract_strided_slice %430 {offsets = [0, 9], sizes = [8, 119], strides = [1, 1]} : vector<8x128xf32> to vector<8x119xf32>
    %433 = tpu.concatenate %432, %431 in 1 : vector<8x119xf32>, vector<8x9xf32> -> vector<8x128xf32>
    %434 = vector.extract_strided_slice %425 {offsets = [0, 0], sizes = [1, 128], strides = [1, 1]} : vector<16x128xf32> to vector<1x128xf32>
    %435 = vector.broadcast %434 : vector<1x128xf32> to vector<8x128xf32>
    %436 = arith.mulf %433, %435 : vector<8x128xf32>
    %437 = arith.addf %429, %436 : vector<8x128xf32>
    %438 = vector.extract_strided_slice %424 {offsets = [8, 0], sizes = [8, 128], strides = [1, 1]} : vector<128x128xf32> to vector<8x128xf32>
    %cst_109 = arith.constant 0.000000e+00 : f32
    %439 = vector.broadcast %cst_109 : f32 to vector<8x8xf32>
    %440 = vector.extract_strided_slice %438 {offsets = [0, 8], sizes = [8, 120], strides = [1, 1]} : vector<8x128xf32> to vector<8x120xf32>
    %441 = tpu.concatenate %440, %439 in 1 : vector<8x120xf32>, vector<8x8xf32> -> vector<8x128xf32>
    %442 = vector.extract_strided_slice %425 {offsets = [1, 0], sizes = [1, 128], strides = [1, 1]} : vector<16x128xf32> to vector<1x128xf32>
    %443 = vector.broadcast %442 : vector<1x128xf32> to vector<8x128xf32>
    %444 = arith.mulf %441, %443 : vector<8x128xf32>
    %445 = arith.addf %428, %444 : vector<8x128xf32>
    %446 = vector.extract_strided_slice %424 {offsets = [16, 0], sizes = [8, 128], strides = [1, 1]} : vector<128x128xf32> to vector<8x128xf32>
    %cst_110 = arith.constant 0.000000e+00 : f32
    %447 = vector.broadcast %cst_110 : f32 to vector<8x8xf32>
    %448 = vector.extract_strided_slice %446 {offsets = [0, 8], sizes = [8, 120], strides = [1, 1]} : vector<8x128xf32> to vector<8x120xf32>
    %449 = tpu.concatenate %448, %447 in 1 : vector<8x120xf32>, vector<8x8xf32> -> vector<8x128xf32>
    %450 = vector.extract_strided_slice %425 {offsets = [2, 0], sizes = [1, 128], strides = [1, 1]} : vector<16x128xf32> to vector<1x128xf32>
    %451 = vector.broadcast %450 : vector<1x128xf32> to vector<8x128xf32>
    %452 = arith.mulf %449, %451 : vector<8x128xf32>
    %453 = arith.addf %437, %452 : vector<8x128xf32>
    %454 = vector.extract_strided_slice %424 {offsets = [24, 0], sizes = [8, 128], strides = [1, 1]} : vector<128x128xf32> to vector<8x128xf32>
    %cst_111 = arith.constant 0.000000e+00 : f32
    %455 = vector.broadcast %cst_111 : f32 to vector<8x7xf32>
    %456 = vector.extract_strided_slice %454 {offsets = [0, 7], sizes = [8, 121], strides = [1, 1]} : vector<8x128xf32> to vector<8x121xf32>
    %457 = tpu.concatenate %456, %455 in 1 : vector<8x121xf32>, vector<8x7xf32> -> vector<8x128xf32>
    %458 = vector.extract_strided_slice %425 {offsets = [3, 0], sizes = [1, 128], strides = [1, 1]} : vector<16x128xf32> to vector<1x128xf32>
    %459 = vector.broadcast %458 : vector<1x128xf32> to vector<8x128xf32>
    %460 = arith.mulf %457, %459 : vector<8x128xf32>
    %461 = arith.addf %445, %460 : vector<8x128xf32>
    %462 = vector.extract_strided_slice %424 {offsets = [32, 0], sizes = [8, 128], strides = [1, 1]} : vector<128x128xf32> to vector<8x128xf32>
    %cst_112 = arith.constant 0.000000e+00 : f32
    %463 = vector.broadcast %cst_112 : f32 to vector<8x1xf32>
    %464 = vector.extract_strided_slice %462 {offsets = [0, 1], sizes = [8, 127], strides = [1, 1]} : vector<8x128xf32> to vector<8x127xf32>
    %465 = tpu.concatenate %464, %463 in 1 : vector<8x127xf32>, vector<8x1xf32> -> vector<8x128xf32>
    %466 = vector.extract_strided_slice %425 {offsets = [4, 0], sizes = [1, 128], strides = [1, 1]} : vector<16x128xf32> to vector<1x128xf32>
    %467 = vector.broadcast %466 : vector<1x128xf32> to vector<8x128xf32>
    %468 = arith.mulf %465, %467 : vector<8x128xf32>
    %469 = arith.addf %427, %468 : vector<8x128xf32>
    %470 = vector.extract_strided_slice %424 {offsets = [40, 0], sizes = [8, 128], strides = [1, 1]} : vector<128x128xf32> to vector<8x128xf32>
    %471 = vector.extract_strided_slice %425 {offsets = [5, 0], sizes = [1, 128], strides = [1, 1]} : vector<16x128xf32> to vector<1x128xf32>
    %472 = vector.broadcast %471 : vector<1x128xf32> to vector<8x128xf32>
    %473 = arith.mulf %470, %472 : vector<8x128xf32>
    %474 = arith.addf %426, %473 : vector<8x128xf32>
    %475 = vector.extract_strided_slice %424 {offsets = [48, 0], sizes = [8, 128], strides = [1, 1]} : vector<128x128xf32> to vector<8x128xf32>
    %476 = vector.extract_strided_slice %425 {offsets = [6, 0], sizes = [1, 128], strides = [1, 1]} : vector<16x128xf32> to vector<1x128xf32>
    %477 = vector.broadcast %476 : vector<1x128xf32> to vector<8x128xf32>
    %478 = arith.mulf %475, %477 : vector<8x128xf32>
    %479 = arith.addf %469, %478 : vector<8x128xf32>
    %480 = vector.extract_strided_slice %424 {offsets = [56, 0], sizes = [8, 128], strides = [1, 1]} : vector<128x128xf32> to vector<8x128xf32>
    %cst_113 = arith.constant 0.000000e+00 : f32
    %481 = vector.broadcast %cst_113 : f32 to vector<8x1xf32>
    %482 = vector.extract_strided_slice %480 {offsets = [0, 0], sizes = [8, 127], strides = [1, 1]} : vector<8x128xf32> to vector<8x127xf32>
    %483 = tpu.concatenate %481, %482 in 1 : vector<8x1xf32>, vector<8x127xf32> -> vector<8x128xf32>
    %484 = vector.extract_strided_slice %425 {offsets = [7, 0], sizes = [1, 128], strides = [1, 1]} : vector<16x128xf32> to vector<1x128xf32>
    %485 = vector.broadcast %484 : vector<1x128xf32> to vector<8x128xf32>
    %486 = arith.mulf %483, %485 : vector<8x128xf32>
    %487 = arith.addf %474, %486 : vector<8x128xf32>
    %488 = vector.extract_strided_slice %424 {offsets = [64, 0], sizes = [8, 128], strides = [1, 1]} : vector<128x128xf32> to vector<8x128xf32>
    %cst_114 = arith.constant 0.000000e+00 : f32
    %489 = vector.broadcast %cst_114 : f32 to vector<8x1xf32>
    %490 = vector.extract_strided_slice %488 {offsets = [0, 1], sizes = [8, 127], strides = [1, 1]} : vector<8x128xf32> to vector<8x127xf32>
    %491 = tpu.concatenate %490, %489 in 1 : vector<8x127xf32>, vector<8x1xf32> -> vector<8x128xf32>
    %492 = vector.extract_strided_slice %425 {offsets = [8, 0], sizes = [1, 128], strides = [1, 1]} : vector<16x128xf32> to vector<1x128xf32>
    %493 = vector.broadcast %492 : vector<1x128xf32> to vector<8x128xf32>
    %494 = arith.mulf %491, %493 : vector<8x128xf32>
    %495 = arith.addf %453, %494 : vector<8x128xf32>
    %496 = vector.extract_strided_slice %424 {offsets = [72, 0], sizes = [8, 128], strides = [1, 1]} : vector<128x128xf32> to vector<8x128xf32>
    %497 = vector.extract_strided_slice %425 {offsets = [9, 0], sizes = [1, 128], strides = [1, 1]} : vector<16x128xf32> to vector<1x128xf32>
    %498 = vector.broadcast %497 : vector<1x128xf32> to vector<8x128xf32>
    %499 = arith.mulf %496, %498 : vector<8x128xf32>
    %500 = arith.addf %461, %499 : vector<8x128xf32>
    %501 = vector.extract_strided_slice %424 {offsets = [80, 0], sizes = [8, 128], strides = [1, 1]} : vector<128x128xf32> to vector<8x128xf32>
    %502 = vector.extract_strided_slice %425 {offsets = [10, 0], sizes = [1, 128], strides = [1, 1]} : vector<16x128xf32> to vector<1x128xf32>
    %503 = vector.broadcast %502 : vector<1x128xf32> to vector<8x128xf32>
    %504 = arith.mulf %501, %503 : vector<8x128xf32>
    %505 = arith.addf %495, %504 : vector<8x128xf32>
    %506 = vector.extract_strided_slice %424 {offsets = [88, 0], sizes = [8, 128], strides = [1, 1]} : vector<128x128xf32> to vector<8x128xf32>
    %cst_115 = arith.constant 0.000000e+00 : f32
    %507 = vector.broadcast %cst_115 : f32 to vector<8x1xf32>
    %508 = vector.extract_strided_slice %506 {offsets = [0, 0], sizes = [8, 127], strides = [1, 1]} : vector<8x128xf32> to vector<8x127xf32>
    %509 = tpu.concatenate %507, %508 in 1 : vector<8x1xf32>, vector<8x127xf32> -> vector<8x128xf32>
    %510 = vector.extract_strided_slice %425 {offsets = [11, 0], sizes = [1, 128], strides = [1, 1]} : vector<16x128xf32> to vector<1x128xf32>
    %511 = vector.broadcast %510 : vector<1x128xf32> to vector<8x128xf32>
    %512 = arith.mulf %509, %511 : vector<8x128xf32>
    %513 = arith.addf %500, %512 : vector<8x128xf32>
    %514 = vector.extract_strided_slice %424 {offsets = [96, 0], sizes = [8, 128], strides = [1, 1]} : vector<128x128xf32> to vector<8x128xf32>
    %cst_116 = arith.constant 0.000000e+00 : f32
    %515 = vector.broadcast %cst_116 : f32 to vector<8x7xf32>
    %516 = vector.extract_strided_slice %514 {offsets = [0, 0], sizes = [8, 121], strides = [1, 1]} : vector<8x128xf32> to vector<8x121xf32>
    %517 = tpu.concatenate %515, %516 in 1 : vector<8x7xf32>, vector<8x121xf32> -> vector<8x128xf32>
    %518 = vector.extract_strided_slice %425 {offsets = [12, 0], sizes = [1, 128], strides = [1, 1]} : vector<16x128xf32> to vector<1x128xf32>
    %519 = vector.broadcast %518 : vector<1x128xf32> to vector<8x128xf32>
    %520 = arith.mulf %517, %519 : vector<8x128xf32>
    %521 = arith.addf %479, %520 : vector<8x128xf32>
    %522 = vector.extract_strided_slice %424 {offsets = [104, 0], sizes = [8, 128], strides = [1, 1]} : vector<128x128xf32> to vector<8x128xf32>
    %cst_117 = arith.constant 0.000000e+00 : f32
    %523 = vector.broadcast %cst_117 : f32 to vector<8x8xf32>
    %524 = vector.extract_strided_slice %522 {offsets = [0, 0], sizes = [8, 120], strides = [1, 1]} : vector<8x128xf32> to vector<8x120xf32>
    %525 = tpu.concatenate %523, %524 in 1 : vector<8x8xf32>, vector<8x120xf32> -> vector<8x128xf32>
    %526 = vector.extract_strided_slice %425 {offsets = [13, 0], sizes = [1, 128], strides = [1, 1]} : vector<16x128xf32> to vector<1x128xf32>
    %527 = vector.broadcast %526 : vector<1x128xf32> to vector<8x128xf32>
    %528 = arith.mulf %525, %527 : vector<8x128xf32>
    %529 = arith.addf %487, %528 : vector<8x128xf32>
    %530 = vector.extract_strided_slice %424 {offsets = [112, 0], sizes = [8, 128], strides = [1, 1]} : vector<128x128xf32> to vector<8x128xf32>
    %cst_118 = arith.constant 0.000000e+00 : f32
    %531 = vector.broadcast %cst_118 : f32 to vector<8x8xf32>
    %532 = vector.extract_strided_slice %530 {offsets = [0, 0], sizes = [8, 120], strides = [1, 1]} : vector<8x128xf32> to vector<8x120xf32>
    %533 = tpu.concatenate %531, %532 in 1 : vector<8x8xf32>, vector<8x120xf32> -> vector<8x128xf32>
    %534 = vector.extract_strided_slice %425 {offsets = [14, 0], sizes = [1, 128], strides = [1, 1]} : vector<16x128xf32> to vector<1x128xf32>
    %535 = vector.broadcast %534 : vector<1x128xf32> to vector<8x128xf32>
    %536 = arith.mulf %533, %535 : vector<8x128xf32>
    %537 = arith.addf %521, %536 : vector<8x128xf32>
    %538 = vector.extract_strided_slice %424 {offsets = [120, 0], sizes = [8, 128], strides = [1, 1]} : vector<128x128xf32> to vector<8x128xf32>
    %cst_119 = arith.constant 0.000000e+00 : f32
    %539 = vector.broadcast %cst_119 : f32 to vector<8x9xf32>
    %540 = vector.extract_strided_slice %538 {offsets = [0, 0], sizes = [8, 119], strides = [1, 1]} : vector<8x128xf32> to vector<8x119xf32>
    %541 = tpu.concatenate %539, %540 in 1 : vector<8x9xf32>, vector<8x119xf32> -> vector<8x128xf32>
    %542 = vector.extract_strided_slice %425 {offsets = [15, 0], sizes = [1, 128], strides = [1, 1]} : vector<16x128xf32> to vector<1x128xf32>
    %543 = vector.broadcast %542 : vector<1x128xf32> to vector<8x128xf32>
    %544 = arith.mulf %541, %543 : vector<8x128xf32>
    %545 = arith.addf %529, %544 : vector<8x128xf32>
    %546 = tpu.concatenate %545, %537, %513, %505 in 0 : vector<8x128xf32>, vector<8x128xf32>, vector<8x128xf32>, vector<8x128xf32> -> vector<32x128xf32>
    %547 = vector.extract_strided_slice %546 {offsets = [0, 0], sizes = [32, 64], strides = [1, 1]} : vector<32x128xf32> to vector<32x64xf32>
    %548 = arith.truncf %547 : vector<32x64xf32> to vector<32x64xbf16>
    %c0_120 = arith.constant 0 : index
    %c0_121 = arith.constant 0 : index
    %549 = vector.load %arg17[%c0_120, %c0_121] : memref<64x256xbf16, #tpu.memory_space<vmem>>, vector<64x256xbf16>
    %cst_122 = arith.constant dense<0.000000e+00> : vector<32x256xf32>
    %550 = tpu.matmul %548, %549, %cst_122 {dimension_numbers = #tpu.dot_dimension_numbers<[1], [0], [0], [1], [0, 0, 1, 1], [], []>} : vector<32x64xbf16>, vector<64x256xbf16>, vector<32x256xf32> -> vector<32x256xf32>
    %551 = vector.extract_strided_slice %550 {offsets = [0, 0], sizes = [8, 256], strides = [1, 1]} : vector<32x256xf32> to vector<8x256xf32>
    %552 = vector.extract_strided_slice %550 {offsets = [8, 0], sizes = [8, 256], strides = [1, 1]} : vector<32x256xf32> to vector<8x256xf32>
    %cst_123 = arith.constant 0.000000e+00 : f32
    %553 = vector.broadcast %cst_123 : f32 to vector<8x1xf32>
    %554 = vector.extract_strided_slice %552 {offsets = [0, 0], sizes = [8, 255], strides = [1, 1]} : vector<8x256xf32> to vector<8x255xf32>
    %555 = tpu.concatenate %553, %554 in 1 : vector<8x1xf32>, vector<8x255xf32> -> vector<8x256xf32>
    %556 = arith.addf %551, %555 : vector<8x256xf32>
    %557 = vector.extract_strided_slice %550 {offsets = [16, 0], sizes = [8, 256], strides = [1, 1]} : vector<32x256xf32> to vector<8x256xf32>
    %cst_124 = arith.constant 0.000000e+00 : f32
    %558 = vector.broadcast %cst_124 : f32 to vector<8x16xf32>
    %559 = vector.extract_strided_slice %557 {offsets = [0, 0], sizes = [8, 240], strides = [1, 1]} : vector<8x256xf32> to vector<8x240xf32>
    %560 = tpu.concatenate %558, %559 in 1 : vector<8x16xf32>, vector<8x240xf32> -> vector<8x256xf32>
    %561 = arith.addf %556, %560 : vector<8x256xf32>
    %562 = vector.extract_strided_slice %550 {offsets = [24, 0], sizes = [8, 256], strides = [1, 1]} : vector<32x256xf32> to vector<8x256xf32>
    %cst_125 = arith.constant 0.000000e+00 : f32
    %563 = vector.broadcast %cst_125 : f32 to vector<8x17xf32>
    %564 = vector.extract_strided_slice %562 {offsets = [0, 0], sizes = [8, 239], strides = [1, 1]} : vector<8x256xf32> to vector<8x239xf32>
    %565 = tpu.concatenate %563, %564 in 1 : vector<8x17xf32>, vector<8x239xf32> -> vector<8x256xf32>
    %566 = arith.addf %561, %565 : vector<8x256xf32>
    %567 = vector.extract_strided_slice %546 {offsets = [0, 64], sizes = [32, 64], strides = [1, 1]} : vector<32x128xf32> to vector<32x64xf32>
    %568 = arith.truncf %567 : vector<32x64xf32> to vector<32x64xbf16>
    %c0_126 = arith.constant 0 : index
    %c0_127 = arith.constant 0 : index
    %569 = vector.load %arg17[%c0_126, %c0_127] : memref<64x256xbf16, #tpu.memory_space<vmem>>, vector<64x256xbf16>
    %cst_128 = arith.constant dense<0.000000e+00> : vector<32x256xf32>
    %570 = tpu.matmul %568, %569, %cst_128 {dimension_numbers = #tpu.dot_dimension_numbers<[1], [0], [0], [1], [0, 0, 1, 1], [], []>} : vector<32x64xbf16>, vector<64x256xbf16>, vector<32x256xf32> -> vector<32x256xf32>
    %571 = vector.extract_strided_slice %570 {offsets = [0, 0], sizes = [8, 256], strides = [1, 1]} : vector<32x256xf32> to vector<8x256xf32>
    %572 = vector.extract_strided_slice %570 {offsets = [8, 0], sizes = [8, 256], strides = [1, 1]} : vector<32x256xf32> to vector<8x256xf32>
    %cst_129 = arith.constant 0.000000e+00 : f32
    %573 = vector.broadcast %cst_129 : f32 to vector<8x1xf32>
    %574 = vector.extract_strided_slice %572 {offsets = [0, 0], sizes = [8, 255], strides = [1, 1]} : vector<8x256xf32> to vector<8x255xf32>
    %575 = tpu.concatenate %573, %574 in 1 : vector<8x1xf32>, vector<8x255xf32> -> vector<8x256xf32>
    %576 = arith.addf %571, %575 : vector<8x256xf32>
    %577 = vector.extract_strided_slice %570 {offsets = [16, 0], sizes = [8, 256], strides = [1, 1]} : vector<32x256xf32> to vector<8x256xf32>
    %cst_130 = arith.constant 0.000000e+00 : f32
    %578 = vector.broadcast %cst_130 : f32 to vector<8x16xf32>
    %579 = vector.extract_strided_slice %577 {offsets = [0, 0], sizes = [8, 240], strides = [1, 1]} : vector<8x256xf32> to vector<8x240xf32>
    %580 = tpu.concatenate %578, %579 in 1 : vector<8x16xf32>, vector<8x240xf32> -> vector<8x256xf32>
    %581 = arith.addf %576, %580 : vector<8x256xf32>
    %582 = vector.extract_strided_slice %570 {offsets = [24, 0], sizes = [8, 256], strides = [1, 1]} : vector<32x256xf32> to vector<8x256xf32>
    %cst_131 = arith.constant 0.000000e+00 : f32
    %583 = vector.broadcast %cst_131 : f32 to vector<8x17xf32>
    %584 = vector.extract_strided_slice %582 {offsets = [0, 0], sizes = [8, 239], strides = [1, 1]} : vector<8x256xf32> to vector<8x239xf32>
    %585 = tpu.concatenate %583, %584 in 1 : vector<8x17xf32>, vector<8x239xf32> -> vector<8x256xf32>
    %586 = arith.addf %581, %585 : vector<8x256xf32>
    %587 = tpu.concatenate %566, %586 in 1 : vector<8x256xf32>, vector<8x256xf32> -> vector<8x512xf32>
    %588 = math.absf %587 : vector<8x512xf32>
    %cst_132 = arith.constant -2.000000e+00 : f32
    %589 = vector.broadcast %cst_132 : f32 to vector<8x512xf32>
    %590 = arith.mulf %589, %588 : vector<8x512xf32>
    %591 = math.exp %590 : vector<8x512xf32>
    %cst_133 = arith.constant 0.000000e+00 : f32
    %592 = vector.broadcast %cst_133 : f32 to vector<8x512xf32>
    %593 = arith.cmpf oge, %587, %592 : vector<8x512xf32>
    %cst_134 = arith.constant 1.000000e+00 : f32
    %cst_135 = arith.constant -1.000000e+00 : f32
    %594 = vector.broadcast %cst_134 : f32 to vector<8x512xf32>
    %595 = vector.broadcast %cst_135 : f32 to vector<8x512xf32>
    %596 = arith.select %593, %594, %595 : vector<8x512xi1>, vector<8x512xf32>
    %cst_136 = arith.constant 1.000000e+00 : f32
    %597 = vector.broadcast %cst_136 : f32 to vector<8x512xf32>
    %598 = arith.subf %597, %591 : vector<8x512xf32>
    %cst_137 = arith.constant 1.000000e+00 : f32
    %599 = vector.broadcast %cst_137 : f32 to vector<8x512xf32>
    %600 = arith.addf %599, %591 : vector<8x512xf32>
    %601 = tpu.reciprocal %600 {approx = true} : vector<8x512xf32> -> vector<8x512xf32>
    %602 = arith.mulf %598, %601 : vector<8x512xf32>
    %603 = arith.mulf %596, %602 : vector<8x512xf32>
    %c0_138 = arith.constant 0 : index
    %c0_139 = arith.constant 0 : index
    %604 = vector.load %arg18[%c0_138, %c0_139] : memref<8x512xf32, #tpu.memory_space<vmem>>, vector<8x512xf32>
    tpu.vector_store %arg18[%c0_138, %c0_139], %603 {strides = array<i32>} : memref<8x512xf32, #tpu.memory_space<vmem>>, vector<8x512xf32>,
    return
  }
  func.func @transform_0(%arg0: i32) -> (i32, i32) {
    %c0_i32 = arith.constant 0 : i32
    %c0_i32_0 = arith.constant 0 : i32
    %c0_i32_1 = arith.constant 0 : i32
    return %c0_i32, %c0_i32_0 : i32, i32
  }
  func.func @transform_1(%arg0: i32) -> (i32, i32) {
    %c0_i32 = arith.constant 0 : i32
    %c0_i32_0 = arith.constant 0 : i32
    %c0_i32_1 = arith.constant 0 : i32
    return %c0_i32, %c0_i32_0 : i32, i32
  }
  func.func @transform_2(%arg0: i32) -> (i32, i32) {
    %c0_i32 = arith.constant 0 : i32
    %c0_i32_0 = arith.constant 0 : i32
    %c0_i32_1 = arith.constant 0 : i32
    return %c0_i32, %c0_i32_0 : i32, i32
  }
  func.func @transform_3(%arg0: i32) -> (i32, i32) {
    %c0_i32 = arith.constant 0 : i32
    %c0_i32_0 = arith.constant 0 : i32
    %c0_i32_1 = arith.constant 0 : i32
    return %c0_i32, %c0_i32_0 : i32, i32
  }
  func.func @transform_4(%arg0: i32) -> (i32, i32) {
    %c0_i32 = arith.constant 0 : i32
    %c0_i32_0 = arith.constant 0 : i32
    %c0_i32_1 = arith.constant 0 : i32
    return %c0_i32, %c0_i32_0 : i32, i32
  }
  func.func @transform_5(%arg0: i32) -> (i32, i32) {
    %c0_i32 = arith.constant 0 : i32
    %c0_i32_0 = arith.constant 0 : i32
    %c0_i32_1 = arith.constant 0 : i32
    return %c0_i32, %c0_i32_0 : i32, i32
  }
  func.func @transform_6(%arg0: i32) -> (i32, i32) {
    %c0_i32 = arith.constant 0 : i32
    %c0_i32_0 = arith.constant 0 : i32
    %c0_i32_1 = arith.constant 0 : i32
    return %c0_i32, %c0_i32_0 : i32, i32
  }
  func.func @transform_7(%arg0: i32) -> (i32, i32) {
    %c0_i32 = arith.constant 0 : i32
    %c0_i32_0 = arith.constant 0 : i32
    %c0_i32_1 = arith.constant 0 : i32
    return %c0_i32, %c0_i32_0 : i32, i32
  }
  func.func @transform_8(%arg0: i32) -> (i32, i32) {
    %c0_i32 = arith.constant 0 : i32
    %c0_i32_0 = arith.constant 0 : i32
    %c0_i32_1 = arith.constant 0 : i32
    return %c0_i32, %c0_i32_0 : i32, i32
  }
  func.func @transform_9(%arg0: i32) -> (i32, i32) {
    %c0_i32 = arith.constant 0 : i32
    %c0_i32_0 = arith.constant 0 : i32
    %c0_i32_1 = arith.constant 0 : i32
    return %c0_i32, %c0_i32_0 : i32, i32
  }
  func.func @transform_10(%arg0: i32) -> (i32, i32) {
    %c0_i32 = arith.constant 0 : i32
    %c0_i32_0 = arith.constant 0 : i32
    %c0_i32_1 = arith.constant 0 : i32
    return %c0_i32, %c0_i32_0 : i32, i32
  }
  func.func @transform_11(%arg0: i32) -> (i32, i32) {
    %c0_i32 = arith.constant 0 : i32
    %c0_i32_0 = arith.constant 0 : i32
    %c0_i32_1 = arith.constant 0 : i32
    return %c0_i32, %c0_i32_0 : i32, i32
  }
  func.func @transform_12(%arg0: i32) -> (i32, i32) {
    %c0_i32 = arith.constant 0 : i32
    %c0_i32_0 = arith.constant 0 : i32
    %c0_i32_1 = arith.constant 0 : i32
    return %c0_i32, %c0_i32_0 : i32, i32
  }
  func.func @transform_13(%arg0: i32) -> (i32, i32) {
    %c0_i32 = arith.constant 0 : i32
    %c0_i32_0 = arith.constant 0 : i32
    %c0_i32_1 = arith.constant 0 : i32
    return %c0_i32, %c0_i32_0 : i32, i32
  }
  func.func @transform_14(%arg0: i32) -> (i32, i32) {
    %c0_i32 = arith.constant 0 : i32
    %c0_i32_0 = arith.constant 0 : i32
    %c0_i32_1 = arith.constant 0 : i32
    return %c0_i32, %c0_i32_0 : i32, i32
  }
  func.func @transform_15(%arg0: i32) -> (i32, i32) {
    %c0_i32 = arith.constant 0 : i32
    %c0_i32_0 = arith.constant 0 : i32
    %c0_i32_1 = arith.constant 0 : i32
    return %c0_i32, %c0_i32_0 : i32, i32
  }
  func.func @transform_16(%arg0: i32) -> (i32, i32) {
    %c0_i32 = arith.constant 0 : i32
    %c0_i32_0 = arith.constant 0 : i32
    %c0_i32_1 = arith.constant 0 : i32
    return %c0_i32, %c0_i32_0 : i32, i32
  }
  func.func @transform_17(%arg0: i32) -> (i32, i32) {
    %c0_i32 = arith.constant 0 : i32
    %c0_i32_0 = arith.constant 0 : i32
    %c0_i32_1 = arith.constant 0 : i32
    return %c0_i32, %c0_i32_0 : i32, i32
  }
}

</mosaic_0001>

<bundles_post_ra>
// kernel: forward.1
= control target key start
LH: loop header
LB: loop body
LE: loop exit
PB: predicated region body
PF: predicated region fallthrough
CT: control target
= control target key end

     0   :  { %s4007_s0 = inlined_call_operand.vmem [shape: bf16[32,2], index: 0, kind: input, shape index: {}]   ;;  %s4008_s1 = inlined_call_operand.hbm [shape: bf16[128,32], index: 1, kind: input, shape index: {}]   ;;  %s4009_s2 = inlined_call_operand.vmem [shape: f32[32,1], index: 2, kind: input, shape index: {}]   ;;  %s4010_s3 = inlined_call_operand.vmem [shape: f32[32,1], index: 3, kind: input, shape index: {}]   ;;  %s4011_s4 = inlined_call_operand.vmem [shape: bf16[256,32], index: 4, kind: input, shape index: {}]   ;;  %s4012_s5 = inlined_call_operand.hbm [shape: f32[16,8], index: 5, kind: input, shape index: {}]   ;;  %s4013_s6 = inlined_call_operand.hbm [shape: bf16[4,16], index: 6, kind: input, shape index: {}]   ;;  %s4014_s7 = inlined_call_operand.vmem [shape: f32[16,1], index: 7, kind: input, shape index: {}]   ;;  %s4015_s8 = inlined_call_operand.vmem [shape: f32[16,1], index: 8, kind: input, shape index: {}]   ;;  %s4016_s9 = inlined_call_operand.hbm [shape: bf16[128,16], index: 9, kind: input, shape index: {}]   ;;  %s4017_s10 = inlined_call_operand.hbm [shape: f32[16,32], index: 10, kind: input, shape index: {}]   ;;  %s4018_s11 = inlined_call_operand.vmem [shape: bf16[16,64], index: 11, kind: input, shape index: {}]   ;;  %s4019_s12 = inlined_call_operand.vmem [shape: f32[8,1], index: 12, kind: input, shape index: {}]   ;;  %s4020_s13 = inlined_call_operand.vmem [shape: f32[8,1], index: 13, kind: input, shape index: {}]   ;;  %s4021_s14 = inlined_call_operand.hbm [shape: bf16[128,8], index: 14, kind: input, shape index: {}]   ;;  %s4022_s15 = inlined_call_operand.vmem [shape: f32[16,128], index: 15, kind: input, shape index: {}]   ;;  %s4023_s16 = inlined_call_operand.hbm [shape: bf16[64,256], index: 16, kind: input, shape index: {}]   ;;  %s4024_s17 = inlined_call_operand.vmem [shape: f32[8,512], index: 17, kind: output, shape index: {}]  }
   0x1   :  { %4026 = sst [smem:[#allocation17_spill]] %s4007_s0 }
   0x2   :  { %4027 = sst [smem:[#allocation18_spill]] %s4008_s1 }
   0x3   :  { %22 = vsyncpa [#allocation3], 0 }
   0x4   :  { %23 = vsyncpa [#allocation5], 0 }
   0x5   :  { %24 = vsyncpa [#allocation8], 0 }
   0x6   :  { %25 = vsyncpa [#allocation11], 0  ;;  %s3230_s24 = smov [#allocation4]  }
   0x7   :  { %s51_s25 = sshll.u32 %s3230_s24, 4  ;;  %s52_s25 = int_to_ptr.vmem [resolvable:$true] %s51_s25 }
   0x8   :  { %s3090_s26 = scalar_lea.vmem %s52_s25, 256  ;;  %p3095_p1 = scmp.lt.s32.totalorder %s52_s25, %s52_s25 }
   0x9   :  { %p3091_p0 = scmp.ne.s32.totalorder %s52_s25, %s3090_s26  ;;  %p3096_p2 = scmp.lt.s32.totalorder %s3090_s26, %s3090_s26 }
   0xb   :  { %p3097_p3 = por %p3096_p2, %p3095_p1 }
   0xd   :  { %p3098_p4 = pnand %p3097_p3, %p3091_p0 }
   0xf   :  { %3101 = shalt.err (!%p3098_p4)
}
  0x10   :  { %s3231_s27 = smov 128   ;;  %s3232_s28 = smov 8  }
  0x11   :  { %57 = dma.hbm_to_vmem [thread:$0]  %s4012_s5, 256, %s52_s25, [#allocation5], %s3231_s27, %s3231_s27, %s3232_s28  }
  0x12   :  { %s3233_s30 = smov [#allocation7]   ;;  %s3234_s19 = smov [#allocation10]  }
  0x13   :  { %s77_s18 = sshll.u32 %s3233_s30, 4  ;;  %s107_s1 = sshll.u32 %s3234_s19, 4  ;;  %s78_s18 = int_to_ptr.vmem [resolvable:$true] %s77_s18  ;;  %s108_s1 = int_to_ptr.vmem [resolvable:$true] %s107_s1 }
  0x14   :  { %s3110_s20 = scalar_lea.vmem %s78_s18, 1024  ;;  %p3115_p6 = scmp.lt.s32.totalorder %s78_s18, %s78_s18 }
  0x15   :  { %p3111_p5 = scmp.ne.s32.totalorder %s78_s18, %s3110_s20  ;;  %p3116_p7 = scmp.lt.s32.totalorder %s3110_s20, %s3110_s20 }
  0x17   :  { %p3117_p8 = por %p3116_p7, %p3115_p6 }
  0x19   :  { %p3118_p9 = pnand %p3117_p8, %p3111_p5 }
  0x1b   :  { %3121 = shalt.err (!%p3118_p9)
}
  0x1c   :  { %s3235_s21 = smov 64   ;;  %s3236_s22 = smov 4  }
  0x1d   :  { %83 = dma.hbm_to_vmem [thread:$0]  %s4016_s9, 1024, %s78_s18, [#allocation8], %s3235_s21, %s3235_s21, %s3236_s22  }
  0x1e   :  { %s3130_s5 = scalar_lea.vmem %s108_s1, 1024  ;;  %p3135_p11 = scmp.lt.s32.totalorder %s108_s1, %s108_s1 }
  0x1f   :  { %p3131_p10 = scmp.ne.s32.totalorder %s108_s1, %s3130_s5  ;;  %p3136_p12 = scmp.lt.s32.totalorder %s3130_s5, %s3130_s5 }
  0x21   :  { %p3137_p13 = por %p3136_p12, %p3135_p11 }
  0x23   :  { %p3138_p0 = pnand %p3137_p13, %p3131_p10 }
  0x25   :  { %3141 = shalt.err (!%p3138_p0)
}
  0x26   :  { %113 = dma.hbm_to_vmem [thread:$0]  %s4021_s14, 1024, %s108_s1, [#allocation11], %s3235_s21, %s3235_s21, %s3236_s22  }
  0x27   :  { %s3237_s29 = smov [#allocation2]   ;;  %s3238_s30 = smov [#allocation6]  }
  0x28   :  { %s33_s0 = sshll.u32 %s3237_s29, 4  ;;  %s64_s9 = sshll.u32 %s3238_s30, 4  ;;  %s34_s0 = int_to_ptr.vmem [resolvable:$true] %s33_s0  ;;  %s65_s9 = int_to_ptr.vmem [resolvable:$true] %s64_s9 }
  0x29   :  { %s3150_s18 = scalar_lea.vmem %s34_s0, 1024  ;;  %p3155_p2 = scmp.lt.s32.totalorder %s34_s0, %s34_s0 }
  0x2a   :  { %p3151_p1 = scmp.ne.s32.totalorder %s34_s0, %s3150_s18  ;;  %p3156_p3 = scmp.lt.s32.totalorder %s3150_s18, %s3150_s18 }
  0x2c   :  { %p3157_p4 = por %p3156_p3, %p3155_p2 }
  0x2e   :  { %p3158_p5 = pnand %p3157_p4, %p3151_p1 }
  0x30   :  { %3161 = shalt.err (!%p3158_p5)
}
  0x31   :  { %s4028_s23 = sld [smem:[#allocation18_spill]]  ;;  %s3170_s14 = scalar_lea.vmem %s65_s9, 32 }
  0x32   :  { %p3171_p6 = scmp.ne.s32.totalorder %s65_s9, %s3170_s14  ;;  %p3175_p7 = scmp.lt.s32.totalorder %s65_s9, %s65_s9 }
  0x33   :  { %p3176_p8 = scmp.lt.s32.totalorder %s3170_s14, %s3170_s14 }
  0x35   :  { %p3177_p9 = por %p3176_p8, %p3175_p7 }
  0x37   :  { %39 = dma.hbm_to_vmem [thread:$0]  %s4028_s23, 1024, %s34_s0, [#allocation3], %s3235_s21, %s3235_s21, %s3236_s22  }
  0x38   :  { %p3178_p10 = pnand %p3177_p9, %p3171_p6 }
  0x3a   :  { %3181 = shalt.err (!%p3178_p10)
}
  0x3b   :  { %67 = dma.hbm_to_vmem [thread:$0]  %s4013_s6, 32, %s65_s9, [#allocation5]  }
  0x3c   :  { %s3239_s5 = smov [#allocation9]   ;;  %s3240_s26 = smov [#allocation12]  }
  0x3d   :  { %s89_s25 = sshll.u32 %s3239_s5, 4  ;;  %s121_s29 = sshll.u32 %s3240_s26, 4  ;;  %s90_s25 = int_to_ptr.vmem [resolvable:$true] %s89_s25  ;;  %s122_s29 = int_to_ptr.vmem [resolvable:$true] %s121_s29 }
  0x3e   :  { %s3190_s30 = scalar_lea.vmem %s90_s25, 256  ;;  %p3195_p12 = scmp.lt.s32.totalorder %s90_s25, %s90_s25 }
  0x3f   :  { %p3191_p11 = scmp.ne.s32.totalorder %s90_s25, %s3190_s30  ;;  %p3196_p13 = scmp.lt.s32.totalorder %s3190_s30, %s3190_s30 }
  0x41   :  { %p3197_p0 = por %p3196_p13, %p3195_p12 }
  0x43   :  { %p3198_p1 = pnand %p3197_p0, %p3191_p11 }
  0x45   :  { %3201 = shalt.err (!%p3198_p1)
}
  0x46   :  { %95 = dma.hbm_to_vmem [thread:$0]  %s4017_s10, 256, %s90_s25, [#allocation8], %s3231_s27, %s3231_s27, %s3232_s28  }
  0x47   :  { %s3210_s6 = scalar_lea.vmem %s122_s29, 1024  ;;  %p3215_p3 = scmp.lt.s32.totalorder %s122_s29, %s122_s29 }
  0x48   :  { %p3211_p2 = scmp.ne.s32.totalorder %s122_s29, %s3210_s6  ;;  %p3216_p4 = scmp.lt.s32.totalorder %s3210_s6, %s3210_s6 }
  0x4a   :  { %p3217_p5 = por %p3216_p4, %p3215_p3 }
  0x4c   :  { %p3218_p6 = pnand %p3217_p5, %p3211_p2 }
  0x4e   :  { %3221 = shalt.err (!%p3218_p6)
}
  0x4f   :  { %127 = dma.hbm_to_vmem [thread:$0]  %s4023_s16, 1024, %s122_s29, [#allocation11], %s3231_s27, %s3231_s27, %s3232_s28  }
  0x50   :  { %3222 = dma.done.wait [#allocation3], 1024  }
  0x51   :  { %3223 = vsyncadd [#allocation3], 4294966272 }
  0x52   :  { %3224 = dma.done.wait [#allocation5], 288  }
  0x53   :  { %3225 = vsyncadd [#allocation5], 4294967008 }
  0x54   :  { %3226 = dma.done.wait [#allocation8], 1280  }
  0x55   :  { %3227 = vsyncadd [#allocation8], 4294966016 }
  0x56   :  { %3228 = dma.done.wait [#allocation11], 2048  }
  0x57   :  { %3229 = vsyncadd [#allocation11], 4294965248  ;;  %s4029_s23 = sld [smem:[#allocation17_spill]]  ;;  %v2999_v2 = vld [vmem:[#allocation2] sm:$0xff]   ;;  %vm222_vm0 = vcmask 261120   ;;  %v3000_v3 = vld [vmem:[#allocation2 + $0x30] sm:$0xff]  }
  0x58   :  { %2837 = vmatprep.mubr.msk.bf16.mxu0 %vm222_vm0, %v2999_v2  ;;  %2849 = vmatprep.mubr.msk.bf16.mxu1 %vm222_vm0, %v3000_v3  ;;  %v3001_v4 = vld [vmem:[#allocation2 + $0x8] sm:$0xff]   ;;  %v3002_v5 = vld [vmem:[#allocation2 + $0x38] sm:$0xff]   ;;  %v3003_v6 = vld [vmem:[#allocation2 + $0x10] sm:$0xff]   ;;  %s3241_s16 = smov 3   ;;  %s3242_s27 = smov 6   ;;  %v3246_v25 = vmov 0  }
  0x59   :  { %v3004_v7 = vld [vmem:[#allocation2 + $0x18] sm:$0xff]   ;;  %v3005_v8 = vld [vmem:[#allocation2 + $0x20] sm:$0xff]   ;;  %v3006_v9 = vld [vmem:[#allocation2 + $0x28] sm:$0xff]   ;;  %s3243_s24 = smov 1   ;;  %s3244_s5 = smov 2   ;;  %2995 = vset.pattern.permute.xlu1 %v3246_v25  ;;  %2996 = vset.pattern.permute.xlu0 %v3246_v25  ;;  %vm444_vm1 = vcmask 7168  }
  0x5a   :  { %s3245_s25 = smov 5   ;;  %vm449_vm2 = vcmask 15360   ;;  %vm454_vm3 = vcmask 23552   ;;  %vm459_vm4 = vcmask 31744   ;;  %vm464_vm5 = vcmask 39936   ;;  %s3247_s30 = smov 126  }
  0x5b   :  { %vm469_vm6 = vcmask 48128   ;;  %vm474_vm7 = vcmask 56320   ;;  %vm487_vm8 = vcmask 64512   ;;  %s3248_s0 = smov 125   ;;  %vm1183_vm9 = vcmask 1041408   ;;  %s3257_s26 = smov 120  }
  0x5c   :  { %vm1421_vm10 = vcmask 130048   ;;  %vm1712_vm11 = vcmask 252928   ;;  %vm1665_vm12 = vcmask 220160   ;;  %vm1677_vm13 = vcmask 228352   ;;  %s3258_s29 = smov 121  }
  0x5d   :  { %v2997_v0 = vld [vmem:[%s4029_s23 + $0x8] sm:$0xff]   ;;  %v2998_v1 = vld [vmem:[%s4029_s23] sm:$0xff]   ;;  %vm1700_vm14 = vcmask 236544   ;;  %vm1902_vm15 = vcmask 72704  }
  0x5e   :  { %2833 = vmatprep.subr.bf16.mxu0 %v2997_v0  ;;  %2957 = vmatprep.subr.bf16.mxu1 %v2997_v0 }
  0x5f   :  { %2834 = vmatpush3.bf16.msra.mxu0 %v2997_v0  ;;  %2959 = vmatpush3.bf16.msra.mxu1 %v2997_v0 }
  0x60   :  { %2835 = vmatprep.subr.bf16.mxu0 %v2998_v1  ;;  %2958 = vmatprep.subr.bf16.mxu1 %v2998_v1 }
  0x63   :  { %2836 = vmatpush3.bf16.msra.mxu0 %v2998_v1  ;;  %2960 = vmatpush3.bf16.msra.mxu1 %v2998_v1 }
  0x66   :  { %2838 = vmatmul.mubr.msk.bf16.vlgmr.msra.gmra.mxu0 %vm222_vm0, %v3001_v4  ;;  %2850 = vmatmul.mubr.msk.bf16.vlgmr.msra.gmra.mxu1 %vm222_vm0, %v3002_v5 }
  0x67   :  { %2841 = vmatprep.mubr.msk.bf16.mxu0 %vm222_vm0, %v3003_v6 }
  0x6e   :  { %2842 = vmatmul.mubr.msk.bf16.gmra.mxu0 %vm222_vm0, %v3004_v7 }
  0x6f   :  { %2845 = vmatprep.mubr.msk.bf16.mxu0 %vm222_vm0, %v3005_v8 }
  0x76   :  { %2846 = vmatmul.mubr.msk.bf16.gmra.mxu0 %vm222_vm0, %v3006_v9 }
 0x126   :  { %v3404_v10 = vpop.f32.mrf.mxu0  ;;  %v2851_v11 = vpop.f32.mrf.mxu1 }
 0x127   :  { %384 = vrot.lane.b32.xlu0 %v2851_v11, %s3241_s16 }
 0x128   :  { %v329_v12 = vpop.f32.mrf.mxu1  ;;  %v3407_v13 = vpop.f32.mrf.mxu0 }
 0x12a   :  { %v2852_v14 = vpop.f32.mrf.mxu1  ;;  %v3412_v15 = vpop.f32.mrf.mxu0 }
 0x12b   :  { %386 = vrot.lane.b32.xlu1 %v2852_v14, %s3241_s16  ;;  %400 = vrot.lane.b32.xlu0 %v3404_v10, %s3241_s16 }
 0x12c   :  { %v3419_v16 = vpop.f32.mrf.mxu0  ;;  %v332_v17 = vpop.f32.mrf.mxu1 }
 0x12e   :  { %v2843_v18 = vpop.f32.mrf.mxu0 }
 0x12f   :  { %436 = vrot.lane.b32.xlu0 %v2851_v11, %s3242_s27  ;;  %402 = vrot.lane.b32.xlu1 %v3412_v15, %s3241_s16 }
 0x130   :  { %v297_v19 = vpop.f32.mrf.mxu0 }
 0x132   :  { %v2844_v20 = vpop.f32.mrf.mxu0 }
 0x133   :  { %380 = vrot.lane.b32.xlu0 %v329_v12, %s3241_s16  ;;  %438 = vrot.lane.b32.xlu1 %v2852_v14, %s3242_s27 }
 0x134   :  { %v300_v21 = vpop.f32.mrf.mxu0 }
 0x136   :  { %v2847_v22 = vpop.f32.mrf.mxu0 }
 0x137   :  { %396 = vrot.lane.b32.xlu0 %v3407_v13, %s3241_s16  ;;  %382 = vrot.lane.b32.xlu1 %v332_v17, %s3241_s16 }
 0x138   :  { %v313_v23 = vpop.f32.mrf.mxu0 }
 0x13a   :  { %v2848_v24 = vpop.f32.mrf.mxu0 }
 0x13b   :  { %398 = vrot.lane.b32.xlu1 %v3419_v16, %s3241_s16  ;;  %352 = vrot.lane.b32.xlu0 %v2843_v18, %s3243_s24 }
 0x13c   :  { %v316_v26 = vpop.f32.mrf.mxu0 }
 0x13f   :  { %412 = vrot.lane.b32.xlu0 %v2843_v18, %s3236_s22  ;;  %414 = vrot.lane.b32.xlu1 %v2844_v20, %s3236_s22 }
 0x143   :  { %348 = vrot.lane.b32.xlu0 %v297_v19, %s3243_s24  ;;  %350 = vrot.lane.b32.xlu1 %v300_v21, %s3243_s24 }
 0x147   :  { %408 = vrot.lane.b32.xlu0 %v297_v19, %s3236_s22  ;;  %410 = vrot.lane.b32.xlu1 %v300_v21, %s3236_s22 }
 0x14b   :  { %354 = vrot.lane.b32.xlu0 %v2844_v20, %s3243_s24  ;;  %368 = vrot.lane.b32.xlu1 %v2847_v22, %s3244_s5 }
 0x14f   :  { %424 = vrot.lane.b32.xlu0 %v2847_v22, %s3245_s25  ;;  %370 = vrot.lane.b32.xlu1 %v2848_v24, %s3244_s5 }
 0x153   :  { %364 = vrot.lane.b32.xlu0 %v313_v23, %s3244_s5  ;;  %426 = vrot.lane.b32.xlu1 %v2848_v24, %s3245_s25 }
 0x157   :  { %420 = vrot.lane.b32.xlu0 %v313_v23, %s3245_s25  ;;  %366 = vrot.lane.b32.xlu1 %v316_v26, %s3244_s5  ;;  %v481_v23 = vld [vmem:[%s4009_s2 + $0x10] sm:$0xff] }
 0x15b   :  { %432 = vrot.lane.b32.xlu0 %v329_v12, %s3242_s27  ;;  %422 = vrot.lane.b32.xlu1 %v316_v26, %s3245_s25 }
 0x15f   :  { %434 = vrot.lane.b32.xlu1 %v332_v17, %s3242_s27 }
 0x199   :  { %v385_v27 = vpop.permute.xlu0 %384 }
 0x19d   :  { %v387_v28 = vpop.permute.xlu1 %386  ;;  %v401_v29 = vpop.permute.xlu0 %400 }
 0x1a1   :  { %v437_v30 = vpop.permute.xlu0 %436  ;;  %v403_v31 = vpop.permute.xlu1 %402 }
 0x1a5   :  { %v381_v32 = vpop.permute.xlu0 %380  ;;  %v439_v33 = vpop.permute.xlu1 %438 }
 0x1a9   :  { %v397_v34 = vpop.permute.xlu0 %396  ;;  %v383_v35 = vpop.permute.xlu1 %382 }
 0x1ad   :  { %v399_v36 = vpop.permute.xlu1 %398  ;;  %v353_v37 = vpop.permute.xlu0 %352 }
 0x1ae   :  { %v447_v44 = vsel %vm444_vm1, %v3404_v10, %v353_v37 }
 0x1b1   :  { %v413_v38 = vpop.permute.xlu0 %412  ;;  %v415_v39 = vpop.permute.xlu1 %414 }
 0x1b5   :  { %v349_v40 = vpop.permute.xlu0 %348  ;;  %v351_v41 = vpop.permute.xlu1 %350 }
 0x1b6   :  { %v445_v60 = vsel %vm444_vm1, %v3407_v13, %v349_v40  ;;  %v446_v6 = vsel %vm444_vm1, %v3419_v16, %v351_v41 }
 0x1b9   :  { %v409_v42 = vpop.permute.xlu0 %408  ;;  %v411_v43 = vpop.permute.xlu1 %410 }
 0x1bd   :  { %v355_v45 = vpop.permute.xlu0 %354  ;;  %v369_v46 = vpop.permute.xlu1 %368 }
 0x1be   :  { %v452_v47 = vsel %vm449_vm2, %v447_v44, %v369_v46  ;;  %v448_v50 = vsel %vm444_vm1, %v3412_v15, %v355_v45  ;;  %v485_v45 = vld [vmem:[%s4010_s3 + $0x10] sm:$0xff]  ;;  %v486_v46 = vld [vmem:[%s4010_s3 + $0x18] sm:$0xff] }
 0x1bf   :  { %v457_v48 = vsel %vm454_vm3, %v452_v47, %v385_v27  ;;  %v479_v47 = vld [vmem:[%s4009_s2] sm:$0xff] }
 0x1c0   :  { %v462_v49 = vsel %vm459_vm4, %v457_v48, %v401_v29  ;;  %v482_v48 = vld [vmem:[%s4009_s2 + $0x18] sm:$0xff] }
 0x1c1   :  { %v425_v51 = vpop.permute.xlu0 %424  ;;  %v467_v52 = vsel %vm464_vm5, %v462_v49, %v413_v38  ;;  %v371_v53 = vpop.permute.xlu1 %370  ;;  %v480_v49 = vld [vmem:[%s4009_s2 + $0x8] sm:$0xff]  ;;  %s3249_s2 = smov 127  }
 0x1c2   :  { %v472_v54 = vsel %vm469_vm6, %v467_v52, %v425_v51  ;;  %v453_v55 = vsel %vm449_vm2, %v448_v50, %v371_v53  ;;  %v483_v50 = vld [vmem:[%s4010_s3] sm:$0xff]  ;;  %v484_v51 = vld [vmem:[%s4010_s3 + $0x8] sm:$0xff] }
 0x1c3   :  { %v458_v56 = vsel %vm454_vm3, %v453_v55, %v387_v28  ;;  %v477_v57 = vsel %vm474_vm7, %v472_v54, %v437_v30  ;;  %v3007_v52 = vld [vmem:[%s4011_s4] sm:$0xff]  }
 0x1c4   :  { %v494_v58 = vsel %vm487_vm8, %v477_v57, 0.0  ;;  %v463_v59 = vsel %vm459_vm4, %v458_v56, %v403_v31  ;;  %2857 = vmatprep.mubr.msk.bf16.mxu1 %vm222_vm0, %v3007_v52 }
 0x1c5   :  { %495 = vadd.xlane.f32.xlu0 %v494_v58  ;;  %v365_v61 = vpop.permute.xlu0 %364  ;;  %v468_v62 = vsel %vm464_vm5, %v463_v59, %v415_v39  ;;  %v427_v63 = vpop.permute.xlu1 %426 }
 0x1c6   :  { %v450_v0 = vsel %vm449_vm2, %v445_v60, %v365_v61  ;;  %v473_v1 = vsel %vm469_vm6, %v468_v62, %v427_v63 }
 0x1c7   :  { %v455_v2 = vsel %vm454_vm3, %v450_v0, %v381_v32  ;;  %v478_v3 = vsel %vm474_vm7, %v473_v1, %v439_v33 }
 0x1c8   :  { %v460_v4 = vsel %vm459_vm4, %v455_v2, %v397_v34  ;;  %v497_v5 = vsel %vm487_vm8, %v478_v3, 0.0 }
 0x1c9   :  { %v421_v7 = vpop.permute.xlu0 %420  ;;  %498 = vadd.xlane.f32.xlu1 %v497_v5  ;;  %v367_v8 = vpop.permute.xlu1 %366  ;;  %v465_v9 = vsel %vm464_vm5, %v460_v4, %v409_v42 }
 0x1ca   :  { %v451_v10 = vsel %vm449_vm2, %v446_v6, %v367_v8  ;;  %v470_v13 = vsel %vm469_vm6, %v465_v9, %v421_v7 }
 0x1cb   :  { %v456_v11 = vsel %vm454_vm3, %v451_v10, %v383_v35 }
 0x1cc   :  { %v461_v12 = vsel %vm459_vm4, %v456_v11, %v399_v36 }
 0x1cd   :  { %v433_v14 = vpop.permute.xlu0 %432  ;;  %v423_v15 = vpop.permute.xlu1 %422  ;;  %v466_v17 = vsel %vm464_vm5, %v461_v12, %v411_v43 }
 0x1ce   :  { %v475_v18 = vsel %vm474_vm7, %v470_v13, %v433_v14  ;;  %v471_v19 = vsel %vm469_vm6, %v466_v17, %v423_v15 }
 0x1cf   :  { %v488_v16 = vsel %vm487_vm8, %v475_v18, 0.0 }
 0x1d0   :  { %489 = vadd.xlane.f32.xlu0 %v488_v16 }
 0x1d1   :  { %v435_v20 = vpop.permute.xlu1 %434 }
 0x1d2   :  { %v476_v21 = vsel %vm474_vm7, %v471_v19, %v435_v20 }
 0x1d3   :  { %v491_v22 = vsel %vm487_vm8, %v476_v21, 0.0 }
 0x1d4   :  { %492 = vadd.xlane.f32.xlu0 %v491_v22 }
 0x1da   :  { %553 = vperm.xlu1 %2995, %v481_v23  }
 0x24e   :  { %v496_v24 = vpop.xlane.xlu0 %495 }
 0x24f   :  { %v503_v26 = vmul.f32 0.125, %v496_v24 }
 0x251   :  { %v507_v27 = vsub.f32 %v477_v57, %v503_v26 }
 0x252   :  { %v499_v28 = vpop.xlane.xlu1 %498 }
 0x253   :  { %v504_v29 = vmul.f32 0.125, %v499_v28  ;;  %v511_v30 = vmul.f32 %v507_v27, %v507_v27 }
 0x255   :  { %v508_v31 = vsub.f32 %v478_v3, %v504_v29  ;;  %v519_v32 = vsel %vm487_vm8, %v511_v30, 0.0 }
 0x256   :  { %520 = vadd.xlane.f32.xlu1 %v519_v32  ;;  %v554_v53 = vpop.permute.xlu1 %553  ;;  %v3008_v32 = vld [vmem:[%s4011_s4 + $0x8] sm:$0xff]  }
 0x257   :  { %v512_v33 = vmul.f32 %v508_v31, %v508_v31 }
 0x259   :  { %v490_v34 = vpop.xlane.xlu0 %489  ;;  %v522_v35 = vsel %vm487_vm8, %v512_v33, 0.0  ;;  %v3009_v33 = vld [vmem:[%s4011_s4 + $0x10] sm:$0xff]  }
 0x25a   :  { %v501_v36 = vmul.f32 0.125, %v490_v34  ;;  %523 = vadd.xlane.f32.xlu0 %v522_v35  ;;  %v3010_v34 = vld [vmem:[%s4011_s4 + $0x18] sm:$0xff]   ;;  %v3011_v35 = vld [vmem:[%s4011_s4 + $0x20] sm:$0xff]  }
 0x25c   :  { %v505_v37 = vsub.f32 %v475_v18, %v501_v36  ;;  %v3012_v36 = vld [vmem:[%s4011_s4 + $0x28] sm:$0xff]  }
 0x25d   :  { %v493_v38 = vpop.xlane.xlu0 %492 }
 0x25e   :  { %v502_v39 = vmul.f32 0.125, %v493_v38  ;;  %v509_v40 = vmul.f32 %v505_v37, %v505_v37  ;;  %v3014_v38 = vld [vmem:[%s4011_s4 + $0x38] sm:$0xff]  }
 0x260   :  { %v506_v41 = vsub.f32 %v476_v21, %v502_v39  ;;  %v513_v42 = vsel %vm487_vm8, %v509_v40, 0.0  ;;  %v3015_v39 = vld [vmem:[%s4011_s4 + $0x40] sm:$0xff]   ;;  %v3016_v40 = vld [vmem:[%s4011_s4 + $0x48] sm:$0xff]  }
 0x261   :  { %514 = vadd.xlane.f32.xlu1 %v513_v42  ;;  %v3018_v42 = vld [vmem:[%s4011_s4 + $0x58] sm:$0xff]  }
 0x262   :  { %v510_v43 = vmul.f32 %v506_v41, %v506_v41 }
 0x264   :  { %v516_v44 = vsel %vm487_vm8, %v510_v43, 0.0  ;;  %v3019_v43 = vld [vmem:[%s4011_s4 + $0x60] sm:$0xff]  }
 0x265   :  { %517 = vadd.xlane.f32.xlu0 %v516_v44  ;;  %v3020_v44 = vld [vmem:[%s4011_s4 + $0x68] sm:$0xff]  }
 0x272   :  { %577 = vperm.xlu1 %2995, %v485_v45   ;;  %v3021_v45 = vld [vmem:[%s4011_s4 + $0x70] sm:$0xff]  }
 0x276   :  { %582 = vperm.xlu1 %2995, %v486_v46   ;;  %v3022_v46 = vld [vmem:[%s4011_s4 + $0x78] sm:$0xff]  }
 0x27a   :  { %543 = vperm.xlu1 %2995, %v479_v47  }
 0x27b   :  { %558 = vperm.xlu0 %2996, %v482_v48  }
 0x27e   :  { %548 = vperm.xlu1 %2995, %v480_v49  }
 0x282   :  { %567 = vperm.xlu1 %2995, %v483_v50  }
 0x286   :  { %572 = vperm.xlu1 %2995, %v484_v51  }
 0x2df   :  { %v521_v54 = vpop.xlane.xlu1 %520 }
 0x2e0   :  { %v527_v55 = vmul.f32 0.125, %v521_v54 }
 0x2e2   :  { %v531_v56 = vadd.f32 1e-05, %v527_v55 }
 0x2e3   :  { %v524_v57 = vpop.xlane.xlu0 %523 }
 0x2e4   :  { %3052 = vrsqrt.f32 %v531_v56  ;;  %v528_v58 = vmul.f32 0.125, %v524_v57 }
 0x2e6   :  { %v532_v59 = vadd.f32 1e-05, %v528_v58 }
 0x2e8   :  { %3054 = vrsqrt.f32 %v532_v59 }
 0x2ea   :  { %v515_v60 = vpop.xlane.xlu1 %514 }
 0x2eb   :  { %v525_v61 = vmul.f32 0.125, %v515_v60 }
 0x2ed   :  { %v529_v62 = vadd.f32 1e-05, %v525_v61 }
 0x2ee   :  { %v518_v63 = vpop.xlane.xlu0 %517  ;;  %v578_v0 = vpop.permute.xlu1 %577 }
 0x2ef   :  { %3056 = vrsqrt.f32 %v529_v62  ;;  %v526_v1 = vmul.f32 0.125, %v518_v63 }
 0x2f1   :  { %v3053_v2 = vpop.eup %3052  ;;  %v530_v3 = vadd.f32 1e-05, %v526_v1 }
 0x2f2   :  { %v539_v4 = vmul.f32 %v3053_v2, %v507_v27  ;;  %v583_v5 = vpop.permute.xlu1 %582 }
 0x2f3   :  { %3058 = vrsqrt.f32 %v530_v3 }
 0x2f4   :  { %v563_v6 = vmul.f32 %v554_v53, %v539_v4 }
 0x2f5   :  { %v3055_v7 = vpop.eup %3054 }
 0x2f6   :  { %v544_v8 = vpop.permute.xlu1 %543  ;;  %v540_v9 = vmul.f32 %v3055_v7, %v508_v31  ;;  %v559_v10 = vpop.permute.xlu0 %558  ;;  %v587_v11 = vadd.f32 %v578_v0, %v563_v6 }
 0x2f8   :  { %v564_v12 = vmul.f32 %v559_v10, %v540_v9  ;;  %v591_v17 = vmax.f32 %v587_v11, 0.0  ;;  %v1170_v11 = vld [vmem:[#allocation6] sm:$0x3] }
 0x2f9   :  { %2961 = vmatprep.subr.msk.bf16.mxu0 %vm1183_vm9, %v1170_v11 }
 0x2fa   :  { %v588_v13 = vadd.f32 %v583_v5, %v564_v12  ;;  %v549_v14 = vpop.permute.xlu1 %548  ;;  %v3601_v12 = vsel %vm1183_vm9, %v1170_v11, 0 }
 0x2fb   :  { %2890 = vmatpush3.bf16.msra.mxu0 %v3601_v12 }
 0x2fc   :  { %v3057_v15 = vpop.eup %3056  ;;  %v592_v18 = vmax.f32 %v588_v13, 0.0  ;;  %2962 = vmatprep.subr.msk.bf16.mxu0 %vm1183_vm9, %v1170_v11 }
 0x2fd   :  { %v537_v16 = vmul.f32 %v3057_v15, %v505_v37  ;;  %v3013_v37 = vld [vmem:[%s4011_s4 + $0x30] sm:$0xff]  }
 0x2fe   :  { %v568_v19 = vpop.permute.xlu1 %567  ;;  %v626_v20 = vpack.c.bf16 %v592_v18, %v591_v17 }
 0x2ff   :  { %v561_v21 = vmul.f32 %v544_v8, %v537_v16 }
 0x300   :  { %v3059_v22 = vpop.eup %3058  ;;  %2853 = vmatprep.subr.bf16.mxu1 %v626_v20 }
 0x301   :  { %v538_v23 = vmul.f32 %v3059_v22, %v506_v41  ;;  %2854 = vmatpush3.bf16.msra.mxu1 %v626_v20  ;;  %v585_v26 = vadd.f32 %v568_v19, %v561_v21  ;;  %v3017_v41 = vld [vmem:[%s4011_s4 + $0x50] sm:$0xff]   ;;  %s3250_s4 = smov 124  }
 0x302   :  { %v573_v27 = vpop.permute.xlu1 %572 }
 0x303   :  { %v562_v24 = vmul.f32 %v549_v14, %v538_v23  ;;  %v589_v29 = vmax.f32 %v585_v26, 0.0 }
 0x305   :  { %v586_v28 = vadd.f32 %v573_v27, %v562_v24  ;;  %v928_v24 = vlaneseq }
 0x307   :  { %v590_v30 = vmax.f32 %v586_v28, 0.0  ;;  %v929_v27 = vshrl.u32 %v928_v24, 7 }
 0x309   :  { %v625_v31 = vpack.c.bf16 %v590_v30, %v589_v29  ;;  %v3617_v30 = vsub.s32 5, %v929_v27 }
 0x30b   :  { %2855 = vmatprep.subr.bf16.mxu1 %v625_v31 }
 0x30c   :  { %2856 = vmatpush3.bf16.msra.mxu1 %v625_v31 }
 0x30f   :  { %2858 = vmatmul.mubr.msk.bf16.vlgmr.msra.gmra.mxu1 %vm222_vm0, %v3008_v32  ;;  %v916_v32 = vld [vmem:[#allocation4] sm:$0xff] }
 0x310   :  { %2861 = vmatprep.mubr.msk.bf16.mxu1 %vm222_vm0, %v3009_v33  ;;  %v3619_v33 = vsub.s32 6, %v929_v27 }
 0x317   :  { %2862 = vmatmul.mubr.msk.bf16.gmra.mxu1 %vm222_vm0, %v3010_v34  ;;  %v3621_v34 = vsub.s32 1, %v929_v27 }
 0x318   :  { %2865 = vmatprep.mubr.msk.bf16.mxu1 %vm222_vm0, %v3011_v35  ;;  %v3623_v35 = vsub.s32 2, %v929_v27 }
 0x31f   :  { %2866 = vmatmul.mubr.msk.bf16.gmra.mxu1 %vm222_vm0, %v3012_v36  ;;  %v3625_v36 = vld [vmem:[#allocation4 + $0x8] sm:$0xff] }
 0x320   :  { %2869 = vmatprep.mubr.msk.bf16.mxu1 %vm222_vm0, %v3013_v37  ;;  %v3627_v37 = vsub.s32 0, %v929_v27 }
 0x327   :  { %2870 = vmatmul.mubr.msk.bf16.gmra.mxu1 %vm222_vm0, %v3014_v38  ;;  %v3629_v38 = vsub.s32 3, %v929_v27 }
 0x328   :  { %2873 = vmatprep.mubr.msk.bf16.mxu1 %vm222_vm0, %v3015_v39  ;;  %v3631_v39 = vsub.s32 4, %v929_v27 }
 0x32f   :  { %2874 = vmatmul.mubr.msk.bf16.gmra.mxu1 %vm222_vm0, %v3016_v40  ;;  %v1011_v40 = vrot.slane %v916_v32, %v3617_v30 }
 0x330   :  { %2877 = vmatprep.mubr.msk.bf16.mxu1 %vm222_vm0, %v3017_v41  ;;  %v3634_v41 = vsub.s32 7, %v929_v27 }
 0x337   :  { %2878 = vmatmul.mubr.msk.bf16.gmra.mxu1 %vm222_vm0, %v3018_v42 }
 0x338   :  { %2881 = vmatprep.mubr.msk.bf16.mxu1 %vm222_vm0, %v3019_v43 }
 0x33f   :  { %2882 = vmatmul.mubr.msk.bf16.gmra.mxu1 %vm222_vm0, %v3020_v44  ;;  %v1019_v44 = vrot.slane %v916_v32, %v3619_v33 }
 0x340   :  { %2885 = vmatprep.mubr.msk.bf16.mxu1 %vm222_vm0, %v3021_v45  ;;  %v3639_v45 = vrot.slane %v3625_v36, %v3621_v34 }
 0x347   :  { %2886 = vmatmul.mubr.msk.bf16.gmra.mxu1 %vm222_vm0, %v3022_v46  ;;  %v3643_v46 = vrot.slane %v3625_v36, %v3623_v35 }
 0x3cf   :  { %v2859_v47 = vpop.f32.mrf.mxu1 }
 0x3d0   :  { %938 = vrot.lane.b32.xlu0 %v2859_v47, %s3247_s30  ;;  %v3646_v47 = vrot.slane %v916_v32, %v3621_v34 }
 0x3d1   :  { %v789_v48 = vpop.f32.mrf.mxu1 }
 0x3d3   :  { %v2860_v49 = vpop.f32.mrf.mxu1 }
 0x3d4   :  { %920 = vrot.lane.b32.xlu0 %v789_v48, %s3248_s0  ;;  %940 = vrot.lane.b32.xlu1 %v2860_v49, %s3247_s30  ;;  %v3649_v48 = vrot.slane %v916_v32, %v3627_v37  ;;  %v985_v49 = vrot.slane %v916_v32, %v3629_v38 }
 0x3d5   :  { %v792_v50 = vpop.f32.mrf.mxu1 }
 0x3d7   :  { %v2863_v51 = vpop.f32.mrf.mxu1 }
 0x3d8   :  { %922 = vrot.lane.b32.xlu1 %v792_v50, %s3248_s0  ;;  %974 = vrot.lane.b32.xlu0 %v2863_v51, %s3249_s2  ;;  %v967_v50 = vrot.slane %v916_v32, %v3623_v35  ;;  %v1003_v51 = vrot.slane %v916_v32, %v3631_v39 }
 0x3d9   :  { %v805_v52 = vpop.f32.mrf.mxu1 }
 0x3db   :  { %v2864_v53 = vpop.f32.mrf.mxu1 }
 0x3dc   :  { %956 = vrot.lane.b32.xlu0 %v805_v52, %s3247_s30  ;;  %976 = vrot.lane.b32.xlu1 %v2864_v53, %s3249_s2 }
 0x3dd   :  { %v808_v54 = vpop.f32.mrf.mxu1 }
 0x3df   :  { %v3578_v55 = vpop.f32.mrf.mxu1 }
 0x3e0   :  { %958 = vrot.lane.b32.xlu1 %v808_v54, %s3247_s30  ;;  %v1012_v52 = vmul.f32 %v3578_v55, %v1011_v40  ;;  %v1037_v54 = vrot.slane %v916_v32, %v3634_v41  ;;  %v1107_v55 = vrot.slane %v3625_v36, %v3631_v39 }
 0x3e1   :  { %v821_v56 = vpop.f32.mrf.mxu1 }
 0x3e2   :  { %992 = vrot.lane.b32.xlu0 %v821_v56, %s3249_s2  ;;  %v1125_v56 = vrot.slane %v3625_v36, %v3617_v30 }
 0x3e3   :  { %v3581_v57 = vpop.f32.mrf.mxu1 }
 0x3e4   :  { %v1013_v53 = vmul.f32 %v3581_v57, %v1011_v40  ;;  %v1161_v57 = vrot.slane %v3625_v36, %v3634_v41 }
 0x3e5   :  { %v824_v58 = vpop.f32.mrf.mxu1 }
 0x3e6   :  { %994 = vrot.lane.b32.xlu1 %v824_v58, %s3249_s2 }
 0x3e7   :  { %v2871_v59 = vpop.f32.mrf.mxu1 }
 0x3e9   :  { %v3584_v60 = vpop.f32.mrf.mxu1 }
 0x3ea   :  { %1026 = vrot.lane.b32.xlu1 %v2871_v59, %s3243_s24 }
 0x3eb   :  { %v2872_v61 = vpop.f32.mrf.mxu1 }
 0x3ed   :  { %v3587_v62 = vpop.f32.mrf.mxu1 }
 0x3ee   :  { %1028 = vrot.lane.b32.xlu1 %v2872_v61, %s3243_s24  ;;  %v1020_v61 = vmul.f32 %v1019_v44, %v3584_v60 }
 0x3ef   :  { %v3590_v63 = vpop.f32.mrf.mxu1 }
 0x3f1   :  { %v853_v0 = vpop.f32.mrf.mxu1 }
 0x3f3   :  { %v3592_v1 = vpop.f32.mrf.mxu1 }
 0x3f5   :  { %v856_v2 = vpop.f32.mrf.mxu1 }
 0x3f7   :  { %v2879_v3 = vpop.f32.mrf.mxu1 }
 0x3f9   :  { %v3594_v4 = vpop.f32.mrf.mxu1 }
 0x3fb   :  { %v2880_v5 = vpop.f32.mrf.mxu1 }
 0x3fd   :  { %v3596_v6 = vpop.f32.mrf.mxu1 }
 0x3ff   :  { %v2883_v7 = vpop.f32.mrf.mxu1 }
 0x400   :  { %1114 = vrot.lane.b32.xlu0 %v2883_v7, %s3244_s5  ;;  %v1143_v7 = vrot.slane %v3625_v36, %v3619_v33 }
 0x401   :  { %v885_v8 = vpop.f32.mrf.mxu1 }
 0x403   :  { %v2884_v9 = vpop.f32.mrf.mxu1 }
 0x404   :  { %1096 = vrot.lane.b32.xlu0 %v885_v8, %s3243_s24  ;;  %1116 = vrot.lane.b32.xlu1 %v2884_v9, %s3244_s5  ;;  %v3675_v9 = vrot.slane %v3625_v36, %v3627_v37 }
 0x405   :  { %v888_v10 = vpop.f32.mrf.mxu1 }
 0x407   :  { %v2887_v13 = vpop.f32.mrf.mxu1 }
 0x408   :  { %1098 = vrot.lane.b32.xlu1 %v888_v10, %s3243_s24  ;;  %1150 = vrot.lane.b32.xlu0 %v2887_v13, %s3241_s16 }
 0x409   :  { %v901_v14 = vpop.f32.mrf.mxu1 }
 0x40b   :  { %v2888_v15 = vpop.f32.mrf.mxu1 }
 0x40c   :  { %1132 = vrot.lane.b32.xlu0 %v901_v14, %s3244_s5  ;;  %1152 = vrot.lane.b32.xlu1 %v2888_v15, %s3241_s16 }
 0x40d   :  { %v904_v17 = vpop.f32.mrf.mxu1 }
 0x410   :  { %1044 = vrot.lane.b32.xlu0 %v853_v0, %s3249_s2  ;;  %1134 = vrot.lane.b32.xlu1 %v904_v17, %s3244_s5  ;;  %v1021_v0 = vmul.f32 %v1019_v44, %v3587_v62  ;;  %s3251_s5 = smov 16  }
 0x414   :  { %1078 = vrot.lane.b32.xlu0 %v2879_v3, %s3243_s24  ;;  %1046 = vrot.lane.b32.xlu1 %v856_v2, %s3249_s2 }
 0x418   :  { %1080 = vrot.lane.b32.xlu1 %v2880_v5, %s3243_s24 }
 0x442   :  { %v939_v19 = vpop.permute.xlu0 %938 }
 0x443   :  { %v944_v8 = vsel %vm469_vm6, %v939_v19, 0.0 }
 0x446   :  { %v941_v18 = vpop.permute.xlu1 %940  ;;  %v921_v21 = vpop.permute.xlu0 %920 }
 0x447   :  { %v926_v5 = vsel %vm464_vm5, %v921_v21, 0.0  ;;  %v945_v10 = vsel %vm469_vm6, %v941_v18, 0.0 }
 0x448   :  { %v932_v21 = vmul.f32 %v3649_v48, %v926_v5 }
 0x44a   :  { %v923_v16 = vpop.permute.xlu1 %922  ;;  %v975_v23 = vpop.permute.xlu0 %974 }
 0x44b   :  { %v927_v19 = vsel %vm464_vm5, %v923_v16, 0.0 }
 0x44e   :  { %v3613_v20 = vpop.permute.xlu1 %976  ;;  %v957_v28 = vpop.permute.xlu0 %956 }
 0x452   :  { %v3615_v22 = vpop.permute.xlu1 %958 }
 0x454   :  { %v993_v31 = vpop.permute.xlu0 %992 }
 0x455   :  { %v998_v11 = vsel %vm474_vm7, %v993_v31, 0.0  ;;  %v962_v31 = vsel %vm469_vm6, %v957_v28, 0.0 }
 0x458   :  { %v995_v26 = vpop.permute.xlu1 %994 }
 0x459   :  { %v999_v24 = vsel %vm474_vm7, %v995_v26, 0.0 }
 0x45c   :  { %v1027_v29 = vpop.permute.xlu1 %1026 }
 0x45d   :  { %v1032_v2 = vsel %vm444_vm1, 0.0, %v1027_v29  ;;  %v980_v29 = vsel %vm474_vm7, %v975_v23, 0.0  ;;  %v963_v23 = vsel %vm469_vm6, %v3615_v22, 0.0  ;;  %vm2240_vm6 = vcmask 990208  }
 0x45e   :  { %v1038_v13 = vmul.f32 %v1037_v54, %v1032_v2  ;;  %v969_v22 = vmul.f32 %v967_v50, %v963_v23 }
 0x460   :  { %v1029_v42 = vpop.permute.xlu1 %1028  ;;  %v1040_v16 = vadd.f32 %v1038_v13, %v1012_v52 }
 0x461   :  { %v1033_v3 = vsel %vm444_vm1, 0.0, %v1029_v42  ;;  %v981_v42 = vsel %vm474_vm7, %v3613_v20, 0.0 }
 0x462   :  { %v1039_v14 = vmul.f32 %v1037_v54, %v1033_v3  ;;  %v1005_v54 = vmul.f32 %v1003_v51, %v999_v24 }
 0x472   :  { %v1115_v43 = vpop.permute.xlu0 %1114 }
 0x473   :  { %v1120_v60 = vsel %vm449_vm2, 0.0, %v1115_v43  ;;  %v1004_v43 = vmul.f32 %v1003_v51, %v998_v11  ;;  %v986_v11 = vmul.f32 %v985_v49, %v980_v29  ;;  %v987_v51 = vmul.f32 %v985_v49, %v981_v42 }
 0x474   :  { %v1126_v32 = vmul.f32 %v1125_v56, %v1120_v60  ;;  %v950_v49 = vmul.f32 %v3646_v47, %v944_v8 }
 0x475   :  { %v1022_v52 = vadd.f32 %v1020_v61, %v1004_v43  ;;  %v951_v61 = vmul.f32 %v3646_v47, %v945_v10 }
 0x476   :  { %v1097_v58 = vpop.permute.xlu0 %1096  ;;  %v1117_v59 = vpop.permute.xlu1 %1116 }
 0x477   :  { %v1121_v62 = vsel %vm449_vm2, 0.0, %v1117_v59  ;;  %v1102_v40 = vsel %vm444_vm1, 0.0, %v1097_v58  ;;  %v1041_v59 = vadd.f32 %v1039_v14, %v1013_v53  ;;  %v1128_v58 = vadd.f32 %v1126_v32, %v1040_v16 }
 0x478   :  { %v1127_v18 = vmul.f32 %v1125_v56, %v1121_v62  ;;  %v1108_v5 = vmul.f32 %v1107_v55, %v1102_v40  ;;  %v1023_v53 = vadd.f32 %v1021_v0, %v1005_v54  ;;  %v933_v0 = vmul.f32 %v3649_v48, %v927_v19 }
 0x479   :  { %v989_v54 = vadd.f32 %v987_v51, %v951_v61  ;;  %v1064_v19 = vmul.f32 %v3590_v63, %v3639_v45  ;;  %v1065_v16 = vmul.f32 %v3592_v1, %v3639_v45 }
 0x47a   :  { %v1099_v15 = vpop.permute.xlu1 %1098  ;;  %v1151_v17 = vpop.permute.xlu0 %1150  ;;  %v1129_v60 = vadd.f32 %v1127_v18, %v1041_v59  ;;  %v1110_v40 = vadd.f32 %v1108_v5, %v1022_v52  ;;  %v1089_v18 = vrot.slane %v3625_v36, %v3629_v38  ;;  %v971_v48 = vadd.f32 %v969_v22, %v933_v0 }
 0x47b   :  { %v1156_v27 = vsel %vm454_vm3, 0.0, %v1151_v17  ;;  %v1103_v44 = vsel %vm444_vm1, 0.0, %v1099_v15  ;;  %v968_v15 = vmul.f32 %v967_v50, %v962_v31  ;;  %v1072_v59 = vmul.f32 %v3643_v46, %v3594_v4 }
 0x47c   :  { %v1162_v26 = vmul.f32 %v1161_v57, %v1156_v27  ;;  %v1109_v20 = vmul.f32 %v1107_v55, %v1103_v44  ;;  %v988_v44 = vadd.f32 %v986_v11, %v950_v49  ;;  %v1067_v45 = vadd.f32 %v1065_v16, %v989_v54 }
 0x47d   :  { %v970_v50 = vadd.f32 %v968_v15, %v932_v21 }
 0x47e   :  { %v1133_v2 = vpop.permute.xlu0 %1132  ;;  %v1153_v3 = vpop.permute.xlu1 %1152  ;;  %v1164_v13 = vadd.f32 %v1162_v26, %v1128_v58  ;;  %v1111_v32 = vadd.f32 %v1109_v20, %v1023_v53  ;;  %v1073_v26 = vmul.f32 %v3643_v46, %v3596_v6 }
 0x47f   :  { %v1138_v56 = vsel %vm449_vm2, 0.0, %v1133_v2  ;;  %v1157_v28 = vsel %vm454_vm3, 0.0, %v1153_v3 }
 0x480   :  { %v1163_v62 = vmul.f32 %v1161_v57, %v1157_v28  ;;  %v1144_v14 = vmul.f32 %v1143_v7, %v1138_v56  ;;  %v1066_v56 = vadd.f32 %v1064_v19, %v988_v44 }
 0x482   :  { %v1165_v17 = vadd.f32 %v1163_v62, %v1129_v60  ;;  %v1045_v24 = vpop.permute.xlu0 %1044  ;;  %v1135_v27 = vpop.permute.xlu1 %1134  ;;  %v1146_v31 = vadd.f32 %v1144_v14, %v1110_v40 }
 0x483   :  { %v1050_v2 = vsel %vm474_vm7, %v1045_v24, 0.0  ;;  %v1139_v3 = vsel %vm449_vm2, 0.0, %v1135_v27  ;;  %vm2098_vm2 = vcmask 1043456  }
 0x484   :  { %v1056_v55 = vmul.f32 %v3675_v9, %v1050_v2  ;;  %v1145_v57 = vmul.f32 %v1143_v7, %v1139_v3  ;;  %v1166_v29 = vpack.c.bf16 %v1165_v17, %v1164_v13 }
 0x486   :  { %v1147_v42 = vadd.f32 %v1145_v57, %v1111_v32  ;;  %v1079_v43 = vpop.permute.xlu0 %1078  ;;  %1292 = vrot.lane.b32.xlu0 %v1166_v29, %s3250_s4  ;;  %2891 = vmatprep.mubr.msk.bf16.mxu0 %vm459_vm4, %v1166_v29  ;;  %v1047_v7 = vpop.permute.xlu1 %1046  ;;  %v1058_v10 = vadd.f32 %v1056_v55, %v970_v50 }
 0x487   :  { %v1084_v8 = vsel %vm444_vm1, 0.0, %v1079_v43  ;;  %v1051_v47 = vsel %vm474_vm7, %v1047_v7, 0.0 }
 0x488   :  { %v1057_v36 = vmul.f32 %v3675_v9, %v1051_v47  ;;  %v1167_v21 = vpack.c.bf16 %v1147_v42, %v1146_v31  ;;  %v1090_v23 = vmul.f32 %v1089_v18, %v1084_v8  ;;  %v1074_v63 = vadd.f32 %v1072_v59, %v1058_v10 }
 0x48a   :  { %v1059_v5 = vadd.f32 %v1057_v36, %v971_v48  ;;  %1294 = vrot.lane.b32.xlu1 %v1167_v21, %s3250_s4  ;;  %2892 = vmatmul.mubr.msk.bf16.vlgmr.msra.gmra.mxu0 %vm459_vm4, %v1167_v21  ;;  %v1081_v9 = vpop.permute.xlu1 %1080  ;;  %v1092_v4 = vadd.f32 %v1090_v23, %v1066_v56 }
 0x48b   :  { %v1085_v28 = vsel %vm444_vm1, 0.0, %v1081_v9  ;;  %2900 = vmatpush3.bf16.msra.mxu0 %v3601_v12 }
 0x48c   :  { %v1075_v1 = vadd.f32 %v1073_v26, %v1059_v5  ;;  %v1091_v58 = vmul.f32 %v1089_v18, %v1085_v28 }
 0x48e   :  { %v1093_v60 = vadd.f32 %v1091_v58, %v1067_v45  ;;  %v1169_v20 = vpack.c.bf16 %v1075_v1, %v1074_v63 }
 0x490   :  { %1298 = vrot.lane.b32.xlu1 %v1169_v20, %s3250_s4  ;;  %v1168_v6 = vpack.c.bf16 %v1093_v60, %v1092_v4 }
 0x492   :  { %1296 = vrot.lane.b32.xlu0 %v1168_v6, %s3250_s4  ;;  %2895 = vmatprep.mubr.msk.bf16.mxu0 %vm459_vm4, %v1168_v6 }
 0x493   :  { %2896 = vmatmul.mubr.msk.bf16.gmra.mxu0 %vm459_vm4, %v1169_v20 }
 0x4f8   :  { %v1293_v46 = vpop.permute.xlu0 %1292 }
 0x4f9   :  { %2901 = vmatprep.mubr.msk.bf16.mxu0 %vm459_vm4, %v1293_v46 }
 0x4fc   :  { %v1295_v12 = vpop.permute.xlu1 %1294 }
 0x4fd   :  { %2902 = vmatmul.mubr.msk.bf16.vlgmr.msra.gmra.mxu0 %vm459_vm4, %v1295_v12 }
 0x502   :  { %v1299_v11 = vpop.permute.xlu1 %1298 }
 0x504   :  { %v1297_v62 = vpop.permute.xlu0 %1296 }
 0x505   :  { %2905 = vmatprep.mubr.msk.bf16.mxu0 %vm459_vm4, %v1297_v62 }
 0x506   :  { %2906 = vmatmul.mubr.msk.bf16.gmra.mxu0 %vm459_vm4, %v1299_v11 }
 0x54a   :  { %v2893_v15 = vpop.f32.mrf.mxu0 }
 0x54c   :  { %v1221_v51 = vpop.f32.mrf.mxu0 }
 0x54e   :  { %v2894_v52 = vpop.f32.mrf.mxu0 }
 0x550   :  { %v1224_v53 = vpop.f32.mrf.mxu0 }
 0x553   :  { %v2897_v13 = vpop.f32.mrf.mxu0 }
 0x555   :  { %v1237_v14 = vpop.f32.mrf.mxu0 }
 0x557   :  { %v2898_v17 = vpop.f32.mrf.mxu0 }
 0x559   :  { %v1240_v24 = vpop.f32.mrf.mxu0 }
 0x5bd   :  { %v2903_v27 = vpop.f32.mrf.mxu0 }
 0x5be   :  { %1379 = vrot.lane.b32.xlu0 %v2903_v27, %s3243_s24 }
 0x5bf   :  { %v1346_v22 = vpop.f32.mrf.mxu0 }
 0x5c1   :  { %v2904_v40 = vpop.f32.mrf.mxu0 }
 0x5c2   :  { %1381 = vrot.lane.b32.xlu1 %v2904_v40, %s3243_s24 }
 0x5c3   :  { %v1349_v2 = vpop.f32.mrf.mxu0 }
 0x5c6   :  { %v2907_v3 = vpop.f32.mrf.mxu0 }
 0x5c8   :  { %v1362_v32 = vpop.f32.mrf.mxu0 }
 0x5c9   :  { %1391 = vrot.lane.b32.xlu0 %v1362_v32, %s3236_s22 }
 0x5ca   :  { %v2908_v55 = vpop.f32.mrf.mxu0 }
 0x5cc   :  { %v1365_v57 = vpop.f32.mrf.mxu0 }
 0x5cd   :  { %1403 = vrot.lane.b32.xlu0 %v2907_v3, %s3245_s25  ;;  %1393 = vrot.lane.b32.xlu1 %v1365_v57, %s3236_s22 }
 0x5d1   :  { %1254 = vrot.lane.b32.xlu0 %v2893_v15, %s3243_s24  ;;  %1405 = vrot.lane.b32.xlu1 %v2908_v55, %s3245_s25 }
 0x5d5   :  { %1266 = vrot.lane.b32.xlu0 %v1237_v14, %s3236_s22  ;;  %1256 = vrot.lane.b32.xlu1 %v2894_v52, %s3243_s24  ;;  %v1427_v14 = vld [vmem:[%s4015_s8 + $0x8] sm:$0xff] }
 0x5d9   :  { %1278 = vrot.lane.b32.xlu0 %v2897_v13, %s3245_s25  ;;  %1268 = vrot.lane.b32.xlu1 %v1240_v24, %s3236_s22  ;;  %v1426_v13 = vld [vmem:[%s4015_s8] sm:$0xff] }
 0x5dd   :  { %1280 = vrot.lane.b32.xlu1 %v2898_v17, %s3245_s25 }
 0x630   :  { %v1380_v29 = vpop.permute.xlu0 %1379 }
 0x631   :  { %v1385_v49 = vsel %vm444_vm1, 0.0, %v1380_v29  ;;  %v1425_v29 = vld [vmem:[%s4014_s7 + $0x8] sm:$0xff] }
 0x632   :  { %v1387_v50 = vadd.f32 %v1385_v49, %v1346_v22  ;;  %v3023_v49 = vld [vmem:[#allocation7] sm:$0xff]  }
 0x633   :  { %2911 = vmatprep.mubr.msk.bf16.mxu0 %vm1421_vm10, %v3023_v49 }
 0x634   :  { %v1382_v61 = vpop.permute.xlu1 %1381 }
 0x635   :  { %v1386_v31 = vsel %vm444_vm1, 0.0, %v1382_v61 }
 0x636   :  { %v1388_v8 = vadd.f32 %v1386_v31, %v1349_v2 }
 0x63b   :  { %v1392_v0 = vpop.permute.xlu0 %1391 }
 0x63c   :  { %v1397_v18 = vsel %vm459_vm4, 0.0, %v1392_v0 }
 0x63d   :  { %v1399_v42 = vadd.f32 %v1397_v18, %v1387_v50 }
 0x63f   :  { %v1404_v43 = vpop.permute.xlu0 %1403  ;;  %v1394_v7 = vpop.permute.xlu1 %1393 }
 0x640   :  { %v1409_v44 = vsel %vm464_vm5, 0.0, %v1404_v43  ;;  %v1398_v54 = vsel %vm459_vm4, 0.0, %v1394_v7 }
 0x641   :  { %v1411_v47 = vadd.f32 %v1409_v44, %v1399_v42  ;;  %v1400_v48 = vadd.f32 %v1398_v54, %v1388_v8 }
 0x643   :  { %1415 = vrot.lane.b32.xlu0 %v1411_v47, %s3251_s5  ;;  %v1406_v10 = vpop.permute.xlu1 %1405  ;;  %v1255_v19 = vpop.permute.xlu0 %1254 }
 0x644   :  { %v1410_v36 = vsel %vm464_vm5, 0.0, %v1406_v10  ;;  %v1260_v23 = vsel %vm444_vm1, 0.0, %v1255_v19 }
 0x645   :  { %v1412_v21 = vadd.f32 %v1410_v36, %v1400_v48  ;;  %v1262_v56 = vadd.f32 %v1260_v23, %v1221_v51 }
 0x647   :  { %1417 = vrot.lane.b32.xlu1 %v1412_v21, %s3251_s5  ;;  %v1257_v16 = vpop.permute.xlu1 %1256  ;;  %v1267_v59 = vpop.permute.xlu0 %1266 }
 0x648   :  { %v1272_v9 = vsel %vm459_vm4, 0.0, %v1267_v59  ;;  %v1261_v28 = vsel %vm444_vm1, 0.0, %v1257_v16 }
 0x649   :  { %v1274_v1 = vadd.f32 %v1272_v9, %v1262_v56  ;;  %v1263_v4 = vadd.f32 %v1261_v28, %v1224_v53  ;;  %v1424_v53 = vld [vmem:[%s4014_s7] sm:$0xff]  ;;  %v3025_v9 = vld [vmem:[#allocation7 + $0x10] sm:$0xff]   ;;  %v3026_v56 = vld [vmem:[#allocation7 + $0x18] sm:$0xff]   ;;  %s3252_s7 = smov 123  }
 0x64a   :  { %v3027_v28 = vld [vmem:[#allocation7 + $0x20] sm:$0xff]  }
 0x64b   :  { %v1269_v26 = vpop.permute.xlu1 %1268  ;;  %v1279_v5 = vpop.permute.xlu0 %1278 }
 0x64c   :  { %v1284_v63 = vsel %vm464_vm5, 0.0, %v1279_v5  ;;  %v1273_v58 = vsel %vm459_vm4, 0.0, %v1269_v26  ;;  %v3024_v5 = vld [vmem:[#allocation7 + $0x8] sm:$0xff]  }
 0x64d   :  { %v1286_v60 = vadd.f32 %v1284_v63, %v1274_v1  ;;  %v1275_v46 = vadd.f32 %v1273_v58, %v1263_v4  ;;  %v3028_v63 = vld [vmem:[#allocation7 + $0x28] sm:$0xff]   ;;  %v3029_v1 = vld [vmem:[#allocation7 + $0x30] sm:$0xff]  }
 0x64f   :  { %v1281_v45 = vpop.permute.xlu1 %1280 }
 0x650   :  { %v1285_v20 = vsel %vm464_vm5, 0.0, %v1281_v45  ;;  %v3030_v45 = vld [vmem:[#allocation7 + $0x38] sm:$0xff]  }
 0x651   :  { %v1287_v11 = vadd.f32 %v1285_v20, %v1275_v46 }
 0x6b5   :  { %v1416_v6 = vpop.permute.xlu0 %1415 }
 0x6b6   :  { %v1422_v12 = vsel %vm1421_vm10, %v1286_v60, %v1416_v6 }
 0x6b7   :  { %v1428_v62 = vsel %vm222_vm0, %v1422_v12, 0.0 }
 0x6b8   :  { %1429 = vadd.xlane.f32.xlu0 %v1428_v62 }
 0x6b9   :  { %v1418_v15 = vpop.permute.xlu1 %1417 }
 0x6ba   :  { %v1423_v51 = vsel %vm1421_vm10, %v1287_v11, %v1418_v15 }
 0x6bb   :  { %v1431_v52 = vsel %vm222_vm0, %v1423_v51, 0.0 }
 0x6bc   :  { %1432 = vadd.xlane.f32.xlu1 %v1431_v52 }
 0x6cd   :  { %1457 = vperm.xlu1 %2995, %v1424_v53   ;;  %v3792_v53 = vld [vmem:[%s4018_s11] sm:$0xff]   ;;  %s3253_s11 = smov 112  }
 0x6ce   :  { %2927 = vmatprep.subr.bf16.mxu1 %v3792_v53 }
 0x6cf   :  { %2928 = vmatpush3.bf16.msra.mxu1 %v3792_v53 }
 0x6d0   :  { %2933 = vmatprep.subr.bf16.mxu1 %v3792_v53 }
 0x6d1   :  { %1469 = vperm.xlu1 %2995, %v1426_v13  }
 0x6d5   :  { %1474 = vperm.xlu1 %2995, %v1427_v14  }
 0x741   :  { %v1430_v17 = vpop.xlane.xlu0 %1429 }
 0x742   :  { %v1435_v24 = vmul.f32 0.03125, %v1430_v17 }
 0x744   :  { %v1437_v27 = vsub.f32 %v1422_v12, %v1435_v24 }
 0x745   :  { %v1433_v22 = vpop.xlane.xlu1 %1432 }
 0x746   :  { %v1436_v40 = vmul.f32 0.03125, %v1433_v22  ;;  %v1439_v2 = vmul.f32 %v1437_v27, %v1437_v27 }
 0x748   :  { %v1438_v3 = vsub.f32 %v1423_v51, %v1436_v40  ;;  %v1441_v32 = vsel %vm222_vm0, %v1439_v2, 0.0 }
 0x749   :  { %1442 = vadd.xlane.f32.xlu0 %v1441_v32  ;;  %v1458_v43 = vpop.permute.xlu1 %1457 }
 0x74a   :  { %v1440_v55 = vmul.f32 %v1438_v3, %v1438_v3 }
 0x74c   :  { %v1444_v57 = vsel %vm222_vm0, %v1440_v55, 0.0  ;;  %v3802_v55 = vld [vmem:[#allocation9 + $0x8] sm:$0xff]  ;;  %vm1988_vm0 = vcmask 523264  }
 0x74d   :  { %1445 = vadd.xlane.f32.xlu0 %v1444_v57  ;;  %v1470_v54 = vpop.permute.xlu1 %1469  ;;  %v1763_v49 = vrot.slane %v3802_v55, %v3623_v35 }
 0x751   :  { %v1475_v19 = vpop.permute.xlu1 %1474 }
 0x763   :  { %1462 = vperm.xlu0 %2996, %v1425_v29  }
 0x7d2   :  { %v1443_v61 = vpop.xlane.xlu0 %1442 }
 0x7d3   :  { %v1447_v0 = vmul.f32 0.03125, %v1443_v61  ;;  %v1757_v61 = vrot.slane %v3802_v55, %v3621_v34 }
 0x7d5   :  { %v1449_v18 = vadd.f32 1e-05, %v1447_v0 }
 0x7d6   :  { %v1446_v50 = vpop.xlane.xlu0 %1445 }
 0x7d7   :  { %3060 = vrsqrt.f32 %v1449_v18  ;;  %v1448_v31 = vmul.f32 0.03125, %v1446_v50 }
 0x7d9   :  { %v1450_v42 = vadd.f32 1e-05, %v1448_v31 }
 0x7db   :  { %3062 = vrsqrt.f32 %v1450_v42 }
 0x7de   :  { %v1463_v10 = vpop.permute.xlu0 %1462 }
 0x7e4   :  { %v3061_v7 = vpop.eup %3060 }
 0x7e5   :  { %v1453_v44 = vmul.f32 %v3061_v7, %v1437_v27 }
 0x7e7   :  { %v1465_v8 = vmul.f32 %v1458_v43, %v1453_v44 }
 0x7e8   :  { %v3063_v47 = vpop.eup %3062 }
 0x7e9   :  { %v1454_v48 = vmul.f32 %v3063_v47, %v1438_v3  ;;  %v1477_v21 = vadd.f32 %v1470_v54, %v1465_v8  ;;  %v1659_v3 = vld [vmem:[#allocation9] sm:$0xff]  ;;  %v1785_v54 = vrot.slane %v3802_v55, %v3631_v39 }
 0x7ea   :  { %v1729_v57 = vrot.slane %v1659_v3, %v3619_v33  ;;  %v1723_v29 = vrot.slane %v1659_v3, %v3617_v30  ;;  %v1717_v0 = vrot.slane %v1659_v3, %v3631_v39  ;;  %v1670_v31 = vrot.slane %v1659_v3, %v3627_v37 }
 0x7eb   :  { %v1466_v36 = vmul.f32 %v1463_v10, %v1454_v48  ;;  %v1479_v26 = vmax.f32 %v1477_v21, 0.0  ;;  %v1682_v7 = vrot.slane %v1659_v3, %v3621_v34  ;;  %v1740_v44 = vrot.slane %v1659_v3, %v3634_v41 }
 0x7ec   :  { %v1693_v8 = vrot.slane %v1659_v3, %v3623_v35  ;;  %v1705_v47 = vrot.slane %v1659_v3, %v3629_v38 }
 0x7ed   :  { %v1478_v16 = vadd.f32 %v1475_v19, %v1466_v36 }
 0x7ef   :  { %v1480_v59 = vmax.f32 %v1478_v16, 0.0  ;;  %v1751_v16 = vrot.slane %v3802_v55, %v3627_v37 }
 0x7f1   :  { %v1497_v23 = vpack.c.bf16 %v1480_v59, %v1479_v26 }
 0x7f3   :  { %2909 = vmatprep.subr.bf16.mxu0 %v1497_v23 }
 0x7f4   :  { %2910 = vmatpush3.bf16.msra.mxu0 %v1497_v23 }
 0x7f7   :  { %2912 = vmatmul.mubr.msk.bf16.vlgmr.msra.gmra.mxu0 %vm1421_vm10, %v3024_v5 }
 0x7f8   :  { %2915 = vmatprep.mubr.msk.bf16.mxu0 %vm1421_vm10, %v3025_v9 }
 0x7ff   :  { %2916 = vmatmul.mubr.msk.bf16.gmra.mxu0 %vm1421_vm10, %v3026_v56 }
 0x800   :  { %2919 = vmatprep.mubr.msk.bf16.mxu0 %vm1421_vm10, %v3027_v28 }
 0x807   :  { %2920 = vmatmul.mubr.msk.bf16.gmra.mxu0 %vm1421_vm10, %v3028_v63 }
 0x808   :  { %2923 = vmatprep.mubr.msk.bf16.mxu0 %vm1421_vm10, %v3029_v1 }
 0x80f   :  { %2924 = vmatmul.mubr.msk.bf16.gmra.mxu0 %vm1421_vm10, %v3030_v45  ;;  %v1796_v45 = vrot.slane %v3802_v55, %v3617_v30 }
 0x810   :  { %2449 = vmatprep.mubr.bf16.mxu0 %v3246_v25 }
 0x8b7   :  { %v2913_v58 = vpop.f32.mrf.mxu0 }
 0x8b8   :  { %1686 = vrot.lane.b32.xlu0 %v2913_v58, %s3250_s4 }
 0x8b9   :  { %v1596_v4 = vpop.f32.mrf.mxu0 }
 0x8bb   :  { %v2914_v60 = vpop.f32.mrf.mxu0 }
 0x8bc   :  { %1697 = vrot.lane.b32.xlu1 %v2914_v60, %s3248_s0  ;;  %1662 = vrot.lane.b32.xlu0 %v1596_v4, %s3252_s7  ;;  %v1807_v60 = vrot.slane %v3802_v55, %v3619_v33 }
 0x8bd   :  { %v1599_v20 = vpop.f32.mrf.mxu0 }
 0x8bf   :  { %v2917_v6 = vpop.f32.mrf.mxu0 }
 0x8c0   :  { %1674 = vrot.lane.b32.xlu1 %v1599_v20, %s3250_s4  ;;  %v1730_v36 = vmul.f32 %v2917_v6, %v1729_v57  ;;  %v1818_v20 = vrot.slane %v3802_v55, %v3634_v41 }
 0x8c1   :  { %v1612_v46 = vpop.f32.mrf.mxu0 }
 0x8c2   :  { %1709 = vrot.lane.b32.xlu0 %v1612_v46, %s3249_s2 }
 0x8c3   :  { %v2918_v12 = vpop.f32.mrf.mxu0 }
 0x8c4   :  { %1733 = vrot.lane.b32.xlu1 %v2918_v12, %s3243_s24 }
 0x8c5   :  { %v1615_v62 = vpop.f32.mrf.mxu0 }
 0x8c6   :  { %v1724_v58 = vmul.f32 %v1723_v29, %v1615_v62 }
 0x8c7   :  { %v3784_v11 = vpop.f32.mrf.mxu0 }
 0x8c9   :  { %v1628_v15 = vpop.f32.mrf.mxu0 }
 0x8ca   :  { %1744 = vrot.lane.b32.xlu0 %v1628_v15, %s3249_s2 }
 0x8cb   :  { %v2922_v51 = vpop.f32.mrf.mxu0 }
 0x8cd   :  { %v3787_v52 = vpop.f32.mrf.mxu0 }
 0x8ce   :  { %v1758_v3 = vmul.f32 %v1757_v61, %v3787_v52 }
 0x8cf   :  { %v2925_v13 = vpop.f32.mrf.mxu0 }
 0x8d0   :  { %1800 = vrot.lane.b32.xlu1 %v2925_v13, %s3236_s22  ;;  %v1774_v13 = vrot.slane %v3802_v55, %v3629_v38  ;;  %v1764_v55 = vmul.f32 %v3784_v11, %v1763_v49 }
 0x8d1   :  { %v1644_v14 = vpop.f32.mrf.mxu0 }
 0x8d2   :  { %1778 = vrot.lane.b32.xlu0 %v1644_v14, %s3241_s16 }
 0x8d3   :  { %v2926_v17 = vpop.f32.mrf.mxu0 }
 0x8d5   :  { %v1647_v24 = vpop.f32.mrf.mxu0 }
 0x8d6   :  { %1789 = vrot.lane.b32.xlu1 %v1647_v24, %s3236_s22  ;;  %1811 = vrot.lane.b32.xlu0 %v2926_v17, %s3245_s25  ;;  %s3254_s22 = smov 9  }
 0x8da   :  { %1767 = vrot.lane.b32.xlu1 %v2922_v51, %s3243_s24 }
 0x92a   :  { %v1687_v27 = vpop.permute.xlu0 %1686 }
 0x92b   :  { %v1689_v21 = vsel %vm1677_vm13, %v1687_v27, 0.0 }
 0x92c   :  { %v1694_v4 = vmul.f32 %v1693_v8, %v1689_v21 }
 0x92e   :  { %v1698_v22 = vpop.permute.xlu1 %1697  ;;  %v1663_v40 = vpop.permute.xlu0 %1662 }
 0x92f   :  { %v1666_v43 = vsel %vm1665_vm12, %v1663_v40, 0.0  ;;  %v1701_v23 = vsel %vm1700_vm14, %v1698_v22, 0.0 }
 0x930   :  { %v1671_v5 = vmul.f32 %v1670_v31, %v1666_v43  ;;  %v1706_v6 = vmul.f32 %v1705_v47, %v1701_v23 }
 0x932   :  { %v1675_v2 = vpop.permute.xlu1 %1674  ;;  %v1695_v14 = vadd.f32 %v1694_v4, %v1671_v5 }
 0x933   :  { %v1678_v48 = vsel %vm1677_vm13, %v1675_v2, 0.0 }
 0x934   :  { %v1710_v32 = vpop.permute.xlu0 %1709  ;;  %v1683_v28 = vmul.f32 %v1682_v7, %v1678_v48 }
 0x935   :  { %v1713_v42 = vsel %vm1712_vm11, %v1710_v32, 0.0 }
 0x936   :  { %v1734_v18 = vpop.permute.xlu1 %1733  ;;  %v1718_v19 = vmul.f32 %v1717_v0, %v1713_v42  ;;  %v1707_v27 = vadd.f32 %v1706_v6, %v1683_v28 }
 0x937   :  { %v1736_v10 = vsel %vm444_vm1, 0.0, %v1734_v18 }
 0x938   :  { %v1741_v63 = vmul.f32 %v1740_v44, %v1736_v10  ;;  %v1731_v46 = vadd.f32 %v1730_v36, %v1718_v19  ;;  %v1759_v43 = vadd.f32 %v1758_v3, %v1707_v27  ;;  %v1990_v27 = vld [vmem:[%s4019_s12] sm:$0xff]  ;;  %s3255_s12 = smov 119  }
 0x93a   :  { %v1742_v22 = vadd.f32 %v1741_v63, %v1724_v58 }
 0x93c   :  { %v1745_v50 = vpop.permute.xlu0 %1744 }
 0x93d   :  { %v1747_v9 = vsel %vm1712_vm11, %v1745_v50, 0.0 }
 0x93e   :  { %v1752_v12 = vmul.f32 %v1751_v16, %v1747_v9 }
 0x940   :  { %v1753_v32 = vadd.f32 %v1752_v12, %v1695_v14 }
 0x942   :  { %v1801_v59 = vpop.permute.xlu1 %1800  ;;  %v1765_v44 = vadd.f32 %v1764_v55, %v1753_v32 }
 0x943   :  { %v1803_v17 = vsel %vm459_vm4, 0.0, %v1801_v59 }
 0x944   :  { %v1779_v26 = vpop.permute.xlu0 %1778  ;;  %v1808_v57 = vmul.f32 %v1807_v60, %v1803_v17 }
 0x945   :  { %v1781_v56 = vsel %vm454_vm3, 0.0, %v1779_v26  ;;  %vm2252_vm3 = vcmask 1039360  }
 0x946   :  { %v1786_v1 = vmul.f32 %v1785_v54, %v1781_v56 }
 0x948   :  { %v1790_v15 = vpop.permute.xlu1 %1789  ;;  %v1812_v51 = vpop.permute.xlu0 %1811  ;;  %v1787_v40 = vadd.f32 %v1786_v1, %v1731_v46 }
 0x949   :  { %v1792_v62 = vsel %vm459_vm4, 0.0, %v1790_v15  ;;  %v1814_v24 = vsel %vm464_vm5, 0.0, %v1812_v51  ;;  %vm2217_vm4 = vcmask 982016   ;;  %vm2205_vm5 = vcmask 973824  }
 0x94a   :  { %v1797_v2 = vmul.f32 %v1796_v45, %v1792_v62  ;;  %v1819_v0 = vmul.f32 %v1818_v20, %v1814_v24  ;;  %v1809_v31 = vadd.f32 %v1808_v57, %v1787_v40 }
 0x94c   :  { %v1798_v29 = vadd.f32 %v1797_v2, %v1742_v22  ;;  %v1768_v18 = vpop.permute.xlu1 %1767  ;;  %v3032_v22 = vld [vmem:[#allocation10] sm:$0xff]  }
 0x94d   :  { %v1770_v50 = vsel %vm444_vm1, 0.0, %v1768_v18 }
 0x94e   :  { %v1820_v42 = vadd.f32 %v1819_v0, %v1798_v29  ;;  %v1775_v7 = vmul.f32 %v1774_v13, %v1770_v50  ;;  %v1991_v13 = vld [vmem:[%s4020_s13] sm:$0xff]  ;;  %s3256_s13 = smov 7  }
 0x950   :  { %v1821_v54 = vpack.c.bf16 %v1809_v31, %v1820_v42  ;;  %v1776_v8 = vadd.f32 %v1775_v7, %v1759_v43  ;;  %v3033_v43 = vld [vmem:[#allocation10 + $0x8] sm:$0xff]   ;;  %v3034_v7 = vld [vmem:[#allocation10 + $0x10] sm:$0xff]  }
 0x952   :  { %v1822_v47 = vpack.c.bf16 %v1765_v44, %v1776_v8  ;;  %1907 = vrot.lane.b32.xlu0 %v1821_v54, %s3253_s11  ;;  %2929 = vmatprep.mubr.msk.bf16.mxu1 %vm1421_vm10, %v1821_v54  ;;  %v3035_v44 = vld [vmem:[#allocation10 + $0x18] sm:$0xff]   ;;  %v3036_v54 = vld [vmem:[#allocation10 + $0x20] sm:$0xff]   ;;  %v3037_v8 = vld [vmem:[#allocation10 + $0x28] sm:$0xff]  }
 0x954   :  { %1909 = vrot.lane.b32.xlu1 %v1822_v47, %s3253_s11  ;;  %2930 = vmatmul.mubr.msk.bf16.vlgmr.msra.gmra.mxu1 %vm1421_vm10, %v1822_v47  ;;  %v3038_v47 = vld [vmem:[#allocation10 + $0x30] sm:$0xff]  }
 0x955   :  { %2934 = vmatpush3.bf16.msra.mxu1 %v3792_v53 }
 0x9c4   :  { %v1908_v11 = vpop.permute.xlu0 %1907 }
 0x9c5   :  { %2935 = vmatprep.mubr.msk.bf16.mxu1 %vm1421_vm10, %v1908_v11  ;;  %v3039_v11 = vld [vmem:[#allocation10 + $0x38] sm:$0xff]  }
 0x9c6   :  { %v1910_v52 = vpop.permute.xlu1 %1909 }
 0x9c7   :  { %2936 = vmatmul.mubr.msk.bf16.vlgmr.msra.gmra.mxu1 %vm1421_vm10, %v1910_v52 }
 0x9c8   :  { %2941 = vmatprep.mubr.msk.bf16.mxu1 %vm487_vm8, %v3032_v22 }
 0xa14   :  { %v2931_v49 = vpop.f32.mrf.mxu1 }
 0xa16   :  { %v1871_v61 = vpop.f32.mrf.mxu1 }
 0xa18   :  { %v2932_v48 = vpop.f32.mrf.mxu1 }
 0xa1a   :  { %v1874_v10 = vpop.f32.mrf.mxu1 }
 0xa87   :  { %v2937_v36 = vpop.f32.mrf.mxu1 }
 0xa88   :  { %1973 = vrot.lane.b32.xlu1 %v2937_v36, %s3232_s28 }
 0xa89   :  { %v1951_v21 = vpop.f32.mrf.mxu1 }
 0xa8b   :  { %v2938_v19 = vpop.f32.mrf.mxu1 }
 0xa8c   :  { %1887 = vrot.lane.b32.xlu1 %v1874_v10, %s3243_s24 }
 0xa8d   :  { %v1954_v16 = vpop.f32.mrf.mxu1 }
 0xa8e   :  { %1967 = vrot.lane.b32.xlu0 %v1954_v16, %s3243_s24  ;;  %v3873_v16 = vld [vmem:[#allocation12 + $0x30] ss:$8 sps:$4 sm:$0xff]  }
 0xa90   :  { %1899 = vrot.lane.b32.xlu1 %v2932_v48, %s3254_s22 }
 0xa92   :  { %1979 = vrot.lane.b32.xlu0 %v2938_v19, %s3254_s22 }
 0xa96   :  { %1893 = vrot.lane.b32.xlu0 %v2931_v49, %s3232_s28 }
 0xafa   :  { %v1974_v53 = vpop.permute.xlu1 %1973 }
 0xafb   :  { %v1976_v5 = vsel %vm487_vm8, 0.0, %v1974_v53 }
 0xafe   :  { %v1888_v1 = vpop.permute.xlu1 %1887 }
 0xaff   :  { %v1890_v58 = vsel %vm444_vm1, 0.0, %v1888_v1  ;;  %v3893_v1 = vld [vmem:[#allocation12 + $0x4] ss:$8 sps:$4 sm:$0xff]  }
 0xb00   :  { %v1968_v59 = vpop.permute.xlu0 %1967  ;;  %v1891_v60 = vadd.f32 %v1890_v58, %v1871_v61  ;;  %v3895_v58 = vld [vmem:[#allocation12] ss:$8 sps:$4 sm:$0xff]  }
 0xb01   :  { %v1970_v26 = vsel %vm444_vm1, 0.0, %v1968_v59  ;;  %v3877_v59 = vld [vmem:[#allocation12 + $0x24] ss:$8 sps:$4 sm:$0xff]  }
 0xb02   :  { %v1971_v23 = vadd.f32 %v1970_v26, %v1951_v21  ;;  %v1900_v20 = vpop.permute.xlu1 %1899  ;;  %v3042_v21 = vld [vmem:[#allocation12 + $0x34] ss:$8 sps:$4 sm:$0xff]  }
 0xb03   :  { %v1903_v46 = vsel %vm1902_vm15, 0.0, %v1900_v20  ;;  %2425 = vmatprep.subr.bf16.mxu0 %v3042_v21 }
 0xb04   :  { %v1977_v9 = vadd.f32 %v1976_v5, %v1971_v23  ;;  %v1980_v56 = vpop.permute.xlu0 %1979  ;;  %2426 = vmatpush1.bf16.msra.mxu0 %v3873_v16  ;;  %v3881_v23 = vld [vmem:[#allocation12 + $0x20] ss:$8 sps:$4 sm:$0xff]  }
 0xb05   :  { %v1982_v28 = vsel %vm1902_vm15, 0.0, %v1980_v56  ;;  %2427 = vmatprep.subr.bf16.mxu0 %v3877_v59 }
 0xb06   :  { %v1983_v63 = vadd.f32 %v1982_v28, %v1977_v9  ;;  %v3885_v9 = vld [vmem:[#allocation12 + $0x14] ss:$8 sps:$4 sm:$0xff]   ;;  %v3887_v28 = vld [vmem:[#allocation12 + $0x10] ss:$8 sps:$4 sm:$0xff]  }
 0xb08   :  { %1985 = vrot.lane.b32.xlu0 %v1983_v63, %s3235_s21  ;;  %v1894_v45 = vpop.permute.xlu0 %1893  ;;  %2428 = vmatpush1.bf16.msra.mxu0 %v3881_v23 }
 0xb09   :  { %v1896_v4 = vsel %vm487_vm8, 0.0, %v1894_v45  ;;  %2429 = vmatprep.subr.bf16.mxu0 %v3885_v9 }
 0xb0a   :  { %v1897_v6 = vadd.f32 %v1896_v4, %v1891_v60 }
 0xb0c   :  { %v1904_v12 = vadd.f32 %v1903_v46, %v1897_v6  ;;  %2430 = vmatpush1.bf16.msra.mxu0 %v3887_v28 }
 0xb0d   :  { %2431 = vmatprep.subr.bf16.mxu0 %v3893_v1 }
 0xb10   :  { %2432 = vmatpush1.bf16.msra.mxu0 %v3895_v58 }
 0xb11   :  { %2527 = vmatprep.subr.bf16.mxu0 %v3042_v21 }
 0xb7a   :  { %v1986_v15 = vpop.permute.xlu0 %1985 }
 0xb7b   :  { %v1989_v51 = vsel %vm1988_vm0, %v1904_v12, %v1986_v15  ;;  %v2199_v12 = vld [vmem:[%s4022_s15] sm:$0xff] }
 0xb7c   :  { %1992 = vadd.xlane.f32.xlu1 %v1989_v51  ;;  %v2257_v15 = vrot.slane %v2199_v12, %v3631_v39 }
 0xb8d   :  { %2012 = vperm.xlu1 %2995, %v1991_v13  }
 0xc05   :  { %v1993_v14 = vpop.xlane.xlu1 %1992 }
 0xc06   :  { %v1995_v17 = vmul.f32 0.0078125, %v1993_v14  ;;  %v3911_v14 = vld [vmem:[%s4022_s15 + $0x8] sm:$0xff]  ;;  %s3259_s15 = smov 17  }
 0xc08   :  { %v1996_v62 = vsub.f32 %v1989_v51, %v1995_v17 }
 0xc09   :  { %v2013_v18 = vpop.permute.xlu1 %2012 }
 0xc0a   :  { %v1997_v24 = vmul.f32 %v1996_v62, %v1996_v62 }
 0xc0c   :  { %1998 = vadd.xlane.f32.xlu0 %v1997_v24  ;;  %v2280_v24 = vrot.slane %v2199_v12, %v3634_v41 }
 0xc22   :  { %2006 = vperm.xlu0 %2996, %v1990_v27   ;;  %v2325_v27 = vrot.slane %v3911_v14, %v3631_v39 }
 0xc95   :  { %v1999_v40 = vpop.xlane.xlu0 %1998 }
 0xc96   :  { %v2000_v2 = vmul.f32 0.0078125, %v1999_v40  ;;  %v2263_v40 = vrot.slane %v2199_v12, %v3617_v30 }
 0xc98   :  { %v2001_v3 = vadd.f32 1e-05, %v2000_v2 }
 0xc9a   :  { %3064 = vrsqrt.f32 %v2001_v3 }
 0xc9d   :  { %v2007_v29 = vpop.permute.xlu0 %2006 }
 0xca7   :  { %v3065_v32 = vpop.eup %3064 }
 0xca8   :  { %v2003_v57 = vmul.f32 %v3065_v32, %v1996_v62  ;;  %v2269_v62 = vrot.slane %v2199_v12, %v3619_v33 }
 0xcaa   :  { %v2009_v0 = vmul.f32 %v2007_v29, %v2003_v57 }
 0xcac   :  { %v2015_v55 = vadd.f32 %v2013_v18, %v2009_v0 }
 0xcae   :  { %v2016_v50 = vmax.f32 %v2015_v55, 0.0  ;;  %v2336_v55 = vrot.slane %v3911_v14, %v3617_v30 }
 0xcb0   :  { %v2033_v31 = vpack.c.bf16 %v2016_v50, %v2016_v50  ;;  %v2347_v50 = vrot.slane %v3911_v14, %v3619_v33 }
 0xcb2   :  { %2963 = vmatprep.subr.msk.bf16.mxu1 %vm2098_vm2, %v2033_v31  ;;  %v2100_v42 = vsel %vm2098_vm2, %v2033_v31, 0 }
 0xcb3   :  { %2940 = vmatpush3.bf16.msra.mxu1 %v2100_v42  ;;  %v2358_v42 = vrot.slane %v3911_v14, %v3634_v41 }
 0xcb6   :  { %2942 = vmatmul.mubr.msk.bf16.vlgmr.msra.gmra.mxu1 %vm487_vm8, %v3033_v43 }
 0xcb7   :  { %2945 = vmatprep.mubr.msk.bf16.mxu1 %vm487_vm8, %v3034_v7 }
 0xcbe   :  { %2946 = vmatmul.mubr.msk.bf16.gmra.mxu1 %vm487_vm8, %v3035_v44 }
 0xcbf   :  { %2949 = vmatprep.mubr.msk.bf16.mxu1 %vm487_vm8, %v3036_v54 }
 0xcc6   :  { %2950 = vmatmul.mubr.msk.bf16.gmra.mxu1 %vm487_vm8, %v3037_v8 }
 0xcc7   :  { %2953 = vmatprep.mubr.msk.bf16.mxu1 %vm487_vm8, %v3038_v47 }
 0xcce   :  { %2954 = vmatmul.mubr.msk.bf16.gmra.mxu1 %vm487_vm8, %v3039_v11  ;;  %v2233_v11 = vrot.slane %v2199_v12, %v3623_v35 }
 0xd76   :  { %v2943_v52 = vpop.f32.mrf.mxu1 }
 0xd78   :  { %v2136_v49 = vpop.f32.mrf.mxu1 }
 0xd79   :  { %2202 = vrot.lane.b32.xlu1 %v2136_v49, %s3255_s12 }
 0xd7a   :  { %v2944_v61 = vpop.f32.mrf.mxu1 }
 0xd7c   :  { %v2139_v48 = vpop.f32.mrf.mxu1 }
 0xd7e   :  { %v2947_v10 = vpop.f32.mrf.mxu1 }
 0xd7f   :  { %v2270_v29 = vmul.f32 %v2947_v10, %v2269_v62  ;;  %v2291_v10 = vrot.slane %v3911_v14, %v3627_v37  ;;  %v2314_v62 = vrot.slane %v3911_v14, %v3629_v38 }
 0xd80   :  { %v2152_v36 = vpop.f32.mrf.mxu1 }
 0xd81   :  { %2249 = vrot.lane.b32.xlu1 %v2152_v36, %s3249_s2 }
 0xd82   :  { %v2948_v19 = vpop.f32.mrf.mxu1 }
 0xd83   :  { %2273 = vrot.lane.b32.xlu0 %v2948_v19, %s3243_s24 }
 0xd84   :  { %v2155_v53 = vpop.f32.mrf.mxu1 }
 0xd85   :  { %v2264_v31 = vmul.f32 %v2263_v40, %v2155_v53 }
 0xd86   :  { %v3879_v26 = vpop.f32.mrf.mxu1 }
 0xd88   :  { %v2168_v5 = vpop.f32.mrf.mxu1 }
 0xd8a   :  { %v2952_v56 = vpop.f32.mrf.mxu1 }
 0xd8c   :  { %v3890_v63 = vpop.f32.mrf.mxu1 }
 0xd8e   :  { %v2955_v45 = vpop.f32.mrf.mxu1 }
 0xd8f   :  { %2340 = vrot.lane.b32.xlu1 %v2955_v45, %s3232_s28 }
 0xd90   :  { %v2184_v4 = vpop.f32.mrf.mxu1 }
 0xd92   :  { %v2956_v60 = vpop.f32.mrf.mxu1 }
 0xd93   :  { %2318 = vrot.lane.b32.xlu1 %v2184_v4, %s3256_s13  ;;  %2351 = vrot.lane.b32.xlu0 %v2956_v60, %s3254_s22  ;;  %v2245_v60 = vrot.slane %v2199_v12, %v3629_v38 }
 0xd94   :  { %v2187_v20 = vpop.f32.mrf.mxu1 }
 0xd97   :  { %2226 = vrot.lane.b32.xlu1 %v2943_v52, %s3257_s26  ;;  %2329 = vrot.lane.b32.xlu0 %v2187_v20, %s3232_s28  ;;  %v2210_v52 = vrot.slane %v2199_v12, %v3627_v37 }
 0xd9b   :  { %2284 = vrot.lane.b32.xlu1 %v2168_v5, %s3249_s2  ;;  %2214 = vrot.lane.b32.xlu0 %v2139_v48, %s3257_s26  ;;  %v2222_v5 = vrot.slane %v2199_v12, %v3621_v34 }
 0xd9f   :  { %2237 = vrot.lane.b32.xlu0 %v2944_v61, %s3258_s29 }
 0xda3   :  { %2307 = vrot.lane.b32.xlu0 %v2952_v56, %s3243_s24 }
 0xdeb   :  { %v2203_v6 = vpop.permute.xlu1 %2202 }
 0xdec   :  { %v2206_v19 = vsel %vm2205_vm5, %v2203_v6, 0.0  ;;  %v2303_v6 = vrot.slane %v3911_v14, %v3623_v35 }
 0xded   :  { %v2211_v37 = vmul.f32 %v2210_v52, %v2206_v19 }
 0xdf3   :  { %v2250_v46 = vpop.permute.xlu1 %2249 }
 0xdf4   :  { %v2253_v17 = vsel %vm2252_vm3, %v2250_v46, 0.0  ;;  %v2297_v46 = vrot.slane %v3911_v14, %v3621_v34  ;;  %v2304_v14 = vmul.f32 %v3879_v26, %v2303_v6 }
 0xdf5   :  { %v2274_v51 = vpop.permute.xlu0 %2273  ;;  %v2258_v2 = vmul.f32 %v2257_v15, %v2253_v17 }
 0xdf6   :  { %v2276_v22 = vsel %vm444_vm1, 0.0, %v2274_v51  ;;  %v2298_v34 = vmul.f32 %v2297_v46, %v3890_v63 }
 0xdf7   :  { %v2281_v0 = vmul.f32 %v2280_v24, %v2276_v22  ;;  %v2271_v39 = vadd.f32 %v2270_v29, %v2258_v2 }
 0xdf9   :  { %v2282_v47 = vadd.f32 %v2281_v0, %v2264_v31 }
 0xe01   :  { %v2341_v13 = vpop.permute.xlu1 %2340 }
 0xe02   :  { %v2343_v44 = vsel %vm487_vm8, 0.0, %v2341_v13 }
 0xe03   :  { %v2348_v41 = vmul.f32 %v2347_v50, %v2343_v44 }
 0xe05   :  { %v2319_v3 = vpop.permute.xlu1 %2318  ;;  %v2352_v32 = vpop.permute.xlu0 %2351 }
 0xe06   :  { %v2321_v57 = vsel %vm474_vm7, 0.0, %v2319_v3  ;;  %v2354_v54 = vsel %vm1902_vm15, 0.0, %v2352_v32  ;;  %vm2500_vm7 = vcmask 138240  }
 0xe07   :  { %v2326_v18 = vmul.f32 %v2325_v27, %v2321_v57  ;;  %v2359_v61 = vmul.f32 %v2358_v42, %v2354_v54 }
 0xe09   :  { %v2227_v43 = vpop.permute.xlu1 %2226  ;;  %v2330_v7 = vpop.permute.xlu0 %2329  ;;  %v2327_v30 = vadd.f32 %v2326_v18, %v2271_v39 }
 0xe0a   :  { %v2332_v8 = vsel %vm487_vm8, 0.0, %v2330_v7  ;;  %v2229_v49 = vsel %vm2217_vm4, %v2227_v43, 0.0 }
 0xe0b   :  { %v2337_v33 = vmul.f32 %v2336_v55, %v2332_v8  ;;  %v2349_v56 = vadd.f32 %v2348_v41, %v2327_v30  ;;  %v2234_v45 = vmul.f32 %v2233_v11, %v2229_v49 }
 0xe0d   :  { %v2338_v48 = vadd.f32 %v2337_v33, %v2282_v47  ;;  %v2285_v36 = vpop.permute.xlu1 %2284  ;;  %v2215_v21 = vpop.permute.xlu0 %2214  ;;  %v2235_v24 = vadd.f32 %v2234_v45, %v2211_v37 }
 0xe0e   :  { %v2287_v53 = vsel %vm2252_vm3, %v2285_v36, 0.0  ;;  %v2218_v20 = vsel %vm2217_vm4, %v2215_v21, 0.0 }
 0xe0f   :  { %v2360_v4 = vadd.f32 %v2359_v61, %v2338_v48  ;;  %v2292_v15 = vmul.f32 %v2291_v10, %v2287_v53  ;;  %v2223_v27 = vmul.f32 %v2222_v5, %v2218_v20 }
 0xe11   :  { %v2238_v51 = vpop.permute.xlu0 %2237  ;;  %v2361_v13 = vpack.c.bf16 %v2349_v56, %v2360_v4  ;;  %v2293_v12 = vadd.f32 %v2292_v15, %v2235_v24 }
 0xe12   :  { %v2241_v17 = vsel %vm2240_vm6, %v2238_v51, 0.0 }
 0xe13   :  { %v2246_v22 = vmul.f32 %v2245_v60, %v2241_v17  ;;  %2509 = vrot.lane.b32.xlu1 %v2361_v13, %s3235_s21  ;;  %2767 = vmatmul.mubr.msk.bf16.vlgmr.msra.gmra.mxu0 %vm1988_vm0, %v2361_v13  ;;  %v2305_v32 = vadd.f32 %v2304_v14, %v2293_v12 }
 0xe14   :  { %2459 = vmatprep.mubr.bf16.mxu0 %v3246_v25  ;;  %2528 = vmatpush1.bf16.msra.mxu0 %v3873_v16 }
 0xe15   :  { %v2247_v40 = vadd.f32 %v2246_v22, %v2223_v27  ;;  %v2308_v35 = vpop.permute.xlu0 %2307  ;;  %2529 = vmatprep.subr.bf16.mxu0 %v3877_v59  ;;  %v3260_v27 = vmov -1.0  }
 0xe16   :  { %v2310_v38 = vsel %vm444_vm1, 0.0, %v2308_v35 }
 0xe17   :  { %v2299_v2 = vadd.f32 %v2298_v34, %v2247_v40  ;;  %v2315_v3 = vmul.f32 %v2314_v62, %v2310_v38 }
 0xe18   :  { %2530 = vmatpush1.bf16.msra.mxu0 %v3881_v23 }
 0xe19   :  { %v2316_v57 = vadd.f32 %v2315_v3, %v2299_v2  ;;  %2531 = vmatprep.subr.bf16.mxu0 %v3885_v9 }
 0xe1b   :  { %v2362_v16 = vpack.c.bf16 %v2305_v32, %v2316_v57 }
 0xe1c   :  { %2532 = vmatpush1.bf16.msra.mxu0 %v3887_v28 }
 0xe1d   :  { %2511 = vrot.lane.b32.xlu0 %v2362_v16, %s3235_s21  ;;  %2768 = vmatmul.mubr.msk.bf16.gmra.mxu0 %vm1988_vm0, %v2362_v16 }
 0xe1e   :  { %2533 = vmatprep.subr.bf16.mxu0 %v3893_v1  ;;  %2551 = vmatprep.mubr.bf16.mxu0 %v3246_v25 }
 0xe20   :  { %2534 = vmatpush1.bf16.msra.mxu0 %v3895_v58 }
 0xe85   :  { %v2510_v59 = vpop.permute.xlu1 %2509 }
 0xe86   :  { %2769 = vmatmul.mubr.msk.bf16.vlgmr.msra.gmra.mxu0 %vm1988_vm0, %v2510_v59 }
 0xe87   :  { %2561 = vmatprep.mubr.bf16.mxu0 %v3246_v25 }
 0xe8f   :  { %v2512_v26 = vpop.permute.xlu0 %2511 }
 0xe90   :  { %2770 = vmatmul.mubr.msk.bf16.gmra.mxu0 %vm1988_vm0, %v2512_v26 }
 0xed3   :  { %v2451_v23 = vpop.f32.mrf.mxu0 }
 0xed5   :  { %v2453_v9 = vpop.f32.mrf.mxu0 }
 0xed7   :  { %v2455_v28 = vpop.f32.mrf.mxu0 }
 0xed8   :  { %2472 = vrot.lane.b32.xlu1 %v2455_v28, %s3243_s24 }
 0xed9   :  { %v2457_v63 = vpop.f32.mrf.mxu0 }
 0xeda   :  { %2474 = vrot.lane.b32.xlu0 %v2457_v63, %s3243_s24 }
 0xedd   :  { %v2461_v1 = vpop.f32.mrf.mxu0 }
 0xede   :  { %2484 = vrot.lane.b32.xlu1 %v2461_v1, %s3251_s5 }
 0xedf   :  { %v2463_v58 = vpop.f32.mrf.mxu0 }
 0xee0   :  { %2486 = vrot.lane.b32.xlu0 %v2463_v58, %s3251_s5 }
 0xee1   :  { %v2465_v29 = vpop.f32.mrf.mxu0 }
 0xee2   :  { %2496 = vrot.lane.b32.xlu1 %v2465_v29, %s3259_s15 }
 0xee3   :  { %v2467_v25 = vpop.f32.mrf.mxu0 }
 0xee4   :  { %2498 = vrot.lane.b32.xlu0 %v2467_v25, %s3259_s15 }
 0xf46   :  { %v3971_v0 = vpop.f32.mrf.mxu0 }
 0xf48   :  { %v3973_v18 = vpop.f32.mrf.mxu0 }
 0xf4a   :  { %v2557_v55 = vpop.f32.mrf.mxu0  ;;  %v2473_v50 = vpop.permute.xlu1 %2472 }
 0xf4b   :  { %2574 = vrot.lane.b32.xlu1 %v2557_v55, %s3243_s24  ;;  %v2479_v42 = vsel %vm444_vm1, 0.0, %v2473_v50 }
 0xf4c   :  { %v2559_v31 = vpop.f32.mrf.mxu0  ;;  %v2475_v39 = vpop.permute.xlu0 %2474  ;;  %v2480_v8 = vadd.f32 %v2479_v42, %v2451_v23 }
 0xf4d   :  { %2576 = vrot.lane.b32.xlu0 %v2559_v31, %s3243_s24  ;;  %v2476_v44 = vsel %vm444_vm1, %v2473_v50, %v2475_v39 }
 0xf4e   :  { %v2481_v33 = vadd.f32 %v2476_v44, %v2453_v9 }
 0xf50   :  { %v2485_v43 = vpop.permute.xlu1 %2484  ;;  %v2563_v7 = vpop.f32.mrf.mxu0 }
 0xf51   :  { %v2491_v54 = vsel %vm1421_vm10, 0.0, %v2485_v43  ;;  %2586 = vrot.lane.b32.xlu1 %v2563_v7, %s3251_s5 }
 0xf52   :  { %v2487_v47 = vpop.permute.xlu0 %2486  ;;  %v2565_v30 = vpop.f32.mrf.mxu0  ;;  %v2492_v52 = vadd.f32 %v2491_v54, %v2480_v8 }
 0xf53   :  { %v2488_v11 = vsel %vm1421_vm10, %v2485_v43, %v2487_v47  ;;  %2588 = vrot.lane.b32.xlu0 %v2565_v30, %s3251_s5 }
 0xf54   :  { %v2497_v49 = vpop.permute.xlu1 %2496  ;;  %v2567_v41 = vpop.f32.mrf.mxu0  ;;  %v2493_v48 = vadd.f32 %v2488_v11, %v2481_v33 }
 0xf55   :  { %v2504_v61 = vsel %vm2500_vm7, 0.0, %v2497_v49  ;;  %2598 = vrot.lane.b32.xlu1 %v2567_v41, %s3259_s15 }
 0xf56   :  { %v2505_v10 = vadd.f32 %v2504_v61, %v2492_v52  ;;  %v2499_v36 = vpop.permute.xlu0 %2498  ;;  %v2569_v21 = vpop.f32.mrf.mxu0 }
 0xf57   :  { %v2501_v19 = vsel %vm2500_vm7, %v2497_v49, %v2499_v36  ;;  %2600 = vrot.lane.b32.xlu0 %v2569_v21, %s3259_s15 }
 0xf58   :  { %v2608_v53 = vand.u32 2147483647, %v2505_v10  ;;  %v2506_v5 = vadd.f32 %v2501_v19, %v2493_v48  ;;  %vm2624_vm8 = vcmp.ge.f32.partialorder %v2505_v10, 0.0 }
 0xf59   :  { %v2628_v22 = vsel %vm2624_vm8, 1.0, %v3260_v27 }
 0xf5a   :  { %v2612_v56 = vmul.f32 -2.0, %v2608_v53  ;;  %v2609_v45 = vand.u32 2147483647, %v2506_v5  ;;  %vm2625_vm9 = vcmp.ge.f32.partialorder %v2506_v5, 0.0 }
 0xf5b   :  { %v2629_v40 = vsel %vm2625_vm9, 1.0, %v3260_v27 }
 0xf5c   :  { %v2616_v4 = vmul.f32 1.442695, %v2612_v56  ;;  %v2613_v60 = vmul.f32 -2.0, %v2609_v45 }
 0xf5e   :  { %3066 = vpow2.f32 %v2616_v4  ;;  %v2618_v20 = vmul.f32 1.442695, %v2613_v60 }
 0xf60   :  { %3068 = vpow2.f32 %v2618_v20 }
 0xf6b   :  { %v3067_v46 = vpop.eup %3066 }
 0xf6c   :  { %v2636_v37 = vadd.f32 1.0, %v3067_v46  ;;  %v2632_v13 = vsub.f32 1.0, %v3067_v46 }
 0xf6d   :  { %v3069_v15 = vpop.eup %3068 }
 0xf6e   :  { %3070 = vrcp.f32 %v2636_v37  ;;  %v2637_v51 = vadd.f32 1.0, %v3069_v15  ;;  %v2633_v62 = vsub.f32 1.0, %v3069_v15 }
 0xf70   :  { %3072 = vrcp.f32 %v2637_v51 }
 0xf7b   :  { %v3071_v6 = vpop.eup %3070 }
 0xf7c   :  { %v2644_v17 = vmul.f32 %v3071_v6, %v2632_v13 }
 0xf7d   :  { %v3073_v24 = vpop.eup %3072 }
 0xf7e   :  { %v2648_v34 = vmul.f32 %v2644_v17, %v2628_v22  ;;  %v2645_v12 = vmul.f32 %v3073_v24, %v2633_v62 }
 0xf80   :  { %2652 = vst [vmem:[%s4024_s17] sm:$0xff] %v2648_v34  ;;  %v2649_v35 = vmul.f32 %v2645_v12, %v2629_v40 }
 0xf82   :  { %2653 = vst [vmem:[%s4024_s17 + $0x8] sm:$0xff] %v2649_v35 }
 0xfbd   :  { %v2575_v38 = vpop.permute.xlu1 %2574 }
 0xfbe   :  { %v2581_v2 = vsel %vm444_vm1, 0.0, %v2575_v38 }
 0xfbf   :  { %v2577_v14 = vpop.permute.xlu0 %2576  ;;  %v2582_v16 = vadd.f32 %v2581_v2, %v3971_v0 }
 0xfc0   :  { %v2578_v32 = vsel %vm444_vm1, %v2575_v38, %v2577_v14 }
 0xfc1   :  { %v2583_v23 = vadd.f32 %v2578_v32, %v3973_v18 }
 0xfc3   :  { %v2587_v3 = vpop.permute.xlu1 %2586 }
 0xfc4   :  { %v2593_v57 = vsel %vm1421_vm10, 0.0, %v2587_v3 }
 0xfc5   :  { %v2589_v59 = vpop.permute.xlu0 %2588  ;;  %v2594_v9 = vadd.f32 %v2593_v57, %v2582_v16 }
 0xfc6   :  { %v2590_v26 = vsel %vm1421_vm10, %v2587_v3, %v2589_v59 }
 0xfc7   :  { %v2599_v28 = vpop.permute.xlu1 %2598  ;;  %v2595_v1 = vadd.f32 %v2590_v26, %v2583_v23 }
 0xfc8   :  { %v2605_v63 = vsel %vm2500_vm7, 0.0, %v2599_v28 }
 0xfc9   :  { %v2606_v58 = vadd.f32 %v2605_v63, %v2594_v9  ;;  %v2601_v29 = vpop.permute.xlu0 %2600 }
 0xfca   :  { %v2602_v25 = vsel %vm2500_vm7, %v2599_v28, %v2601_v29 }
 0xfcb   :  { %v2610_v55 = vand.u32 2147483647, %v2606_v58  ;;  %v2607_v50 = vadd.f32 %v2602_v25, %v2595_v1  ;;  %vm2626_vm1 = vcmp.ge.f32.partialorder %v2606_v58, 0.0 }
 0xfcc   :  { %v2630_v52 = vsel %vm2626_vm1, 1.0, %v3260_v27 }
 0xfcd   :  { %v2614_v31 = vmul.f32 -2.0, %v2610_v55  ;;  %v2611_v39 = vand.u32 2147483647, %v2607_v50  ;;  %vm2627_vm10 = vcmp.ge.f32.partialorder %v2607_v50, 0.0 }
 0xfce   :  { %v2631_v61 = vsel %vm2627_vm10, 1.0, %v3260_v27 }
 0xfcf   :  { %v2620_v42 = vmul.f32 1.442695, %v2614_v31  ;;  %v2615_v0 = vmul.f32 -2.0, %v2611_v39 }
 0xfd1   :  { %3074 = vpow2.f32 %v2620_v42  ;;  %v2622_v43 = vmul.f32 1.442695, %v2615_v0 }
 0xfd3   :  { %3076 = vpow2.f32 %v2622_v43 }
 0xfde   :  { %v3075_v7 = vpop.eup %3074 }
 0xfdf   :  { %v2638_v18 = vadd.f32 1.0, %v3075_v7  ;;  %v2634_v8 = vsub.f32 1.0, %v3075_v7 }
 0xfe0   :  { %v3077_v44 = vpop.eup %3076 }
 0xfe1   :  { %3078 = vrcp.f32 %v2638_v18  ;;  %v2639_v54 = vadd.f32 1.0, %v3077_v44  ;;  %v2635_v11 = vsub.f32 1.0, %v3077_v44 }
 0xfe3   :  { %3080 = vrcp.f32 %v2639_v54 }
 0xfee   :  { %v3079_v47 = vpop.eup %3078 }
 0xfef   :  { %v2646_v30 = vmul.f32 %v3079_v47, %v2634_v8 }
 0xff0   :  { %v3081_v33 = vpop.eup %3080 }
 0xff1   :  { %v2650_v49 = vmul.f32 %v2646_v30, %v2630_v52  ;;  %v2647_v41 = vmul.f32 %v3081_v33, %v2635_v11 }
 0xff3   :  { %2654 = vst [vmem:[%s4024_s17 + $0x10] sm:$0xff] %v2650_v49  ;;  %v2651_v48 = vmul.f32 %v2647_v41, %v2631_v61 }
 0xff5   :  { %2655 = vst [vmem:[%s4024_s17 + $0x18] sm:$0xff] %v2651_v48 }
 0xff6   :  { %2660 = vsyncpa [#allocation3], 1 }
 0xff7   :  { %2661 = vsyncpa [#allocation5], 1 }
 0xff8   :  { %2662 = vsyncpa [#allocation8], 1 }
 0xff9   :  { %2663 = vsyncpa [#allocation11], 1 }

</bundles_post_ra>
